<compile_context>
chip_gen: v7x
topology: tpu7x:2x2x1
jax: 0.10.0
libtpu: 0.0.40
codegen_flags: <defaults>
</compile_context>

<pallas_src>
import functools

import numpy as np
import jax
import jax.numpy as jnp
from jax.experimental import pallas as pl
from jax.experimental.pallas import tpu as pltpu


def _round_up(x, m):
    return (x + m - 1) // m * m


# ----------------------------------------------------------------------------
# Fused kernel: [GRU layer 0 .. n_layers-1] + Linear head, all VMEM/vreg
# resident.  No scratch buffers, no per-step stores.
# ----------------------------------------------------------------------------
def make_fused_kernel(n_layers, T, B_pad, G):
    """Ref layout (all f32):
       inputs : x           (B_pad, in_pad)
                layer 0    : W0_all (in_pad, T*3G), Wh0 (G, 3G),
                             bproj0 (1, T*3G),      bhn0 (1, G)
                layer l>=1 : Wi (G, 3G), Wh (G, 3G), bproj (1, 3G), bhn (1, G)
                head       : fcw (G, out_pad), fcb (1, out_pad)
       output : out (B_pad, T*out_pad)   -- batch-major, lane-dense
    """

    def kernel(*refs):
        x_ref = refs[0]
        fcw_ref, fcb_ref, out_ref = refs[-3], refs[-2], refs[-1]

        def gru_steps(get_xp, wh, bhn_b):
            # Serial recurrence; h and every h_t stay as SSA values (no scratch
            # stores on the critical path).  For large T, switch to
            # lax.fori_loop(..., unroll=4..8) carrying h and chunk get_xp.
            h = jnp.zeros((B_pad, G), dtype=jnp.float32)
            hs = []
            for t in range(T):                               # static -> unrolled
                xp = get_xp(t)                               # (B_pad, 3G)
                hp = jnp.dot(h, wh, preferred_element_type=jnp.float32)
                r = jax.nn.sigmoid(xp[:, 0:G] + hp[:, 0:G])
                z = jax.nn.sigmoid(xp[:, G:2 * G] + hp[:, G:2 * G])
                n = jnp.tanh(xp[:, 2 * G:3 * G]
                             + r * (hp[:, 2 * G:3 * G] + bhn_b))
                h = (1.0 - z) * n + z * h
                hs.append(h)
            return hs

        # ---- Layer 0: repeat_interleave glue folded into per-step weights ----
        w0_all = refs[1][...]                                # (in_pad, T*3G)
        wh0 = refs[2][...]                                   # (G, 3G)
        bproj0 = refs[3][...]                                # (1, T*3G)
        bhn0_b = jnp.broadcast_to(refs[4][...], (B_pad, G))  # hoisted broadcast

        # One wide matmul yields every timestep's input projection with the
        # r/z/n biases already folded in; gate blocks are 128-lane aligned.
        xproj0 = (jnp.dot(x_ref[...], w0_all,
                          preferred_element_type=jnp.float32) + bproj0)
        hs = gru_steps(lambda t: xproj0[:, t * 3 * G:(t + 1) * 3 * G],
                       wh0, bhn0_b)

        # ---- Layers 1 .. n_layers-1 ----
        for layer in range(1, n_layers):
            base = 1 + 4 * layer
            wi = refs[base][...]                             # (G, 3G)
            wh = refs[base + 1][...]                         # (G, 3G)
            bproj = refs[base + 2][...]                      # (1, 3G)
            bhn_b = jnp.broadcast_to(refs[base + 3][...], (B_pad, G))

            # Free concat: every piece is a whole (8,128) tile (time-major).
            seq = jnp.concatenate(hs, axis=0)                # (T*B_pad, G)
            xproj = (jnp.dot(seq, wi,
                             preferred_element_type=jnp.float32) + bproj)
            hs = gru_steps(lambda t: xproj[t * B_pad:(t + 1) * B_pad, :],
                           wh, bhn_b)

        # ---- Linear head, emitted batch-major: out[b, t*out_pad + c] ----
        fcw = fcw_ref[...]
        fcb = fcb_ref[...]
        outs = [jnp.dot(h_t, fcw, preferred_element_type=jnp.float32) + fcb
                for h_t in hs]
        # Lane concat of 128-aligned blocks -> one lane-dense (B_pad, T*128)
        # store; the wrapper only needs a free reshape + final slice.
        out_ref[...] = jnp.concatenate(outs, axis=1)

    return kernel


# ----------------------------------------------------------------------------
# One-time parameter packing (PyTorch layout -> lane-aligned kernel layout).
# ----------------------------------------------------------------------------
def pack_params(gru_params, fc_w, fc_b, window_size):
    """gru_params: list of (w_ih (3H,in_f), w_hh (3H,H), b_ih (3H,), b_hh (3H,))
       fc_w: (out_dim, H), fc_b: (out_dim,)
       Returns a flat tuple in kernel-ref order (depends on window_size)."""
    T = int(window_size)
    H = int(np.asarray(gru_params[0][1]).shape[1])
    G = _round_up(H, 128)                     # lane-aligned per-gate width
    in_dim = int(np.asarray(gru_params[0][0]).shape[1])
    in_pad = _round_up(in_dim, 128)
    out_dim = int(np.asarray(fc_w).shape[0])
    out_pad = _round_up(out_dim, 128)

    def gate_align(w_t, rows_pad):
        # w_t: (rows, 3H) [r|z|n] -> (rows_pad, 3G); each gate 128-lane aligned,
        # padding exactly zero so padded lanes stay zero through the gates.
        rows = w_t.shape[0]
        out = np.zeros((rows_pad, 3 * G), np.float32)
        for g in range(3):
            out[:rows, g * G:g * G + H] = w_t[:, g * H:(g + 1) * H]
        return out

    flat = []
    for layer, (w_ih, w_hh, b_ih, b_hh) in enumerate(gru_params):
        w_ih = np.asarray(w_ih, np.float32)
        w_hh = np.asarray(w_hh, np.float32)
        b_ih = np.asarray(b_ih, np.float32)
        b_hh = np.asarray(b_hh, np.float32)

        wh_ga = gate_align(w_hh.T, G)                        # (G, 3G)
        bproj = np.zeros((1, 3 * G), np.float32)             # [b_ir+b_hr | b_iz+b_hz | b_in]
        bproj[0, 0:H] = b_ih[0:H] + b_hh[0:H]
        bproj[0, G:G + H] = b_ih[H:2 * H] + b_hh[H:2 * H]
        bproj[0, 2 * G:2 * G + H] = b_ih[2 * H:3 * H]
        bhn = np.zeros((1, G), np.float32)
        bhn[0, :H] = b_hh[2 * H:3 * H]

        if layer == 0:
            # Fold x.repeat_interleave(T, dim=1).view(B, T, in_dim) into the
            # per-timestep input weights: seq0[b,t,f] = x[b, (t*in_dim+f)//T],
            # so x @ W0_all[:, t-block] == seq0[:, t, :] @ W_ih^T (gate-aligned).
            wi_ga = gate_align(w_ih.T, in_dim)               # (in_dim, 3G)
            w0_all = np.zeros((in_pad, T * 3 * G), np.float32)
            for t in range(T):
                for f in range(in_dim):
                    j = (t * in_dim + f) // T                # source feature of x
                    w0_all[j, t * 3 * G:(t + 1) * 3 * G] += wi_ga[f, :]
            bproj0 = np.tile(bproj, (1, T))                  # (1, T*3G)
            flat += [w0_all, wh_ga, bproj0, bhn]
        else:
            wi_ga = gate_align(w_ih.T, G)                    # (G, 3G)
            flat += [wi_ga, wh_ga, bproj, bhn]

    fcw_pad = np.zeros((G, out_pad), np.float32)
    fcw_pad[:H, :out_dim] = np.asarray(fc_w, np.float32).T
    fcb_pad = np.zeros((1, out_pad), np.float32)
    fcb_pad[0, :out_dim] = np.asarray(fc_b, np.float32)
    flat += [fcw_pad, fcb_pad]
    return tuple(jnp.asarray(p) for p in flat)


# ----------------------------------------------------------------------------
# Forward wrapper (single pallas_call; minimal XLA glue around it).
# ----------------------------------------------------------------------------
@functools.partial(jax.jit, static_argnames=("window_size", "out_dim"))
def reconstruction_model_forward(x, flat_params, window_size, out_dim):
    """x: (B, in_dim) latent. Returns (B, window_size, out_dim)."""
    B, in_dim = x.shape
    T = window_size
    n_layers = (len(flat_params) - 2) // 4
    in_pad = flat_params[0].shape[0]          # rows of W0_all
    G = flat_params[1].shape[0]               # rows of Wh0 (lane-padded hidden)
    out_pad = flat_params[-2].shape[1]        # cols of padded fc weight
    B_pad = _round_up(max(B, 1), 8)           # sublane quantum

    # The only wrapper op before the kernel: zero-pad x to (B_pad, in_pad).
    x_pad = jnp.pad(x.astype(jnp.float32),
                    ((0, B_pad - B), (0, in_pad - in_dim)))

    vmem = pl.BlockSpec(memory_space=pltpu.MemorySpace.VMEM)
    out_flat = pl.pallas_call(
        make_fused_kernel(n_layers, T, B_pad, G),
        out_shape=jax.ShapeDtypeStruct((B_pad, T * out_pad), jnp.float32),
        in_specs=[vmem] * (1 + len(flat_params)),
        out_specs=vmem,
        # NOTE(v7x): for large batches add a batch grid with
        # dimension_semantics=("parallel",) (second TensorCore) and set
        # vmem_limit_bytes / chunk xproj; unnecessary at these shapes.
    )(x_pad, *flat_params)

    # Rows are already batch-major: free reshape + final batch/feature slice.
    out = out_flat.reshape(B_pad, T, out_pad)[:B, :, :out_dim]
    return out


# ----------------------------------------------------------------------------
# Deterministic parameter init (PyTorch-style uniform(-1/sqrt(H), 1/sqrt(H))).
# ----------------------------------------------------------------------------
def init_params(key, in_dim, hid_dim, out_dim, n_layers):
    k = 1.0 / jnp.sqrt(jnp.float32(hid_dim))
    gru_params = []
    for layer in range(n_layers):
        layer_in = in_dim if layer == 0 else hid_dim
        key, k1, k2, k3, k4 = jax.random.split(key, 5)
        w_ih = jax.random.uniform(k1, (3 * hid_dim, layer_in), jnp.float32, -k, k)
        w_hh = jax.random.uniform(k2, (3 * hid_dim, hid_dim), jnp.float32, -k, k)
        b_ih = jax.random.uniform(k3, (3 * hid_dim,), jnp.float32, -k, k)
        b_hh = jax.random.uniform(k4, (3 * hid_dim,), jnp.float32, -k, k)
        gru_params.append((w_ih, w_hh, b_ih, b_hh))
    key, k5, k6 = jax.random.split(key, 3)
    fc_w = jax.random.uniform(k5, (out_dim, hid_dim), jnp.float32, -k, k)
    fc_b = jax.random.uniform(k6, (out_dim,), jnp.float32, -k, k)
    return gru_params, fc_w, fc_b


# ----------------------------------------------------------------------------
# Pure-JAX mirror of the PyTorch module (eval mode) for verification.
# ----------------------------------------------------------------------------
def reference_forward(x, gru_params, fc_w, fc_b, window_size):
    B, in_dim = x.shape
    T = window_size
    seq = jnp.repeat(x, T, axis=1).reshape(B, T, in_dim)  # repeat_interleave+view
    for (w_ih, w_hh, b_ih, b_hh) in gru_params:
        H = w_hh.shape[1]
        h = jnp.zeros((B, H), jnp.float32)
        outs = []
        for t in range(T):
            gi = seq[:, t, :] @ w_ih.T + b_ih
            gh = h @ w_hh.T + b_hh
            r = jax.nn.sigmoid(gi[:, :H] + gh[:, :H])
            z = jax.nn.sigmoid(gi[:, H:2 * H] + gh[:, H:2 * H])
            n = jnp.tanh(gi[:, 2 * H:] + r * gh[:, 2 * H:])
            h = (1.0 - z) * n + z * h
            outs.append(h)
        seq = jnp.stack(outs, axis=1)
    return seq @ fc_w.T + fc_b


if __name__ == "__main__":
    # Small shapes consistent with the module.
    batch = 2
    window_size = 8
    in_dim = 4        # latent / input feature size
    hid_dim = 32
    out_dim = 4
    n_layers = 2      # dropout = 0.0 (eval semantics)

    key = jax.random.PRNGKey(0)
    key, kx = jax.random.split(key)
    gru_params, fc_w, fc_b = init_params(key, in_dim, hid_dim, out_dim, n_layers)

    # Pack / lane-align / fold weights exactly once (not per forward call).
    flat_params = pack_params(gru_params, fc_w, fc_b, window_size)

    x = jax.random.normal(kx, (batch, in_dim), dtype=jnp.float32)

    out = reconstruction_model_forward(x, flat_params,
                                       window_size=window_size, out_dim=out_dim)
    out = jax.block_until_ready(out)

    assert out.shape == (batch, window_size, out_dim), out.shape
    assert bool(jnp.all(jnp.isfinite(out)))

    # Numerical parity with the pure-JAX mirror of the PyTorch module.
    ref = reference_forward(x, gru_params, fc_w, fc_b, window_size)
    assert bool(jnp.allclose(out, ref, atol=1e-4, rtol=1e-4)), \
        float(jnp.max(jnp.abs(out - ref)))

    print("KERNEL_OK")
</pallas_src>

<mosaic_0001>
module attributes {stable_mosaic.version = 11 : i64} {
  func.func @kernel(%arg0: memref<8x128xf32, #tpu.memory_space<vmem>>, %arg1: memref<128x3072xf32, #tpu.memory_space<vmem>>, %arg2: memref<128x384xf32, #tpu.memory_space<vmem>>, %arg3: memref<1x3072xf32, #tpu.memory_space<vmem>>, %arg4: memref<1x128xf32, #tpu.memory_space<vmem>>, %arg5: memref<128x384xf32, #tpu.memory_space<vmem>>, %arg6: memref<128x384xf32, #tpu.memory_space<vmem>>, %arg7: memref<1x384xf32, #tpu.memory_space<vmem>>, %arg8: memref<1x128xf32, #tpu.memory_space<vmem>>, %arg9: memref<128x128xf32, #tpu.memory_space<vmem>>, %arg10: memref<1x128xf32, #tpu.memory_space<vmem>>, %arg11: memref<8x1024xf32, #tpu.memory_space<vmem>>) attributes {dimension_semantics = [], scalar_prefetch = 0 : i64, scratch_operands = 0 : i64, tpu.core_type = #tpu.core_type<tc>} {
    %c0 = arith.constant 0 : index
    %c0_0 = arith.constant 0 : index
    %0 = vector.load %arg1[%c0, %c0_0] : memref<128x3072xf32, #tpu.memory_space<vmem>>, vector<128x3072xf32>
    %c0_1 = arith.constant 0 : index
    %c0_2 = arith.constant 0 : index
    %1 = vector.load %arg2[%c0_1, %c0_2] : memref<128x384xf32, #tpu.memory_space<vmem>>, vector<128x384xf32>
    %c0_3 = arith.constant 0 : index
    %c0_4 = arith.constant 0 : index
    %2 = vector.load %arg3[%c0_3, %c0_4] : memref<1x3072xf32, #tpu.memory_space<vmem>>, vector<1x3072xf32>
    %c0_5 = arith.constant 0 : index
    %c0_6 = arith.constant 0 : index
    %3 = vector.load %arg4[%c0_5, %c0_6] : memref<1x128xf32, #tpu.memory_space<vmem>>, vector<1x128xf32>
    %4 = vector.shape_cast %3 : vector<1x128xf32> to vector<1x128xf32>
    %5 = vector.broadcast %4 : vector<1x128xf32> to vector<8x128xf32>
    %c0_7 = arith.constant 0 : index
    %c0_8 = arith.constant 0 : index
    %6 = vector.load %arg0[%c0_7, %c0_8] : memref<8x128xf32, #tpu.memory_space<vmem>>, vector<8x128xf32>
    %cst = arith.constant dense<0.000000e+00> : vector<8x3072xf32>
    %7 = tpu.matmul %6, %0, %cst {dimension_numbers = #tpu.dot_dimension_numbers<[1], [0], [0], [1], [0, 0, 1, 1], [], []>} : vector<8x128xf32>, vector<128x3072xf32>, vector<8x3072xf32> -> vector<8x3072xf32>
    %8 = vector.broadcast %2 : vector<1x3072xf32> to vector<8x3072xf32>
    %9 = arith.addf %7, %8 : vector<8x3072xf32>
    %cst_9 = arith.constant 0.000000e+00 : f32
    %10 = vector.broadcast %cst_9 : f32 to vector<8x128xf32>
    %11 = vector.extract_strided_slice %9 {offsets = [0, 0], sizes = [8, 384], strides = [1, 1]} : vector<8x3072xf32> to vector<8x384xf32>
    %cst_10 = arith.constant dense<0.000000e+00> : vector<8x384xf32>
    %12 = tpu.matmul %10, %1, %cst_10 {dimension_numbers = #tpu.dot_dimension_numbers<[1], [0], [0], [1], [0, 0, 1, 1], [], []>} : vector<8x128xf32>, vector<128x384xf32>, vector<8x384xf32> -> vector<8x384xf32>
    %13 = vector.extract_strided_slice %11 {offsets = [0, 0], sizes = [8, 128], strides = [1, 1]} : vector<8x384xf32> to vector<8x128xf32>
    %14 = vector.extract_strided_slice %12 {offsets = [0, 0], sizes = [8, 128], strides = [1, 1]} : vector<8x384xf32> to vector<8x128xf32>
    %15 = arith.addf %13, %14 : vector<8x128xf32>
    %16 = arith.negf %15 : vector<8x128xf32>
    %17 = math.exp %16 : vector<8x128xf32>
    %cst_11 = arith.constant 1.000000e+00 : f32
    %18 = vector.broadcast %cst_11 : f32 to vector<8x128xf32>
    %19 = arith.addf %18, %17 : vector<8x128xf32>
    %20 = arith.divf %18, %19 : vector<8x128xf32>
    %21 = vector.extract_strided_slice %11 {offsets = [0, 128], sizes = [8, 128], strides = [1, 1]} : vector<8x384xf32> to vector<8x128xf32>
    %22 = vector.extract_strided_slice %12 {offsets = [0, 128], sizes = [8, 128], strides = [1, 1]} : vector<8x384xf32> to vector<8x128xf32>
    %23 = arith.addf %21, %22 : vector<8x128xf32>
    %24 = arith.negf %23 : vector<8x128xf32>
    %25 = math.exp %24 : vector<8x128xf32>
    %cst_12 = arith.constant 1.000000e+00 : f32
    %26 = vector.broadcast %cst_12 : f32 to vector<8x128xf32>
    %27 = arith.addf %26, %25 : vector<8x128xf32>
    %28 = arith.divf %26, %27 : vector<8x128xf32>
    %29 = vector.extract_strided_slice %11 {offsets = [0, 256], sizes = [8, 128], strides = [1, 1]} : vector<8x384xf32> to vector<8x128xf32>
    %30 = vector.extract_strided_slice %12 {offsets = [0, 256], sizes = [8, 128], strides = [1, 1]} : vector<8x384xf32> to vector<8x128xf32>
    %31 = arith.addf %30, %5 : vector<8x128xf32>
    %32 = arith.mulf %20, %31 : vector<8x128xf32>
    %33 = arith.addf %29, %32 : vector<8x128xf32>
    %34 = math.tanh %33 : vector<8x128xf32>
    %cst_13 = arith.constant 1.000000e+00 : f32
    %35 = vector.broadcast %cst_13 : f32 to vector<8x128xf32>
    %36 = arith.subf %35, %28 : vector<8x128xf32>
    %37 = arith.mulf %36, %34 : vector<8x128xf32>
    %38 = arith.mulf %28, %10 : vector<8x128xf32>
    %39 = arith.addf %37, %38 : vector<8x128xf32>
    %40 = vector.extract_strided_slice %9 {offsets = [0, 384], sizes = [8, 384], strides = [1, 1]} : vector<8x3072xf32> to vector<8x384xf32>
    %cst_14 = arith.constant dense<0.000000e+00> : vector<8x384xf32>
    %41 = tpu.matmul %39, %1, %cst_14 {dimension_numbers = #tpu.dot_dimension_numbers<[1], [0], [0], [1], [0, 0, 1, 1], [], []>} : vector<8x128xf32>, vector<128x384xf32>, vector<8x384xf32> -> vector<8x384xf32>
    %42 = vector.extract_strided_slice %40 {offsets = [0, 0], sizes = [8, 128], strides = [1, 1]} : vector<8x384xf32> to vector<8x128xf32>
    %43 = vector.extract_strided_slice %41 {offsets = [0, 0], sizes = [8, 128], strides = [1, 1]} : vector<8x384xf32> to vector<8x128xf32>
    %44 = arith.addf %42, %43 : vector<8x128xf32>
    %45 = arith.negf %44 : vector<8x128xf32>
    %46 = math.exp %45 : vector<8x128xf32>
    %cst_15 = arith.constant 1.000000e+00 : f32
    %47 = vector.broadcast %cst_15 : f32 to vector<8x128xf32>
    %48 = arith.addf %47, %46 : vector<8x128xf32>
    %49 = arith.divf %47, %48 : vector<8x128xf32>
    %50 = vector.extract_strided_slice %40 {offsets = [0, 128], sizes = [8, 128], strides = [1, 1]} : vector<8x384xf32> to vector<8x128xf32>
    %51 = vector.extract_strided_slice %41 {offsets = [0, 128], sizes = [8, 128], strides = [1, 1]} : vector<8x384xf32> to vector<8x128xf32>
    %52 = arith.addf %50, %51 : vector<8x128xf32>
    %53 = arith.negf %52 : vector<8x128xf32>
    %54 = math.exp %53 : vector<8x128xf32>
    %cst_16 = arith.constant 1.000000e+00 : f32
    %55 = vector.broadcast %cst_16 : f32 to vector<8x128xf32>
    %56 = arith.addf %55, %54 : vector<8x128xf32>
    %57 = arith.divf %55, %56 : vector<8x128xf32>
    %58 = vector.extract_strided_slice %40 {offsets = [0, 256], sizes = [8, 128], strides = [1, 1]} : vector<8x384xf32> to vector<8x128xf32>
    %59 = vector.extract_strided_slice %41 {offsets = [0, 256], sizes = [8, 128], strides = [1, 1]} : vector<8x384xf32> to vector<8x128xf32>
    %60 = arith.addf %59, %5 : vector<8x128xf32>
    %61 = arith.mulf %49, %60 : vector<8x128xf32>
    %62 = arith.addf %58, %61 : vector<8x128xf32>
    %63 = math.tanh %62 : vector<8x128xf32>
    %cst_17 = arith.constant 1.000000e+00 : f32
    %64 = vector.broadcast %cst_17 : f32 to vector<8x128xf32>
    %65 = arith.subf %64, %57 : vector<8x128xf32>
    %66 = arith.mulf %65, %63 : vector<8x128xf32>
    %67 = arith.mulf %57, %39 : vector<8x128xf32>
    %68 = arith.addf %66, %67 : vector<8x128xf32>
    %69 = vector.extract_strided_slice %9 {offsets = [0, 768], sizes = [8, 384], strides = [1, 1]} : vector<8x3072xf32> to vector<8x384xf32>
    %cst_18 = arith.constant dense<0.000000e+00> : vector<8x384xf32>
    %70 = tpu.matmul %68, %1, %cst_18 {dimension_numbers = #tpu.dot_dimension_numbers<[1], [0], [0], [1], [0, 0, 1, 1], [], []>} : vector<8x128xf32>, vector<128x384xf32>, vector<8x384xf32> -> vector<8x384xf32>
    %71 = vector.extract_strided_slice %69 {offsets = [0, 0], sizes = [8, 128], strides = [1, 1]} : vector<8x384xf32> to vector<8x128xf32>
    %72 = vector.extract_strided_slice %70 {offsets = [0, 0], sizes = [8, 128], strides = [1, 1]} : vector<8x384xf32> to vector<8x128xf32>
    %73 = arith.addf %71, %72 : vector<8x128xf32>
    %74 = arith.negf %73 : vector<8x128xf32>
    %75 = math.exp %74 : vector<8x128xf32>
    %cst_19 = arith.constant 1.000000e+00 : f32
    %76 = vector.broadcast %cst_19 : f32 to vector<8x128xf32>
    %77 = arith.addf %76, %75 : vector<8x128xf32>
    %78 = arith.divf %76, %77 : vector<8x128xf32>
    %79 = vector.extract_strided_slice %69 {offsets = [0, 128], sizes = [8, 128], strides = [1, 1]} : vector<8x384xf32> to vector<8x128xf32>
    %80 = vector.extract_strided_slice %70 {offsets = [0, 128], sizes = [8, 128], strides = [1, 1]} : vector<8x384xf32> to vector<8x128xf32>
    %81 = arith.addf %79, %80 : vector<8x128xf32>
    %82 = arith.negf %81 : vector<8x128xf32>
    %83 = math.exp %82 : vector<8x128xf32>
    %cst_20 = arith.constant 1.000000e+00 : f32
    %84 = vector.broadcast %cst_20 : f32 to vector<8x128xf32>
    %85 = arith.addf %84, %83 : vector<8x128xf32>
    %86 = arith.divf %84, %85 : vector<8x128xf32>
    %87 = vector.extract_strided_slice %69 {offsets = [0, 256], sizes = [8, 128], strides = [1, 1]} : vector<8x384xf32> to vector<8x128xf32>
    %88 = vector.extract_strided_slice %70 {offsets = [0, 256], sizes = [8, 128], strides = [1, 1]} : vector<8x384xf32> to vector<8x128xf32>
    %89 = arith.addf %88, %5 : vector<8x128xf32>
    %90 = arith.mulf %78, %89 : vector<8x128xf32>
    %91 = arith.addf %87, %90 : vector<8x128xf32>
    %92 = math.tanh %91 : vector<8x128xf32>
    %cst_21 = arith.constant 1.000000e+00 : f32
    %93 = vector.broadcast %cst_21 : f32 to vector<8x128xf32>
    %94 = arith.subf %93, %86 : vector<8x128xf32>
    %95 = arith.mulf %94, %92 : vector<8x128xf32>
    %96 = arith.mulf %86, %68 : vector<8x128xf32>
    %97 = arith.addf %95, %96 : vector<8x128xf32>
    %98 = vector.extract_strided_slice %9 {offsets = [0, 1152], sizes = [8, 384], strides = [1, 1]} : vector<8x3072xf32> to vector<8x384xf32>
    %cst_22 = arith.constant dense<0.000000e+00> : vector<8x384xf32>
    %99 = tpu.matmul %97, %1, %cst_22 {dimension_numbers = #tpu.dot_dimension_numbers<[1], [0], [0], [1], [0, 0, 1, 1], [], []>} : vector<8x128xf32>, vector<128x384xf32>, vector<8x384xf32> -> vector<8x384xf32>
    %100 = vector.extract_strided_slice %98 {offsets = [0, 0], sizes = [8, 128], strides = [1, 1]} : vector<8x384xf32> to vector<8x128xf32>
    %101 = vector.extract_strided_slice %99 {offsets = [0, 0], sizes = [8, 128], strides = [1, 1]} : vector<8x384xf32> to vector<8x128xf32>
    %102 = arith.addf %100, %101 : vector<8x128xf32>
    %103 = arith.negf %102 : vector<8x128xf32>
    %104 = math.exp %103 : vector<8x128xf32>
    %cst_23 = arith.constant 1.000000e+00 : f32
    %105 = vector.broadcast %cst_23 : f32 to vector<8x128xf32>
    %106 = arith.addf %105, %104 : vector<8x128xf32>
    %107 = arith.divf %105, %106 : vector<8x128xf32>
    %108 = vector.extract_strided_slice %98 {offsets = [0, 128], sizes = [8, 128], strides = [1, 1]} : vector<8x384xf32> to vector<8x128xf32>
    %109 = vector.extract_strided_slice %99 {offsets = [0, 128], sizes = [8, 128], strides = [1, 1]} : vector<8x384xf32> to vector<8x128xf32>
    %110 = arith.addf %108, %109 : vector<8x128xf32>
    %111 = arith.negf %110 : vector<8x128xf32>
    %112 = math.exp %111 : vector<8x128xf32>
    %cst_24 = arith.constant 1.000000e+00 : f32
    %113 = vector.broadcast %cst_24 : f32 to vector<8x128xf32>
    %114 = arith.addf %113, %112 : vector<8x128xf32>
    %115 = arith.divf %113, %114 : vector<8x128xf32>
    %116 = vector.extract_strided_slice %98 {offsets = [0, 256], sizes = [8, 128], strides = [1, 1]} : vector<8x384xf32> to vector<8x128xf32>
    %117 = vector.extract_strided_slice %99 {offsets = [0, 256], sizes = [8, 128], strides = [1, 1]} : vector<8x384xf32> to vector<8x128xf32>
    %118 = arith.addf %117, %5 : vector<8x128xf32>
    %119 = arith.mulf %107, %118 : vector<8x128xf32>
    %120 = arith.addf %116, %119 : vector<8x128xf32>
    %121 = math.tanh %120 : vector<8x128xf32>
    %cst_25 = arith.constant 1.000000e+00 : f32
    %122 = vector.broadcast %cst_25 : f32 to vector<8x128xf32>
    %123 = arith.subf %122, %115 : vector<8x128xf32>
    %124 = arith.mulf %123, %121 : vector<8x128xf32>
    %125 = arith.mulf %115, %97 : vector<8x128xf32>
    %126 = arith.addf %124, %125 : vector<8x128xf32>
    %127 = vector.extract_strided_slice %9 {offsets = [0, 1536], sizes = [8, 384], strides = [1, 1]} : vector<8x3072xf32> to vector<8x384xf32>
    %cst_26 = arith.constant dense<0.000000e+00> : vector<8x384xf32>
    %128 = tpu.matmul %126, %1, %cst_26 {dimension_numbers = #tpu.dot_dimension_numbers<[1], [0], [0], [1], [0, 0, 1, 1], [], []>} : vector<8x128xf32>, vector<128x384xf32>, vector<8x384xf32> -> vector<8x384xf32>
    %129 = vector.extract_strided_slice %127 {offsets = [0, 0], sizes = [8, 128], strides = [1, 1]} : vector<8x384xf32> to vector<8x128xf32>
    %130 = vector.extract_strided_slice %128 {offsets = [0, 0], sizes = [8, 128], strides = [1, 1]} : vector<8x384xf32> to vector<8x128xf32>
    %131 = arith.addf %129, %130 : vector<8x128xf32>
    %132 = arith.negf %131 : vector<8x128xf32>
    %133 = math.exp %132 : vector<8x128xf32>
    %cst_27 = arith.constant 1.000000e+00 : f32
    %134 = vector.broadcast %cst_27 : f32 to vector<8x128xf32>
    %135 = arith.addf %134, %133 : vector<8x128xf32>
    %136 = arith.divf %134, %135 : vector<8x128xf32>
    %137 = vector.extract_strided_slice %127 {offsets = [0, 128], sizes = [8, 128], strides = [1, 1]} : vector<8x384xf32> to vector<8x128xf32>
    %138 = vector.extract_strided_slice %128 {offsets = [0, 128], sizes = [8, 128], strides = [1, 1]} : vector<8x384xf32> to vector<8x128xf32>
    %139 = arith.addf %137, %138 : vector<8x128xf32>
    %140 = arith.negf %139 : vector<8x128xf32>
    %141 = math.exp %140 : vector<8x128xf32>
    %cst_28 = arith.constant 1.000000e+00 : f32
    %142 = vector.broadcast %cst_28 : f32 to vector<8x128xf32>
    %143 = arith.addf %142, %141 : vector<8x128xf32>
    %144 = arith.divf %142, %143 : vector<8x128xf32>
    %145 = vector.extract_strided_slice %127 {offsets = [0, 256], sizes = [8, 128], strides = [1, 1]} : vector<8x384xf32> to vector<8x128xf32>
    %146 = vector.extract_strided_slice %128 {offsets = [0, 256], sizes = [8, 128], strides = [1, 1]} : vector<8x384xf32> to vector<8x128xf32>
    %147 = arith.addf %146, %5 : vector<8x128xf32>
    %148 = arith.mulf %136, %147 : vector<8x128xf32>
    %149 = arith.addf %145, %148 : vector<8x128xf32>
    %150 = math.tanh %149 : vector<8x128xf32>
    %cst_29 = arith.constant 1.000000e+00 : f32
    %151 = vector.broadcast %cst_29 : f32 to vector<8x128xf32>
    %152 = arith.subf %151, %144 : vector<8x128xf32>
    %153 = arith.mulf %152, %150 : vector<8x128xf32>
    %154 = arith.mulf %144, %126 : vector<8x128xf32>
    %155 = arith.addf %153, %154 : vector<8x128xf32>
    %156 = vector.extract_strided_slice %9 {offsets = [0, 1920], sizes = [8, 384], strides = [1, 1]} : vector<8x3072xf32> to vector<8x384xf32>
    %cst_30 = arith.constant dense<0.000000e+00> : vector<8x384xf32>
    %157 = tpu.matmul %155, %1, %cst_30 {dimension_numbers = #tpu.dot_dimension_numbers<[1], [0], [0], [1], [0, 0, 1, 1], [], []>} : vector<8x128xf32>, vector<128x384xf32>, vector<8x384xf32> -> vector<8x384xf32>
    %158 = vector.extract_strided_slice %156 {offsets = [0, 0], sizes = [8, 128], strides = [1, 1]} : vector<8x384xf32> to vector<8x128xf32>
    %159 = vector.extract_strided_slice %157 {offsets = [0, 0], sizes = [8, 128], strides = [1, 1]} : vector<8x384xf32> to vector<8x128xf32>
    %160 = arith.addf %158, %159 : vector<8x128xf32>
    %161 = arith.negf %160 : vector<8x128xf32>
    %162 = math.exp %161 : vector<8x128xf32>
    %cst_31 = arith.constant 1.000000e+00 : f32
    %163 = vector.broadcast %cst_31 : f32 to vector<8x128xf32>
    %164 = arith.addf %163, %162 : vector<8x128xf32>
    %165 = arith.divf %163, %164 : vector<8x128xf32>
    %166 = vector.extract_strided_slice %156 {offsets = [0, 128], sizes = [8, 128], strides = [1, 1]} : vector<8x384xf32> to vector<8x128xf32>
    %167 = vector.extract_strided_slice %157 {offsets = [0, 128], sizes = [8, 128], strides = [1, 1]} : vector<8x384xf32> to vector<8x128xf32>
    %168 = arith.addf %166, %167 : vector<8x128xf32>
    %169 = arith.negf %168 : vector<8x128xf32>
    %170 = math.exp %169 : vector<8x128xf32>
    %cst_32 = arith.constant 1.000000e+00 : f32
    %171 = vector.broadcast %cst_32 : f32 to vector<8x128xf32>
    %172 = arith.addf %171, %170 : vector<8x128xf32>
    %173 = arith.divf %171, %172 : vector<8x128xf32>
    %174 = vector.extract_strided_slice %156 {offsets = [0, 256], sizes = [8, 128], strides = [1, 1]} : vector<8x384xf32> to vector<8x128xf32>
    %175 = vector.extract_strided_slice %157 {offsets = [0, 256], sizes = [8, 128], strides = [1, 1]} : vector<8x384xf32> to vector<8x128xf32>
    %176 = arith.addf %175, %5 : vector<8x128xf32>
    %177 = arith.mulf %165, %176 : vector<8x128xf32>
    %178 = arith.addf %174, %177 : vector<8x128xf32>
    %179 = math.tanh %178 : vector<8x128xf32>
    %cst_33 = arith.constant 1.000000e+00 : f32
    %180 = vector.broadcast %cst_33 : f32 to vector<8x128xf32>
    %181 = arith.subf %180, %173 : vector<8x128xf32>
    %182 = arith.mulf %181, %179 : vector<8x128xf32>
    %183 = arith.mulf %173, %155 : vector<8x128xf32>
    %184 = arith.addf %182, %183 : vector<8x128xf32>
    %185 = vector.extract_strided_slice %9 {offsets = [0, 2304], sizes = [8, 384], strides = [1, 1]} : vector<8x3072xf32> to vector<8x384xf32>
    %cst_34 = arith.constant dense<0.000000e+00> : vector<8x384xf32>
    %186 = tpu.matmul %184, %1, %cst_34 {dimension_numbers = #tpu.dot_dimension_numbers<[1], [0], [0], [1], [0, 0, 1, 1], [], []>} : vector<8x128xf32>, vector<128x384xf32>, vector<8x384xf32> -> vector<8x384xf32>
    %187 = vector.extract_strided_slice %185 {offsets = [0, 0], sizes = [8, 128], strides = [1, 1]} : vector<8x384xf32> to vector<8x128xf32>
    %188 = vector.extract_strided_slice %186 {offsets = [0, 0], sizes = [8, 128], strides = [1, 1]} : vector<8x384xf32> to vector<8x128xf32>
    %189 = arith.addf %187, %188 : vector<8x128xf32>
    %190 = arith.negf %189 : vector<8x128xf32>
    %191 = math.exp %190 : vector<8x128xf32>
    %cst_35 = arith.constant 1.000000e+00 : f32
    %192 = vector.broadcast %cst_35 : f32 to vector<8x128xf32>
    %193 = arith.addf %192, %191 : vector<8x128xf32>
    %194 = arith.divf %192, %193 : vector<8x128xf32>
    %195 = vector.extract_strided_slice %185 {offsets = [0, 128], sizes = [8, 128], strides = [1, 1]} : vector<8x384xf32> to vector<8x128xf32>
    %196 = vector.extract_strided_slice %186 {offsets = [0, 128], sizes = [8, 128], strides = [1, 1]} : vector<8x384xf32> to vector<8x128xf32>
    %197 = arith.addf %195, %196 : vector<8x128xf32>
    %198 = arith.negf %197 : vector<8x128xf32>
    %199 = math.exp %198 : vector<8x128xf32>
    %cst_36 = arith.constant 1.000000e+00 : f32
    %200 = vector.broadcast %cst_36 : f32 to vector<8x128xf32>
    %201 = arith.addf %200, %199 : vector<8x128xf32>
    %202 = arith.divf %200, %201 : vector<8x128xf32>
    %203 = vector.extract_strided_slice %185 {offsets = [0, 256], sizes = [8, 128], strides = [1, 1]} : vector<8x384xf32> to vector<8x128xf32>
    %204 = vector.extract_strided_slice %186 {offsets = [0, 256], sizes = [8, 128], strides = [1, 1]} : vector<8x384xf32> to vector<8x128xf32>
    %205 = arith.addf %204, %5 : vector<8x128xf32>
    %206 = arith.mulf %194, %205 : vector<8x128xf32>
    %207 = arith.addf %203, %206 : vector<8x128xf32>
    %208 = math.tanh %207 : vector<8x128xf32>
    %cst_37 = arith.constant 1.000000e+00 : f32
    %209 = vector.broadcast %cst_37 : f32 to vector<8x128xf32>
    %210 = arith.subf %209, %202 : vector<8x128xf32>
    %211 = arith.mulf %210, %208 : vector<8x128xf32>
    %212 = arith.mulf %202, %184 : vector<8x128xf32>
    %213 = arith.addf %211, %212 : vector<8x128xf32>
    %214 = vector.extract_strided_slice %9 {offsets = [0, 2688], sizes = [8, 384], strides = [1, 1]} : vector<8x3072xf32> to vector<8x384xf32>
    %cst_38 = arith.constant dense<0.000000e+00> : vector<8x384xf32>
    %215 = tpu.matmul %213, %1, %cst_38 {dimension_numbers = #tpu.dot_dimension_numbers<[1], [0], [0], [1], [0, 0, 1, 1], [], []>} : vector<8x128xf32>, vector<128x384xf32>, vector<8x384xf32> -> vector<8x384xf32>
    %216 = vector.extract_strided_slice %214 {offsets = [0, 0], sizes = [8, 128], strides = [1, 1]} : vector<8x384xf32> to vector<8x128xf32>
    %217 = vector.extract_strided_slice %215 {offsets = [0, 0], sizes = [8, 128], strides = [1, 1]} : vector<8x384xf32> to vector<8x128xf32>
    %218 = arith.addf %216, %217 : vector<8x128xf32>
    %219 = arith.negf %218 : vector<8x128xf32>
    %220 = math.exp %219 : vector<8x128xf32>
    %cst_39 = arith.constant 1.000000e+00 : f32
    %221 = vector.broadcast %cst_39 : f32 to vector<8x128xf32>
    %222 = arith.addf %221, %220 : vector<8x128xf32>
    %223 = arith.divf %221, %222 : vector<8x128xf32>
    %224 = vector.extract_strided_slice %214 {offsets = [0, 128], sizes = [8, 128], strides = [1, 1]} : vector<8x384xf32> to vector<8x128xf32>
    %225 = vector.extract_strided_slice %215 {offsets = [0, 128], sizes = [8, 128], strides = [1, 1]} : vector<8x384xf32> to vector<8x128xf32>
    %226 = arith.addf %224, %225 : vector<8x128xf32>
    %227 = arith.negf %226 : vector<8x128xf32>
    %228 = math.exp %227 : vector<8x128xf32>
    %cst_40 = arith.constant 1.000000e+00 : f32
    %229 = vector.broadcast %cst_40 : f32 to vector<8x128xf32>
    %230 = arith.addf %229, %228 : vector<8x128xf32>
    %231 = arith.divf %229, %230 : vector<8x128xf32>
    %232 = vector.extract_strided_slice %214 {offsets = [0, 256], sizes = [8, 128], strides = [1, 1]} : vector<8x384xf32> to vector<8x128xf32>
    %233 = vector.extract_strided_slice %215 {offsets = [0, 256], sizes = [8, 128], strides = [1, 1]} : vector<8x384xf32> to vector<8x128xf32>
    %234 = arith.addf %233, %5 : vector<8x128xf32>
    %235 = arith.mulf %223, %234 : vector<8x128xf32>
    %236 = arith.addf %232, %235 : vector<8x128xf32>
    %237 = math.tanh %236 : vector<8x128xf32>
    %cst_41 = arith.constant 1.000000e+00 : f32
    %238 = vector.broadcast %cst_41 : f32 to vector<8x128xf32>
    %239 = arith.subf %238, %231 : vector<8x128xf32>
    %240 = arith.mulf %239, %237 : vector<8x128xf32>
    %241 = arith.mulf %231, %213 : vector<8x128xf32>
    %242 = arith.addf %240, %241 : vector<8x128xf32>
    %c0_42 = arith.constant 0 : index
    %c0_43 = arith.constant 0 : index
    %243 = vector.load %arg5[%c0_42, %c0_43] : memref<128x384xf32, #tpu.memory_space<vmem>>, vector<128x384xf32>
    %c0_44 = arith.constant 0 : index
    %c0_45 = arith.constant 0 : index
    %244 = vector.load %arg6[%c0_44, %c0_45] : memref<128x384xf32, #tpu.memory_space<vmem>>, vector<128x384xf32>
    %c0_46 = arith.constant 0 : index
    %c0_47 = arith.constant 0 : index
    %245 = vector.load %arg7[%c0_46, %c0_47] : memref<1x384xf32, #tpu.memory_space<vmem>>, vector<1x384xf32>
    %c0_48 = arith.constant 0 : index
    %c0_49 = arith.constant 0 : index
    %246 = vector.load %arg8[%c0_48, %c0_49] : memref<1x128xf32, #tpu.memory_space<vmem>>, vector<1x128xf32>
    %247 = vector.shape_cast %246 : vector<1x128xf32> to vector<1x128xf32>
    %248 = vector.broadcast %247 : vector<1x128xf32> to vector<8x128xf32>
    %249 = tpu.concatenate %39, %68, %97, %126, %155, %184, %213, %242 in 0 : vector<8x128xf32>, vector<8x128xf32>, vector<8x128xf32>, vector<8x128xf32>, vector<8x128xf32>, vector<8x128xf32>, vector<8x128xf32>, vector<8x128xf32> -> vector<64x128xf32>
    %cst_50 = arith.constant dense<0.000000e+00> : vector<64x384xf32>
    %250 = tpu.matmul %249, %243, %cst_50 {dimension_numbers = #tpu.dot_dimension_numbers<[1], [0], [0], [1], [0, 0, 1, 1], [], []>} : vector<64x128xf32>, vector<128x384xf32>, vector<64x384xf32> -> vector<64x384xf32>
    %251 = vector.broadcast %245 : vector<1x384xf32> to vector<64x384xf32>
    %252 = arith.addf %250, %251 : vector<64x384xf32>
    %cst_51 = arith.constant 0.000000e+00 : f32
    %253 = vector.broadcast %cst_51 : f32 to vector<8x128xf32>
    %254 = vector.extract_strided_slice %252 {offsets = [0, 0], sizes = [8, 384], strides = [1, 1]} : vector<64x384xf32> to vector<8x384xf32>
    %cst_52 = arith.constant dense<0.000000e+00> : vector<8x384xf32>
    %255 = tpu.matmul %253, %244, %cst_52 {dimension_numbers = #tpu.dot_dimension_numbers<[1], [0], [0], [1], [0, 0, 1, 1], [], []>} : vector<8x128xf32>, vector<128x384xf32>, vector<8x384xf32> -> vector<8x384xf32>
    %256 = vector.extract_strided_slice %254 {offsets = [0, 0], sizes = [8, 128], strides = [1, 1]} : vector<8x384xf32> to vector<8x128xf32>
    %257 = vector.extract_strided_slice %255 {offsets = [0, 0], sizes = [8, 128], strides = [1, 1]} : vector<8x384xf32> to vector<8x128xf32>
    %258 = arith.addf %256, %257 : vector<8x128xf32>
    %259 = arith.negf %258 : vector<8x128xf32>
    %260 = math.exp %259 : vector<8x128xf32>
    %cst_53 = arith.constant 1.000000e+00 : f32
    %261 = vector.broadcast %cst_53 : f32 to vector<8x128xf32>
    %262 = arith.addf %261, %260 : vector<8x128xf32>
    %263 = arith.divf %261, %262 : vector<8x128xf32>
    %264 = vector.extract_strided_slice %254 {offsets = [0, 128], sizes = [8, 128], strides = [1, 1]} : vector<8x384xf32> to vector<8x128xf32>
    %265 = vector.extract_strided_slice %255 {offsets = [0, 128], sizes = [8, 128], strides = [1, 1]} : vector<8x384xf32> to vector<8x128xf32>
    %266 = arith.addf %264, %265 : vector<8x128xf32>
    %267 = arith.negf %266 : vector<8x128xf32>
    %268 = math.exp %267 : vector<8x128xf32>
    %cst_54 = arith.constant 1.000000e+00 : f32
    %269 = vector.broadcast %cst_54 : f32 to vector<8x128xf32>
    %270 = arith.addf %269, %268 : vector<8x128xf32>
    %271 = arith.divf %269, %270 : vector<8x128xf32>
    %272 = vector.extract_strided_slice %254 {offsets = [0, 256], sizes = [8, 128], strides = [1, 1]} : vector<8x384xf32> to vector<8x128xf32>
    %273 = vector.extract_strided_slice %255 {offsets = [0, 256], sizes = [8, 128], strides = [1, 1]} : vector<8x384xf32> to vector<8x128xf32>
    %274 = arith.addf %273, %248 : vector<8x128xf32>
    %275 = arith.mulf %263, %274 : vector<8x128xf32>
    %276 = arith.addf %272, %275 : vector<8x128xf32>
    %277 = math.tanh %276 : vector<8x128xf32>
    %cst_55 = arith.constant 1.000000e+00 : f32
    %278 = vector.broadcast %cst_55 : f32 to vector<8x128xf32>
    %279 = arith.subf %278, %271 : vector<8x128xf32>
    %280 = arith.mulf %279, %277 : vector<8x128xf32>
    %281 = arith.mulf %271, %253 : vector<8x128xf32>
    %282 = arith.addf %280, %281 : vector<8x128xf32>
    %283 = vector.extract_strided_slice %252 {offsets = [8, 0], sizes = [8, 384], strides = [1, 1]} : vector<64x384xf32> to vector<8x384xf32>
    %cst_56 = arith.constant dense<0.000000e+00> : vector<8x384xf32>
    %284 = tpu.matmul %282, %244, %cst_56 {dimension_numbers = #tpu.dot_dimension_numbers<[1], [0], [0], [1], [0, 0, 1, 1], [], []>} : vector<8x128xf32>, vector<128x384xf32>, vector<8x384xf32> -> vector<8x384xf32>
    %285 = vector.extract_strided_slice %283 {offsets = [0, 0], sizes = [8, 128], strides = [1, 1]} : vector<8x384xf32> to vector<8x128xf32>
    %286 = vector.extract_strided_slice %284 {offsets = [0, 0], sizes = [8, 128], strides = [1, 1]} : vector<8x384xf32> to vector<8x128xf32>
    %287 = arith.addf %285, %286 : vector<8x128xf32>
    %288 = arith.negf %287 : vector<8x128xf32>
    %289 = math.exp %288 : vector<8x128xf32>
    %cst_57 = arith.constant 1.000000e+00 : f32
    %290 = vector.broadcast %cst_57 : f32 to vector<8x128xf32>
    %291 = arith.addf %290, %289 : vector<8x128xf32>
    %292 = arith.divf %290, %291 : vector<8x128xf32>
    %293 = vector.extract_strided_slice %283 {offsets = [0, 128], sizes = [8, 128], strides = [1, 1]} : vector<8x384xf32> to vector<8x128xf32>
    %294 = vector.extract_strided_slice %284 {offsets = [0, 128], sizes = [8, 128], strides = [1, 1]} : vector<8x384xf32> to vector<8x128xf32>
    %295 = arith.addf %293, %294 : vector<8x128xf32>
    %296 = arith.negf %295 : vector<8x128xf32>
    %297 = math.exp %296 : vector<8x128xf32>
    %cst_58 = arith.constant 1.000000e+00 : f32
    %298 = vector.broadcast %cst_58 : f32 to vector<8x128xf32>
    %299 = arith.addf %298, %297 : vector<8x128xf32>
    %300 = arith.divf %298, %299 : vector<8x128xf32>
    %301 = vector.extract_strided_slice %283 {offsets = [0, 256], sizes = [8, 128], strides = [1, 1]} : vector<8x384xf32> to vector<8x128xf32>
    %302 = vector.extract_strided_slice %284 {offsets = [0, 256], sizes = [8, 128], strides = [1, 1]} : vector<8x384xf32> to vector<8x128xf32>
    %303 = arith.addf %302, %248 : vector<8x128xf32>
    %304 = arith.mulf %292, %303 : vector<8x128xf32>
    %305 = arith.addf %301, %304 : vector<8x128xf32>
    %306 = math.tanh %305 : vector<8x128xf32>
    %cst_59 = arith.constant 1.000000e+00 : f32
    %307 = vector.broadcast %cst_59 : f32 to vector<8x128xf32>
    %308 = arith.subf %307, %300 : vector<8x128xf32>
    %309 = arith.mulf %308, %306 : vector<8x128xf32>
    %310 = arith.mulf %300, %282 : vector<8x128xf32>
    %311 = arith.addf %309, %310 : vector<8x128xf32>
    %312 = vector.extract_strided_slice %252 {offsets = [16, 0], sizes = [8, 384], strides = [1, 1]} : vector<64x384xf32> to vector<8x384xf32>
    %cst_60 = arith.constant dense<0.000000e+00> : vector<8x384xf32>
    %313 = tpu.matmul %311, %244, %cst_60 {dimension_numbers = #tpu.dot_dimension_numbers<[1], [0], [0], [1], [0, 0, 1, 1], [], []>} : vector<8x128xf32>, vector<128x384xf32>, vector<8x384xf32> -> vector<8x384xf32>
    %314 = vector.extract_strided_slice %312 {offsets = [0, 0], sizes = [8, 128], strides = [1, 1]} : vector<8x384xf32> to vector<8x128xf32>
    %315 = vector.extract_strided_slice %313 {offsets = [0, 0], sizes = [8, 128], strides = [1, 1]} : vector<8x384xf32> to vector<8x128xf32>
    %316 = arith.addf %314, %315 : vector<8x128xf32>
    %317 = arith.negf %316 : vector<8x128xf32>
    %318 = math.exp %317 : vector<8x128xf32>
    %cst_61 = arith.constant 1.000000e+00 : f32
    %319 = vector.broadcast %cst_61 : f32 to vector<8x128xf32>
    %320 = arith.addf %319, %318 : vector<8x128xf32>
    %321 = arith.divf %319, %320 : vector<8x128xf32>
    %322 = vector.extract_strided_slice %312 {offsets = [0, 128], sizes = [8, 128], strides = [1, 1]} : vector<8x384xf32> to vector<8x128xf32>
    %323 = vector.extract_strided_slice %313 {offsets = [0, 128], sizes = [8, 128], strides = [1, 1]} : vector<8x384xf32> to vector<8x128xf32>
    %324 = arith.addf %322, %323 : vector<8x128xf32>
    %325 = arith.negf %324 : vector<8x128xf32>
    %326 = math.exp %325 : vector<8x128xf32>
    %cst_62 = arith.constant 1.000000e+00 : f32
    %327 = vector.broadcast %cst_62 : f32 to vector<8x128xf32>
    %328 = arith.addf %327, %326 : vector<8x128xf32>
    %329 = arith.divf %327, %328 : vector<8x128xf32>
    %330 = vector.extract_strided_slice %312 {offsets = [0, 256], sizes = [8, 128], strides = [1, 1]} : vector<8x384xf32> to vector<8x128xf32>
    %331 = vector.extract_strided_slice %313 {offsets = [0, 256], sizes = [8, 128], strides = [1, 1]} : vector<8x384xf32> to vector<8x128xf32>
    %332 = arith.addf %331, %248 : vector<8x128xf32>
    %333 = arith.mulf %321, %332 : vector<8x128xf32>
    %334 = arith.addf %330, %333 : vector<8x128xf32>
    %335 = math.tanh %334 : vector<8x128xf32>
    %cst_63 = arith.constant 1.000000e+00 : f32
    %336 = vector.broadcast %cst_63 : f32 to vector<8x128xf32>
    %337 = arith.subf %336, %329 : vector<8x128xf32>
    %338 = arith.mulf %337, %335 : vector<8x128xf32>
    %339 = arith.mulf %329, %311 : vector<8x128xf32>
    %340 = arith.addf %338, %339 : vector<8x128xf32>
    %341 = vector.extract_strided_slice %252 {offsets = [24, 0], sizes = [8, 384], strides = [1, 1]} : vector<64x384xf32> to vector<8x384xf32>
    %cst_64 = arith.constant dense<0.000000e+00> : vector<8x384xf32>
    %342 = tpu.matmul %340, %244, %cst_64 {dimension_numbers = #tpu.dot_dimension_numbers<[1], [0], [0], [1], [0, 0, 1, 1], [], []>} : vector<8x128xf32>, vector<128x384xf32>, vector<8x384xf32> -> vector<8x384xf32>
    %343 = vector.extract_strided_slice %341 {offsets = [0, 0], sizes = [8, 128], strides = [1, 1]} : vector<8x384xf32> to vector<8x128xf32>
    %344 = vector.extract_strided_slice %342 {offsets = [0, 0], sizes = [8, 128], strides = [1, 1]} : vector<8x384xf32> to vector<8x128xf32>
    %345 = arith.addf %343, %344 : vector<8x128xf32>
    %346 = arith.negf %345 : vector<8x128xf32>
    %347 = math.exp %346 : vector<8x128xf32>
    %cst_65 = arith.constant 1.000000e+00 : f32
    %348 = vector.broadcast %cst_65 : f32 to vector<8x128xf32>
    %349 = arith.addf %348, %347 : vector<8x128xf32>
    %350 = arith.divf %348, %349 : vector<8x128xf32>
    %351 = vector.extract_strided_slice %341 {offsets = [0, 128], sizes = [8, 128], strides = [1, 1]} : vector<8x384xf32> to vector<8x128xf32>
    %352 = vector.extract_strided_slice %342 {offsets = [0, 128], sizes = [8, 128], strides = [1, 1]} : vector<8x384xf32> to vector<8x128xf32>
    %353 = arith.addf %351, %352 : vector<8x128xf32>
    %354 = arith.negf %353 : vector<8x128xf32>
    %355 = math.exp %354 : vector<8x128xf32>
    %cst_66 = arith.constant 1.000000e+00 : f32
    %356 = vector.broadcast %cst_66 : f32 to vector<8x128xf32>
    %357 = arith.addf %356, %355 : vector<8x128xf32>
    %358 = arith.divf %356, %357 : vector<8x128xf32>
    %359 = vector.extract_strided_slice %341 {offsets = [0, 256], sizes = [8, 128], strides = [1, 1]} : vector<8x384xf32> to vector<8x128xf32>
    %360 = vector.extract_strided_slice %342 {offsets = [0, 256], sizes = [8, 128], strides = [1, 1]} : vector<8x384xf32> to vector<8x128xf32>
    %361 = arith.addf %360, %248 : vector<8x128xf32>
    %362 = arith.mulf %350, %361 : vector<8x128xf32>
    %363 = arith.addf %359, %362 : vector<8x128xf32>
    %364 = math.tanh %363 : vector<8x128xf32>
    %cst_67 = arith.constant 1.000000e+00 : f32
    %365 = vector.broadcast %cst_67 : f32 to vector<8x128xf32>
    %366 = arith.subf %365, %358 : vector<8x128xf32>
    %367 = arith.mulf %366, %364 : vector<8x128xf32>
    %368 = arith.mulf %358, %340 : vector<8x128xf32>
    %369 = arith.addf %367, %368 : vector<8x128xf32>
    %370 = vector.extract_strided_slice %252 {offsets = [32, 0], sizes = [8, 384], strides = [1, 1]} : vector<64x384xf32> to vector<8x384xf32>
    %cst_68 = arith.constant dense<0.000000e+00> : vector<8x384xf32>
    %371 = tpu.matmul %369, %244, %cst_68 {dimension_numbers = #tpu.dot_dimension_numbers<[1], [0], [0], [1], [0, 0, 1, 1], [], []>} : vector<8x128xf32>, vector<128x384xf32>, vector<8x384xf32> -> vector<8x384xf32>
    %372 = vector.extract_strided_slice %370 {offsets = [0, 0], sizes = [8, 128], strides = [1, 1]} : vector<8x384xf32> to vector<8x128xf32>
    %373 = vector.extract_strided_slice %371 {offsets = [0, 0], sizes = [8, 128], strides = [1, 1]} : vector<8x384xf32> to vector<8x128xf32>
    %374 = arith.addf %372, %373 : vector<8x128xf32>
    %375 = arith.negf %374 : vector<8x128xf32>
    %376 = math.exp %375 : vector<8x128xf32>
    %cst_69 = arith.constant 1.000000e+00 : f32
    %377 = vector.broadcast %cst_69 : f32 to vector<8x128xf32>
    %378 = arith.addf %377, %376 : vector<8x128xf32>
    %379 = arith.divf %377, %378 : vector<8x128xf32>
    %380 = vector.extract_strided_slice %370 {offsets = [0, 128], sizes = [8, 128], strides = [1, 1]} : vector<8x384xf32> to vector<8x128xf32>
    %381 = vector.extract_strided_slice %371 {offsets = [0, 128], sizes = [8, 128], strides = [1, 1]} : vector<8x384xf32> to vector<8x128xf32>
    %382 = arith.addf %380, %381 : vector<8x128xf32>
    %383 = arith.negf %382 : vector<8x128xf32>
    %384 = math.exp %383 : vector<8x128xf32>
    %cst_70 = arith.constant 1.000000e+00 : f32
    %385 = vector.broadcast %cst_70 : f32 to vector<8x128xf32>
    %386 = arith.addf %385, %384 : vector<8x128xf32>
    %387 = arith.divf %385, %386 : vector<8x128xf32>
    %388 = vector.extract_strided_slice %370 {offsets = [0, 256], sizes = [8, 128], strides = [1, 1]} : vector<8x384xf32> to vector<8x128xf32>
    %389 = vector.extract_strided_slice %371 {offsets = [0, 256], sizes = [8, 128], strides = [1, 1]} : vector<8x384xf32> to vector<8x128xf32>
    %390 = arith.addf %389, %248 : vector<8x128xf32>
    %391 = arith.mulf %379, %390 : vector<8x128xf32>
    %392 = arith.addf %388, %391 : vector<8x128xf32>
    %393 = math.tanh %392 : vector<8x128xf32>
    %cst_71 = arith.constant 1.000000e+00 : f32
    %394 = vector.broadcast %cst_71 : f32 to vector<8x128xf32>
    %395 = arith.subf %394, %387 : vector<8x128xf32>
    %396 = arith.mulf %395, %393 : vector<8x128xf32>
    %397 = arith.mulf %387, %369 : vector<8x128xf32>
    %398 = arith.addf %396, %397 : vector<8x128xf32>
    %399 = vector.extract_strided_slice %252 {offsets = [40, 0], sizes = [8, 384], strides = [1, 1]} : vector<64x384xf32> to vector<8x384xf32>
    %cst_72 = arith.constant dense<0.000000e+00> : vector<8x384xf32>
    %400 = tpu.matmul %398, %244, %cst_72 {dimension_numbers = #tpu.dot_dimension_numbers<[1], [0], [0], [1], [0, 0, 1, 1], [], []>} : vector<8x128xf32>, vector<128x384xf32>, vector<8x384xf32> -> vector<8x384xf32>
    %401 = vector.extract_strided_slice %399 {offsets = [0, 0], sizes = [8, 128], strides = [1, 1]} : vector<8x384xf32> to vector<8x128xf32>
    %402 = vector.extract_strided_slice %400 {offsets = [0, 0], sizes = [8, 128], strides = [1, 1]} : vector<8x384xf32> to vector<8x128xf32>
    %403 = arith.addf %401, %402 : vector<8x128xf32>
    %404 = arith.negf %403 : vector<8x128xf32>
    %405 = math.exp %404 : vector<8x128xf32>
    %cst_73 = arith.constant 1.000000e+00 : f32
    %406 = vector.broadcast %cst_73 : f32 to vector<8x128xf32>
    %407 = arith.addf %406, %405 : vector<8x128xf32>
    %408 = arith.divf %406, %407 : vector<8x128xf32>
    %409 = vector.extract_strided_slice %399 {offsets = [0, 128], sizes = [8, 128], strides = [1, 1]} : vector<8x384xf32> to vector<8x128xf32>
    %410 = vector.extract_strided_slice %400 {offsets = [0, 128], sizes = [8, 128], strides = [1, 1]} : vector<8x384xf32> to vector<8x128xf32>
    %411 = arith.addf %409, %410 : vector<8x128xf32>
    %412 = arith.negf %411 : vector<8x128xf32>
    %413 = math.exp %412 : vector<8x128xf32>
    %cst_74 = arith.constant 1.000000e+00 : f32
    %414 = vector.broadcast %cst_74 : f32 to vector<8x128xf32>
    %415 = arith.addf %414, %413 : vector<8x128xf32>
    %416 = arith.divf %414, %415 : vector<8x128xf32>
    %417 = vector.extract_strided_slice %399 {offsets = [0, 256], sizes = [8, 128], strides = [1, 1]} : vector<8x384xf32> to vector<8x128xf32>
    %418 = vector.extract_strided_slice %400 {offsets = [0, 256], sizes = [8, 128], strides = [1, 1]} : vector<8x384xf32> to vector<8x128xf32>
    %419 = arith.addf %418, %248 : vector<8x128xf32>
    %420 = arith.mulf %408, %419 : vector<8x128xf32>
    %421 = arith.addf %417, %420 : vector<8x128xf32>
    %422 = math.tanh %421 : vector<8x128xf32>
    %cst_75 = arith.constant 1.000000e+00 : f32
    %423 = vector.broadcast %cst_75 : f32 to vector<8x128xf32>
    %424 = arith.subf %423, %416 : vector<8x128xf32>
    %425 = arith.mulf %424, %422 : vector<8x128xf32>
    %426 = arith.mulf %416, %398 : vector<8x128xf32>
    %427 = arith.addf %425, %426 : vector<8x128xf32>
    %428 = vector.extract_strided_slice %252 {offsets = [48, 0], sizes = [8, 384], strides = [1, 1]} : vector<64x384xf32> to vector<8x384xf32>
    %cst_76 = arith.constant dense<0.000000e+00> : vector<8x384xf32>
    %429 = tpu.matmul %427, %244, %cst_76 {dimension_numbers = #tpu.dot_dimension_numbers<[1], [0], [0], [1], [0, 0, 1, 1], [], []>} : vector<8x128xf32>, vector<128x384xf32>, vector<8x384xf32> -> vector<8x384xf32>
    %430 = vector.extract_strided_slice %428 {offsets = [0, 0], sizes = [8, 128], strides = [1, 1]} : vector<8x384xf32> to vector<8x128xf32>
    %431 = vector.extract_strided_slice %429 {offsets = [0, 0], sizes = [8, 128], strides = [1, 1]} : vector<8x384xf32> to vector<8x128xf32>
    %432 = arith.addf %430, %431 : vector<8x128xf32>
    %433 = arith.negf %432 : vector<8x128xf32>
    %434 = math.exp %433 : vector<8x128xf32>
    %cst_77 = arith.constant 1.000000e+00 : f32
    %435 = vector.broadcast %cst_77 : f32 to vector<8x128xf32>
    %436 = arith.addf %435, %434 : vector<8x128xf32>
    %437 = arith.divf %435, %436 : vector<8x128xf32>
    %438 = vector.extract_strided_slice %428 {offsets = [0, 128], sizes = [8, 128], strides = [1, 1]} : vector<8x384xf32> to vector<8x128xf32>
    %439 = vector.extract_strided_slice %429 {offsets = [0, 128], sizes = [8, 128], strides = [1, 1]} : vector<8x384xf32> to vector<8x128xf32>
    %440 = arith.addf %438, %439 : vector<8x128xf32>
    %441 = arith.negf %440 : vector<8x128xf32>
    %442 = math.exp %441 : vector<8x128xf32>
    %cst_78 = arith.constant 1.000000e+00 : f32
    %443 = vector.broadcast %cst_78 : f32 to vector<8x128xf32>
    %444 = arith.addf %443, %442 : vector<8x128xf32>
    %445 = arith.divf %443, %444 : vector<8x128xf32>
    %446 = vector.extract_strided_slice %428 {offsets = [0, 256], sizes = [8, 128], strides = [1, 1]} : vector<8x384xf32> to vector<8x128xf32>
    %447 = vector.extract_strided_slice %429 {offsets = [0, 256], sizes = [8, 128], strides = [1, 1]} : vector<8x384xf32> to vector<8x128xf32>
    %448 = arith.addf %447, %248 : vector<8x128xf32>
    %449 = arith.mulf %437, %448 : vector<8x128xf32>
    %450 = arith.addf %446, %449 : vector<8x128xf32>
    %451 = math.tanh %450 : vector<8x128xf32>
    %cst_79 = arith.constant 1.000000e+00 : f32
    %452 = vector.broadcast %cst_79 : f32 to vector<8x128xf32>
    %453 = arith.subf %452, %445 : vector<8x128xf32>
    %454 = arith.mulf %453, %451 : vector<8x128xf32>
    %455 = arith.mulf %445, %427 : vector<8x128xf32>
    %456 = arith.addf %454, %455 : vector<8x128xf32>
    %457 = vector.extract_strided_slice %252 {offsets = [56, 0], sizes = [8, 384], strides = [1, 1]} : vector<64x384xf32> to vector<8x384xf32>
    %cst_80 = arith.constant dense<0.000000e+00> : vector<8x384xf32>
    %458 = tpu.matmul %456, %244, %cst_80 {dimension_numbers = #tpu.dot_dimension_numbers<[1], [0], [0], [1], [0, 0, 1, 1], [], []>} : vector<8x128xf32>, vector<128x384xf32>, vector<8x384xf32> -> vector<8x384xf32>
    %459 = vector.extract_strided_slice %457 {offsets = [0, 0], sizes = [8, 128], strides = [1, 1]} : vector<8x384xf32> to vector<8x128xf32>
    %460 = vector.extract_strided_slice %458 {offsets = [0, 0], sizes = [8, 128], strides = [1, 1]} : vector<8x384xf32> to vector<8x128xf32>
    %461 = arith.addf %459, %460 : vector<8x128xf32>
    %462 = arith.negf %461 : vector<8x128xf32>
    %463 = math.exp %462 : vector<8x128xf32>
    %cst_81 = arith.constant 1.000000e+00 : f32
    %464 = vector.broadcast %cst_81 : f32 to vector<8x128xf32>
    %465 = arith.addf %464, %463 : vector<8x128xf32>
    %466 = arith.divf %464, %465 : vector<8x128xf32>
    %467 = vector.extract_strided_slice %457 {offsets = [0, 128], sizes = [8, 128], strides = [1, 1]} : vector<8x384xf32> to vector<8x128xf32>
    %468 = vector.extract_strided_slice %458 {offsets = [0, 128], sizes = [8, 128], strides = [1, 1]} : vector<8x384xf32> to vector<8x128xf32>
    %469 = arith.addf %467, %468 : vector<8x128xf32>
    %470 = arith.negf %469 : vector<8x128xf32>
    %471 = math.exp %470 : vector<8x128xf32>
    %cst_82 = arith.constant 1.000000e+00 : f32
    %472 = vector.broadcast %cst_82 : f32 to vector<8x128xf32>
    %473 = arith.addf %472, %471 : vector<8x128xf32>
    %474 = arith.divf %472, %473 : vector<8x128xf32>
    %475 = vector.extract_strided_slice %457 {offsets = [0, 256], sizes = [8, 128], strides = [1, 1]} : vector<8x384xf32> to vector<8x128xf32>
    %476 = vector.extract_strided_slice %458 {offsets = [0, 256], sizes = [8, 128], strides = [1, 1]} : vector<8x384xf32> to vector<8x128xf32>
    %477 = arith.addf %476, %248 : vector<8x128xf32>
    %478 = arith.mulf %466, %477 : vector<8x128xf32>
    %479 = arith.addf %475, %478 : vector<8x128xf32>
    %480 = math.tanh %479 : vector<8x128xf32>
    %cst_83 = arith.constant 1.000000e+00 : f32
    %481 = vector.broadcast %cst_83 : f32 to vector<8x128xf32>
    %482 = arith.subf %481, %474 : vector<8x128xf32>
    %483 = arith.mulf %482, %480 : vector<8x128xf32>
    %484 = arith.mulf %474, %456 : vector<8x128xf32>
    %485 = arith.addf %483, %484 : vector<8x128xf32>
    %c0_84 = arith.constant 0 : index
    %c0_85 = arith.constant 0 : index
    %486 = vector.load %arg9[%c0_84, %c0_85] : memref<128x128xf32, #tpu.memory_space<vmem>>, vector<128x128xf32>
    %c0_86 = arith.constant 0 : index
    %c0_87 = arith.constant 0 : index
    %487 = vector.load %arg10[%c0_86, %c0_87] : memref<1x128xf32, #tpu.memory_space<vmem>>, vector<1x128xf32>
    %cst_88 = arith.constant dense<0.000000e+00> : vector<8x128xf32>
    %488 = tpu.matmul %282, %486, %cst_88 {dimension_numbers = #tpu.dot_dimension_numbers<[1], [0], [0], [1], [0, 0, 1, 1], [], []>} : vector<8x128xf32>, vector<128x128xf32>, vector<8x128xf32> -> vector<8x128xf32>
    %489 = vector.broadcast %487 : vector<1x128xf32> to vector<8x128xf32>
    %490 = arith.addf %488, %489 : vector<8x128xf32>
    %cst_89 = arith.constant dense<0.000000e+00> : vector<8x128xf32>
    %491 = tpu.matmul %311, %486, %cst_89 {dimension_numbers = #tpu.dot_dimension_numbers<[1], [0], [0], [1], [0, 0, 1, 1], [], []>} : vector<8x128xf32>, vector<128x128xf32>, vector<8x128xf32> -> vector<8x128xf32>
    %492 = vector.broadcast %487 : vector<1x128xf32> to vector<8x128xf32>
    %493 = arith.addf %491, %492 : vector<8x128xf32>
    %cst_90 = arith.constant dense<0.000000e+00> : vector<8x128xf32>
    %494 = tpu.matmul %340, %486, %cst_90 {dimension_numbers = #tpu.dot_dimension_numbers<[1], [0], [0], [1], [0, 0, 1, 1], [], []>} : vector<8x128xf32>, vector<128x128xf32>, vector<8x128xf32> -> vector<8x128xf32>
    %495 = vector.broadcast %487 : vector<1x128xf32> to vector<8x128xf32>
    %496 = arith.addf %494, %495 : vector<8x128xf32>
    %cst_91 = arith.constant dense<0.000000e+00> : vector<8x128xf32>
    %497 = tpu.matmul %369, %486, %cst_91 {dimension_numbers = #tpu.dot_dimension_numbers<[1], [0], [0], [1], [0, 0, 1, 1], [], []>} : vector<8x128xf32>, vector<128x128xf32>, vector<8x128xf32> -> vector<8x128xf32>
    %498 = vector.broadcast %487 : vector<1x128xf32> to vector<8x128xf32>
    %499 = arith.addf %497, %498 : vector<8x128xf32>
    %cst_92 = arith.constant dense<0.000000e+00> : vector<8x128xf32>
    %500 = tpu.matmul %398, %486, %cst_92 {dimension_numbers = #tpu.dot_dimension_numbers<[1], [0], [0], [1], [0, 0, 1, 1], [], []>} : vector<8x128xf32>, vector<128x128xf32>, vector<8x128xf32> -> vector<8x128xf32>
    %501 = vector.broadcast %487 : vector<1x128xf32> to vector<8x128xf32>
    %502 = arith.addf %500, %501 : vector<8x128xf32>
    %cst_93 = arith.constant dense<0.000000e+00> : vector<8x128xf32>
    %503 = tpu.matmul %427, %486, %cst_93 {dimension_numbers = #tpu.dot_dimension_numbers<[1], [0], [0], [1], [0, 0, 1, 1], [], []>} : vector<8x128xf32>, vector<128x128xf32>, vector<8x128xf32> -> vector<8x128xf32>
    %504 = vector.broadcast %487 : vector<1x128xf32> to vector<8x128xf32>
    %505 = arith.addf %503, %504 : vector<8x128xf32>
    %cst_94 = arith.constant dense<0.000000e+00> : vector<8x128xf32>
    %506 = tpu.matmul %456, %486, %cst_94 {dimension_numbers = #tpu.dot_dimension_numbers<[1], [0], [0], [1], [0, 0, 1, 1], [], []>} : vector<8x128xf32>, vector<128x128xf32>, vector<8x128xf32> -> vector<8x128xf32>
    %507 = vector.broadcast %487 : vector<1x128xf32> to vector<8x128xf32>
    %508 = arith.addf %506, %507 : vector<8x128xf32>
    %cst_95 = arith.constant dense<0.000000e+00> : vector<8x128xf32>
    %509 = tpu.matmul %485, %486, %cst_95 {dimension_numbers = #tpu.dot_dimension_numbers<[1], [0], [0], [1], [0, 0, 1, 1], [], []>} : vector<8x128xf32>, vector<128x128xf32>, vector<8x128xf32> -> vector<8x128xf32>
    %510 = vector.broadcast %487 : vector<1x128xf32> to vector<8x128xf32>
    %511 = arith.addf %509, %510 : vector<8x128xf32>
    %512 = tpu.concatenate %490, %493, %496, %499, %502, %505, %508, %511 in 1 : vector<8x128xf32>, vector<8x128xf32>, vector<8x128xf32>, vector<8x128xf32>, vector<8x128xf32>, vector<8x128xf32>, vector<8x128xf32>, vector<8x128xf32> -> vector<8x1024xf32>
    %c0_96 = arith.constant 0 : index
    %c0_97 = arith.constant 0 : index
    %513 = vector.load %arg11[%c0_96, %c0_97] : memref<8x1024xf32, #tpu.memory_space<vmem>>, vector<8x1024xf32>
    tpu.vector_store %arg11[%c0_96, %c0_97], %512 {strides = array<i32>} : memref<8x1024xf32, #tpu.memory_space<vmem>>, vector<8x1024xf32>,
    return
  }
}

</mosaic_0001>

<bundles_post_ra>
// kernel: reconstruction_model_forward.1
= control target key start
LH: loop header
LB: loop body
LE: loop exit
PB: predicated region body
PF: predicated region fallthrough
CT: control target
= control target key end

     0   :  { %16 = vsyncpa [#allocation3], 0  ;;  %s9863_s0 = inlined_call_operand.vmem [shape: f32[8,128], index: 0, kind: input, shape index: {}]   ;;  %s9864_s1 = inlined_call_operand.hbm [shape: f32[128,3072], index: 1, kind: input, shape index: {}]   ;;  %s9865_s2 = inlined_call_operand.hbm [shape: f32[128,384], index: 2, kind: input, shape index: {}]   ;;  %s9866_s3 = inlined_call_operand.hbm [shape: f32[1,3072], index: 3, kind: input, shape index: {}]   ;;  %s9867_s4 = inlined_call_operand.hbm [shape: f32[1,128], index: 4, kind: input, shape index: {}]   ;;  %s9868_s5 = inlined_call_operand.hbm [shape: f32[128,384], index: 5, kind: input, shape index: {}]   ;;  %s9869_s6 = inlined_call_operand.hbm [shape: f32[128,384], index: 6, kind: input, shape index: {}]   ;;  %s9870_s7 = inlined_call_operand.hbm [shape: f32[1,384], index: 7, kind: input, shape index: {}]   ;;  %s9871_s8 = inlined_call_operand.hbm [shape: f32[1,128], index: 8, kind: input, shape index: {}]   ;;  %s9872_s9 = inlined_call_operand.hbm [shape: f32[128,128], index: 9, kind: input, shape index: {}]   ;;  %s9873_s10 = inlined_call_operand.hbm [shape: f32[1,128], index: 10, kind: input, shape index: {}]   ;;  %s9874_s11 = inlined_call_operand.vmem [shape: f32[8,1024], index: 11, kind: output, shape index: {}]  }
   0x1   :  { %17 = vsyncpa [#allocation5], 0 }
   0x2   :  { %18 = vsyncpa [#allocation8], 0 }
   0x3   :  { %19 = vsyncpa [#allocation11], 0 }
   0x4   :  { %20 = vsyncpa [#allocation14], 0 }
   0x5   :  { %21 = vsyncpa [#allocation17], 0  ;;  %s8478_s17 = smov [#allocation4]   ;;  %s8246_s21 = scalar_lea.hbm %s9865_s2, 6144 }
   0x6   :  { %s41_s18 = sshll.u32 %s8478_s17, 4  ;;  %p8247_p0 = scmp.ne.s32.totalorder %s9865_s2, %s8246_s21  ;;  %s42_s18 = int_to_ptr.vmem [resolvable:$true] %s41_s18 }
   0x7   :  { %p8250_p1 = scmp.lt.u32.totalorder %s8246_s21, %s9865_s2 }
   0x9   :  { %p8252_p2 = pnand %p8250_p1, %p8247_p0 }
   0xb   :  { %8255 = shalt.err (!%p8252_p2)
}
   0xc   :  { %s8256_s26 = scalar_lea.vmem %s42_s18, 6144  ;;  %p8261_p4 = scmp.lt.s32.totalorder %s42_s18, %s42_s18 }
   0xd   :  { %p8257_p3 = scmp.ne.s32.totalorder %s42_s18, %s8256_s26  ;;  %p8262_p5 = scmp.lt.s32.totalorder %s8256_s26, %s8256_s26 }
   0xf   :  { %p8263_p6 = por %p8262_p5, %p8261_p4 }
  0x11   :  { %p8264_p7 = pnand %p8263_p6, %p8257_p3 }
  0x13   :  { %8267 = shalt.err (!%p8264_p7)
}
  0x14   :  { %s8479_s27 = smov 384   ;;  %s8480_s28 = smov 24  }
  0x15   :  { %47 = dma.hbm_to_vmem [thread:$0]  %s9865_s2, 6144, %s42_s18, [#allocation5], %s8479_s27, %s8479_s27, %s8480_s28  }
  0x16   :  { %s8481_s12 = smov [#allocation7]   ;;  %s8482_s14 = smov [#allocation10]  }
  0x17   :  { %s64_s13 = sshll.u32 %s8481_s12, 4  ;;  %s85_s15 = sshll.u32 %s8482_s14, 4  ;;  %s65_s13 = int_to_ptr.vmem [resolvable:$true] %s64_s13  ;;  %s86_s15 = int_to_ptr.vmem [resolvable:$true] %s85_s15 }
  0x18   :  { %s8268_s19 = scalar_lea.hbm %s9867_s4, 16 }
  0x19   :  { %p8269_p8 = scmp.ne.s32.totalorder %s9867_s4, %s8268_s19  ;;  %p8272_p9 = scmp.lt.u32.totalorder %s8268_s19, %s9867_s4 }
  0x1b   :  { %p8274_p10 = pnand %p8272_p9, %p8269_p8 }
  0x1d   :  { %8277 = shalt.err (!%p8274_p10)
}
  0x1e   :  { %s8278_s2 = scalar_lea.vmem %s65_s13, 16  ;;  %s8282_s18 = scalar_lea.vmem %s65_s13, 32 }
  0x1f   :  { %p8279_p11 = scmp.ne.s32.totalorder %s65_s13, %s8278_s2  ;;  %p8283_p12 = scmp.lt.s32.totalorder %s65_s13, %s65_s13 }
  0x20   :  { %p8284_p13 = scmp.lt.s32.totalorder %s8282_s18, %s8278_s2 }
  0x22   :  { %p8285_p0 = por %p8284_p13, %p8283_p12 }
  0x24   :  { %p8286_p1 = pnand %p8285_p0, %p8279_p11 }
  0x26   :  { %8289 = shalt.err (!%p8286_p1)
}
  0x27   :  { %67 = dma.hbm_to_vmem [thread:$0]  %s9867_s4, 16, %s65_s13, [#allocation8]  }
  0x28   :  { %s8290_s30 = scalar_lea.hbm %s9869_s6, 6144 }
  0x29   :  { %p8291_p2 = scmp.ne.s32.totalorder %s9869_s6, %s8290_s30  ;;  %p8294_p3 = scmp.lt.u32.totalorder %s8290_s30, %s9869_s6 }
  0x2b   :  { %p8296_p4 = pnand %p8294_p3, %p8291_p2 }
  0x2d   :  { %8299 = shalt.err (!%p8296_p4)
}
  0x2e   :  { %s8300_s19 = scalar_lea.vmem %s86_s15, 6144  ;;  %p8305_p6 = scmp.lt.s32.totalorder %s86_s15, %s86_s15 }
  0x2f   :  { %p8301_p5 = scmp.ne.s32.totalorder %s86_s15, %s8300_s19  ;;  %p8306_p7 = scmp.lt.s32.totalorder %s8300_s19, %s8300_s19 }
  0x31   :  { %p8307_p8 = por %p8306_p7, %p8305_p6 }
  0x33   :  { %p8308_p9 = pnand %p8307_p8, %p8301_p5 }
  0x35   :  { %8311 = shalt.err (!%p8308_p9)
}
  0x36   :  { %91 = dma.hbm_to_vmem [thread:$0]  %s9869_s6, 6144, %s86_s15, [#allocation11], %s8479_s27, %s8479_s27, %s8480_s28  }
  0x37   :  { %s8483_s20 = smov [#allocation13]   ;;  %s8484_s22 = smov [#allocation2]  }
  0x38   :  { %s108_s21 = sshll.u32 %s8483_s20, 4  ;;  %s29_s23 = sshll.u32 %s8484_s22, 4  ;;  %s109_s21 = int_to_ptr.vmem [resolvable:$true] %s108_s21  ;;  %s30_s23 = int_to_ptr.vmem [resolvable:$true] %s29_s23 }
  0x39   :  { %s8312_s24 = scalar_lea.hbm %s9871_s8, 16 }
  0x3a   :  { %p8313_p10 = scmp.ne.s32.totalorder %s9871_s8, %s8312_s24  ;;  %p8316_p11 = scmp.lt.u32.totalorder %s8312_s24, %s9871_s8 }
  0x3c   :  { %p8318_p12 = pnand %p8316_p11, %p8313_p10 }
  0x3e   :  { %8321 = shalt.err (!%p8318_p12)
}
  0x3f   :  { %s8322_s6 = scalar_lea.vmem %s109_s21, 16  ;;  %s8326_s15 = scalar_lea.vmem %s109_s21, 32 }
  0x40   :  { %p8323_p13 = scmp.ne.s32.totalorder %s109_s21, %s8322_s6  ;;  %p8327_p0 = scmp.lt.s32.totalorder %s109_s21, %s109_s21 }
  0x41   :  { %p8328_p1 = scmp.lt.s32.totalorder %s8326_s15, %s8322_s6 }
  0x43   :  { %p8329_p2 = por %p8328_p1, %p8327_p0 }
  0x45   :  { %p8330_p3 = pnand %p8329_p2, %p8323_p13 }
  0x47   :  { %8333 = shalt.err (!%p8330_p3)
}
  0x48   :  { %111 = dma.hbm_to_vmem [thread:$0]  %s9871_s8, 16, %s109_s21, [#allocation14]  }
  0x49   :  { %s8334_s19 = scalar_lea.hbm %s9864_s1, 49152 }
  0x4a   :  { %p8335_p4 = scmp.ne.s32.totalorder %s9864_s1, %s8334_s19  ;;  %p8338_p5 = scmp.lt.u32.totalorder %s8334_s19, %s9864_s1 }
  0x4c   :  { %p8340_p6 = pnand %p8338_p5, %p8335_p4 }
  0x4e   :  { %8343 = shalt.err (!%p8340_p6)
}
  0x4f   :  { %s8344_s2 = scalar_lea.vmem %s30_s23, 49152  ;;  %p8349_p8 = scmp.lt.s32.totalorder %s30_s23, %s30_s23 }
  0x50   :  { %p8345_p7 = scmp.ne.s32.totalorder %s30_s23, %s8344_s2  ;;  %p8350_p9 = scmp.lt.s32.totalorder %s8344_s2, %s8344_s2 }
  0x52   :  { %p8351_p10 = por %p8350_p9, %p8349_p8 }
  0x54   :  { %p8352_p11 = pnand %p8351_p10, %p8345_p7 }
  0x56   :  { %8355 = shalt.err (!%p8352_p11)
}
  0x57   :  { %s8485_s8 = smov 3072   ;;  %s8486_s21 = smov 192  }
  0x58   :  { %35 = dma.hbm_to_vmem [thread:$0]  %s9864_s1, 49152, %s30_s23, [#allocation3], %s8485_s8, %s8485_s8, %s8486_s21  }
  0x59   :  { %s8487_s25 = smov [#allocation6]   ;;  %s8488_s29 = smov [#allocation9]  }
  0x5a   :  { %s54_s26 = sshll.u32 %s8487_s25, 4  ;;  %s73_s30 = sshll.u32 %s8488_s29, 4  ;;  %s55_s26 = int_to_ptr.vmem [resolvable:$true] %s54_s26  ;;  %s74_s30 = int_to_ptr.vmem [resolvable:$true] %s73_s30 }
  0x5b   :  { %s8356_s12 = scalar_lea.hbm %s9866_s3, 384 }
  0x5c   :  { %p8357_p12 = scmp.ne.s32.totalorder %s9866_s3, %s8356_s12  ;;  %p8360_p13 = scmp.lt.u32.totalorder %s8356_s12, %s9866_s3 }
  0x5e   :  { %p8362_p0 = pnand %p8360_p13, %p8357_p12 }
  0x60   :  { %8365 = shalt.err (!%p8362_p0)
}
  0x61   :  { %s8366_s1 = scalar_lea.vmem %s55_s26, 384  ;;  %p8371_p2 = scmp.lt.s32.totalorder %s55_s26, %s55_s26 }
  0x62   :  { %p8367_p1 = scmp.ne.s32.totalorder %s55_s26, %s8366_s1  ;;  %p8372_p3 = scmp.lt.s32.totalorder %s8366_s1, %s8366_s1 }
  0x64   :  { %p8373_p4 = por %p8372_p3, %p8371_p2 }
  0x66   :  { %p8374_p5 = pnand %p8373_p4, %p8367_p1 }
  0x68   :  { %8377 = shalt.err (!%p8374_p5)
}
  0x69   :  { %57 = dma.hbm_to_vmem [thread:$0]  %s9866_s3, 384, %s55_s26, [#allocation5]  }
  0x6a   :  { %s8378_s22 = scalar_lea.hbm %s9868_s5, 6144 }
  0x6b   :  { %p8379_p6 = scmp.ne.s32.totalorder %s9868_s5, %s8378_s22  ;;  %p8382_p7 = scmp.lt.u32.totalorder %s8378_s22, %s9868_s5 }
  0x6d   :  { %p8384_p8 = pnand %p8382_p7, %p8379_p6 }
  0x6f   :  { %8387 = shalt.err (!%p8384_p8)
}
  0x70   :  { %s8388_s24 = scalar_lea.vmem %s74_s30, 6144  ;;  %p8393_p10 = scmp.lt.s32.totalorder %s74_s30, %s74_s30 }
  0x71   :  { %p8389_p9 = scmp.ne.s32.totalorder %s74_s30, %s8388_s24  ;;  %p8394_p11 = scmp.lt.s32.totalorder %s8388_s24, %s8388_s24 }
  0x73   :  { %p8395_p12 = por %p8394_p11, %p8393_p10 }
  0x75   :  { %p8396_p13 = pnand %p8395_p12, %p8389_p9 }
  0x77   :  { %8399 = shalt.err (!%p8396_p13)
}
  0x78   :  { %79 = dma.hbm_to_vmem [thread:$0]  %s9868_s5, 6144, %s74_s30, [#allocation8], %s8479_s27, %s8479_s27, %s8480_s28  }
  0x79   :  { %s8489_s26 = smov [#allocation12]   ;;  %s8490_s6 = smov [#allocation15]  }
  0x7a   :  { %s98_s29 = sshll.u32 %s8489_s26, 4  ;;  %s117_s15 = sshll.u32 %s8490_s6, 4  ;;  %s99_s29 = int_to_ptr.vmem [resolvable:$true] %s98_s29  ;;  %s118_s15 = int_to_ptr.vmem [resolvable:$true] %s117_s15 }
  0x7b   :  { %s8400_s16 = scalar_lea.hbm %s9870_s7, 48 }
  0x7c   :  { %p8401_p0 = scmp.ne.s32.totalorder %s9870_s7, %s8400_s16  ;;  %p8404_p1 = scmp.lt.u32.totalorder %s8400_s16, %s9870_s7 }
  0x7e   :  { %p8406_p2 = pnand %p8404_p1, %p8401_p0 }
  0x80   :  { %8409 = shalt.err (!%p8406_p2)
}
  0x81   :  { %s8410_s5 = scalar_lea.vmem %s99_s29, 48  ;;  %s8414_s27 = scalar_lea.vmem %s99_s29, 64 }
  0x82   :  { %p8411_p3 = scmp.ne.s32.totalorder %s99_s29, %s8410_s5  ;;  %p8415_p4 = scmp.lt.s32.totalorder %s99_s29, %s99_s29 }
  0x83   :  { %p8416_p5 = scmp.lt.s32.totalorder %s8414_s27, %s8410_s5 }
  0x85   :  { %p8417_p6 = por %p8416_p5, %p8415_p4 }
  0x87   :  { %p8418_p7 = pnand %p8417_p6, %p8411_p3 }
  0x89   :  { %8421 = shalt.err (!%p8418_p7)
}
  0x8a   :  { %101 = dma.hbm_to_vmem [thread:$0]  %s9870_s7, 48, %s99_s29, [#allocation11]  }
  0x8b   :  { %s8422_s20 = scalar_lea.hbm %s9872_s9, 2048 }
  0x8c   :  { %p8423_p8 = scmp.ne.s32.totalorder %s9872_s9, %s8422_s20  ;;  %p8426_p9 = scmp.lt.u32.totalorder %s8422_s20, %s9872_s9 }
  0x8e   :  { %p8428_p10 = pnand %p8426_p9, %p8423_p8 }
  0x90   :  { %8431 = shalt.err (!%p8428_p10)
}
  0x91   :  { %s8432_s18 = scalar_lea.vmem %s118_s15, 2048  ;;  %p8437_p12 = scmp.lt.s32.totalorder %s118_s15, %s118_s15 }
  0x92   :  { %p8433_p11 = scmp.ne.s32.totalorder %s118_s15, %s8432_s18  ;;  %p8438_p13 = scmp.lt.s32.totalorder %s8432_s18, %s8432_s18 }
  0x94   :  { %p8439_p0 = por %p8438_p13, %p8437_p12 }
  0x96   :  { %p8440_p1 = pnand %p8439_p0, %p8433_p11 }
  0x98   :  { %8443 = shalt.err (!%p8440_p1)
}
  0x99   :  { %s8491_s7 = smov 128   ;;  %s8492_s24 = smov 8  }
  0x9a   :  { %123 = dma.hbm_to_vmem [thread:$0]  %s9872_s9, 2048, %s118_s15, [#allocation14], %s8491_s7, %s8491_s7, %s8492_s24  }
  0x9b   :  { %s8493_s26 = smov [#allocation16]   ;;  %s8444_s14 = scalar_lea.hbm %s9873_s10, 16 }
  0x9c   :  { %s130_s29 = sshll.u32 %s8493_s26, 4  ;;  %p8445_p2 = scmp.ne.s32.totalorder %s9873_s10, %s8444_s14  ;;  %s131_s29 = int_to_ptr.vmem [resolvable:$true] %s130_s29 }
  0x9d   :  { %p8448_p3 = scmp.lt.u32.totalorder %s8444_s14, %s9873_s10 }
  0x9f   :  { %p8450_p4 = pnand %p8448_p3, %p8445_p2 }
  0xa1   :  { %8453 = shalt.err (!%p8450_p4)
}
  0xa2   :  { %s8454_s23 = scalar_lea.vmem %s131_s29, 16  ;;  %s8458_s9 = scalar_lea.vmem %s131_s29, 32 }
  0xa3   :  { %p8455_p5 = scmp.ne.s32.totalorder %s131_s29, %s8454_s23  ;;  %p8459_p6 = scmp.lt.s32.totalorder %s131_s29, %s131_s29 }
  0xa4   :  { %p8460_p7 = scmp.lt.s32.totalorder %s8458_s9, %s8454_s23 }
  0xa6   :  { %p8461_p8 = por %p8460_p7, %p8459_p6 }
  0xa8   :  { %p8462_p9 = pnand %p8461_p8, %p8455_p5 }
  0xaa   :  { %8465 = shalt.err (!%p8462_p9)
}
  0xab   :  { %133 = dma.hbm_to_vmem [thread:$0]  %s9873_s10, 16, %s131_s29, [#allocation17]  }
  0xac   :  { %8466 = dma.done.wait [#allocation3], 49152  }
  0xad   :  { %8467 = vsyncadd [#allocation3], 4294918144 }
  0xae   :  { %8468 = dma.done.wait [#allocation5], 6528  }
  0xaf   :  { %8469 = vsyncadd [#allocation5], 4294960768 }
  0xb0   :  { %8470 = dma.done.wait [#allocation8], 6160  }
  0xb1   :  { %8471 = vsyncadd [#allocation8], 4294961136 }
  0xb2   :  { %8472 = dma.done.wait [#allocation11], 6192  }
  0xb3   :  { %8473 = vsyncadd [#allocation11], 4294961104 }
  0xb4   :  { %8474 = dma.done.wait [#allocation14], 2064  }
  0xb5   :  { %8475 = vsyncadd [#allocation14], 4294965232 }
  0xb6   :  { %8476 = dma.done.wait [#allocation17], 16  }
  0xb7   :  { %8477 = vsyncadd [#allocation17], 4294967280  ;;  %v9875_v0 = vmov 0.0   ;;  %v165_v1 = vld [vmem:[#allocation2 + $0x8] sm:$0xff]  ;;  %v164_v3 = vld [vmem:[#allocation2] sm:$0xff]  ;;  %vm8496_vm0 = vmmov 0  }
  0xb8   :  { %794 = vmatprep.mubr.f32.mxu0 %v9875_v0  ;;  %865 = vmatprep.mubr.f32.mxu1 %v9875_v0  ;;  %v189_v2 = vld [vmem:[#allocation2 + $0xc8] sm:$0xff]  ;;  %v188_v5 = vld [vmem:[#allocation2 + $0xc0] sm:$0xff]  ;;  %v167_v25 = vld [vmem:[#allocation2 + $0x18] sm:$0xff] }
  0xb9   :  { %v6480_v4 = vpack.c.bf16 %v189_v2, %v165_v1  ;;  %v213_v6 = vld [vmem:[#allocation2 + $0x188] sm:$0xff]  ;;  %v6482_v8 = vpack.c.bf16 %v188_v5, %v164_v3  ;;  %v212_v10 = vld [vmem:[#allocation2 + $0x180] sm:$0xff]  ;;  %v191_v26 = vld [vmem:[#allocation2 + $0xd8] sm:$0xff] }
  0xba   :  { %v237_v7 = vld [vmem:[#allocation2 + $0x248] sm:$0xff]  ;;  %v236_v11 = vld [vmem:[#allocation2 + $0x240] sm:$0xff]  ;;  %v6512_v28 = vpack.c.bf16 %v191_v26, %v167_v25  ;;  %v166_v29 = vld [vmem:[#allocation2 + $0x10] sm:$0xff] }
  0xbb   :  { %v6484_v9 = vpack.c.bf16 %v237_v7, %v213_v6  ;;  %v261_v12 = vld [vmem:[#allocation2 + $0x308] sm:$0xff]  ;;  %6481 = vmatprep.subr.bf16.mxu0 %v6480_v4  ;;  %v6486_v14 = vpack.c.bf16 %v236_v11, %v212_v10  ;;  %v260_v16 = vld [vmem:[#allocation2 + $0x300] sm:$0xff]  ;;  %v190_v30 = vld [vmem:[#allocation2 + $0xd0] sm:$0xff] }
  0xbc   :  { %v285_v13 = vld [vmem:[#allocation2 + $0x3c8] sm:$0xff]  ;;  %6483 = vmatpush1.bf16.msra.mxu0 %v6482_v8  ;;  %v284_v17 = vld [vmem:[#allocation2 + $0x3c0] sm:$0xff]  ;;  %v6514_v32 = vpack.c.bf16 %v190_v30, %v166_v29  ;;  %6513 = vmatprep.subr.bf16.mxu1 %v6512_v28  ;;  %v215_v34 = vld [vmem:[#allocation2 + $0x198] sm:$0xff] }
  0xbd   :  { %6485 = vmatprep.subr.bf16.mxu0 %v6484_v9  ;;  %v6488_v15 = vpack.c.bf16 %v285_v13, %v261_v12  ;;  %v309_v18 = vld [vmem:[#allocation2 + $0x488] sm:$0xff]  ;;  %v6490_v20 = vpack.c.bf16 %v284_v17, %v260_v16  ;;  %v308_v21 = vld [vmem:[#allocation2 + $0x480] sm:$0xff]  ;;  %v239_v35 = vld [vmem:[#allocation2 + $0x258] sm:$0xff] }
  0xbe   :  { %v333_v19 = vld [vmem:[#allocation2 + $0x548] sm:$0xff]  ;;  %v332_v22 = vld [vmem:[#allocation2 + $0x540] sm:$0xff]  ;;  %v214_v36 = vld [vmem:[#allocation2 + $0x190] sm:$0xff]  ;;  %6515 = vmatpush1.bf16.msra.mxu1 %v6514_v32  ;;  %v6516_v40 = vpack.c.bf16 %v239_v35, %v215_v34 }
  0xbf   :  { %v6492_v23 = vpack.c.bf16 %v333_v19, %v309_v18  ;;  %v357_v24 = vld [vmem:[#allocation2 + $0x608] sm:$0xff]  ;;  %v356_v31 = vld [vmem:[#allocation2 + $0x600] sm:$0xff]  ;;  %v6494_v33 = vpack.c.bf16 %v332_v22, %v308_v21  ;;  %v238_v41 = vld [vmem:[#allocation2 + $0x250] sm:$0xff] }
  0xc0   :  { %6487 = vmatpush1.bf16.msra.mxu0 %v6486_v14  ;;  %v381_v27 = vld [vmem:[#allocation2 + $0x6c8] sm:$0xff]  ;;  %v380_v38 = vld [vmem:[#allocation2 + $0x6c0] sm:$0xff]  ;;  %v6518_v43 = vpack.c.bf16 %v238_v41, %v214_v36  ;;  %v263_v44 = vld [vmem:[#allocation2 + $0x318] sm:$0xff]  ;;  %6517 = vmatprep.subr.bf16.mxu1 %v6516_v40 }
  0xc1   :  { %6489 = vmatprep.subr.bf16.mxu0 %v6488_v15  ;;  %v6496_v37 = vpack.c.bf16 %v381_v27, %v357_v24  ;;  %v405_v39 = vld [vmem:[#allocation2 + $0x788] sm:$0xff]  ;;  %v287_v45 = vld [vmem:[#allocation2 + $0x3d8] sm:$0xff]  ;;  %v262_v47 = vld [vmem:[#allocation2 + $0x310] sm:$0xff]  ;;  %v6498_v48 = vpack.c.bf16 %v380_v38, %v356_v31 }
  0xc2   :  { %v429_v42 = vld [vmem:[#allocation2 + $0x848] sm:$0xff]  ;;  %v6520_v46 = vpack.c.bf16 %v287_v45, %v263_v44  ;;  %v404_v49 = vld [vmem:[#allocation2 + $0x780] sm:$0xff]  ;;  %v286_v51 = vld [vmem:[#allocation2 + $0x3d0] sm:$0xff]  ;;  %6519 = vmatpush1.bf16.msra.mxu1 %v6518_v43 }
  0xc3   :  { %v428_v50 = vld [vmem:[#allocation2 + $0x840] sm:$0xff]  ;;  %v6500_v52 = vpack.c.bf16 %v429_v42, %v405_v39  ;;  %v453_v53 = vld [vmem:[#allocation2 + $0x908] sm:$0xff]  ;;  %v6522_v54 = vpack.c.bf16 %v286_v51, %v262_v47  ;;  %v311_v55 = vld [vmem:[#allocation2 + $0x498] sm:$0xff] }
  0xc4   :  { %6491 = vmatpush1.bf16.msra.mxu0 %v6490_v20  ;;  %v335_v56 = vld [vmem:[#allocation2 + $0x558] sm:$0xff]  ;;  %v477_v57 = vld [vmem:[#allocation2 + $0x9c8] sm:$0xff]  ;;  %6521 = vmatprep.subr.bf16.mxu1 %v6520_v46  ;;  %v310_v59 = vld [vmem:[#allocation2 + $0x490] sm:$0xff]  ;;  %v6502_v62 = vpack.c.bf16 %v428_v50, %v404_v49 }
  0xc5   :  { %6493 = vmatprep.subr.bf16.mxu0 %v6492_v23  ;;  %v6524_v58 = vpack.c.bf16 %v335_v56, %v311_v55  ;;  %v334_v60 = vld [vmem:[#allocation2 + $0x550] sm:$0xff]  ;;  %v359_v61 = vld [vmem:[#allocation2 + $0x618] sm:$0xff]  ;;  %v6504_v1 = vpack.c.bf16 %v477_v57, %v453_v53  ;;  %v452_v2 = vld [vmem:[#allocation2 + $0x900] sm:$0xff] }
  0xc6   :  { %v383_v63 = vld [vmem:[#allocation2 + $0x6d8] sm:$0xff]  ;;  %v476_v3 = vld [vmem:[#allocation2 + $0x9c0] sm:$0xff]  ;;  %v501_v4 = vld [vmem:[#allocation2 + $0xa88] sm:$0xff]  ;;  %6523 = vmatpush1.bf16.msra.mxu1 %v6522_v54  ;;  %v6526_v5 = vpack.c.bf16 %v334_v60, %v310_v59 }
  0xc7   :  { %v525_v6 = vld [vmem:[#allocation2 + $0xb48] sm:$0xff]  ;;  %6525 = vmatprep.subr.bf16.mxu1 %v6524_v58  ;;  %v6528_v7 = vpack.c.bf16 %v383_v63, %v359_v61  ;;  %v358_v8 = vld [vmem:[#allocation2 + $0x610] sm:$0xff]  ;;  %v407_v10 = vld [vmem:[#allocation2 + $0x798] sm:$0xff]  ;;  %v6506_v12 = vpack.c.bf16 %v476_v3, %v452_v2 }
  0xc8   :  { %6495 = vmatpush1.bf16.msra.mxu0 %v6494_v33  ;;  %v382_v9 = vld [vmem:[#allocation2 + $0x6d0] sm:$0xff]  ;;  %v431_v11 = vld [vmem:[#allocation2 + $0x858] sm:$0xff]  ;;  %v6508_v13 = vpack.c.bf16 %v525_v6, %v501_v4  ;;  %v500_v14 = vld [vmem:[#allocation2 + $0xa80] sm:$0xff] }
  0xc9   :  { %6497 = vmatprep.subr.bf16.mxu0 %v6496_v37  ;;  %v524_v15 = vld [vmem:[#allocation2 + $0xb40] sm:$0xff]  ;;  %v169_v16 = vld [vmem:[#allocation2 + $0x28] sm:$0xff]  ;;  %v6530_v17 = vpack.c.bf16 %v382_v9, %v358_v8  ;;  %v6532_v19 = vpack.c.bf16 %v431_v11, %v407_v10  ;;  %v406_v20 = vld [vmem:[#allocation2 + $0x790] sm:$0xff] }
  0xca   :  { %6527 = vmatpush1.bf16.msra.mxu1 %v6526_v5  ;;  %v193_v18 = vld [vmem:[#allocation2 + $0xe8] sm:$0xff]  ;;  %v430_v21 = vld [vmem:[#allocation2 + $0x850] sm:$0xff]  ;;  %v455_v22 = vld [vmem:[#allocation2 + $0x918] sm:$0xff]  ;;  %v6510_v24 = vpack.c.bf16 %v524_v15, %v500_v14 }
  0xcb   :  { %6529 = vmatprep.subr.bf16.mxu1 %v6528_v7  ;;  %v479_v23 = vld [vmem:[#allocation2 + $0x9d8] sm:$0xff]  ;;  %v6544_v25 = vpack.c.bf16 %v193_v18, %v169_v16  ;;  %v168_v26 = vld [vmem:[#allocation2 + $0x20] sm:$0xff]  ;;  %v217_v28 = vld [vmem:[#allocation2 + $0x1a8] sm:$0xff]  ;;  %v6534_v29 = vpack.c.bf16 %v430_v21, %v406_v20 }
  0xcc   :  { %6499 = vmatpush1.bf16.msra.mxu0 %v6498_v48  ;;  %v192_v27 = vld [vmem:[#allocation2 + $0xe0] sm:$0xff]  ;;  %v241_v30 = vld [vmem:[#allocation2 + $0x268] sm:$0xff]  ;;  %v6536_v31 = vpack.c.bf16 %v479_v23, %v455_v22  ;;  %v454_v32 = vld [vmem:[#allocation2 + $0x910] sm:$0xff] }
  0xcd   :  { %6501 = vmatprep.subr.bf16.mxu0 %v6500_v52  ;;  %v478_v33 = vld [vmem:[#allocation2 + $0x9d0] sm:$0xff]  ;;  %v503_v34 = vld [vmem:[#allocation2 + $0xa98] sm:$0xff]  ;;  %v8691_v36 = vld [vmem:[%s9863_s0] sm:$0xff]  ;;  %v6546_v37 = vpack.c.bf16 %v192_v27, %v168_v26  ;;  %v6548_v38 = vpack.c.bf16 %v241_v30, %v217_v28 }
  0xce   :  { %6531 = vmatpush1.bf16.msra.mxu1 %v6530_v17  ;;  %v527_v35 = vld [vmem:[#allocation2 + $0xb58] sm:$0xff]  ;;  %v216_v39 = vld [vmem:[#allocation2 + $0x1a0] sm:$0xff]  ;;  %v265_v41 = vld [vmem:[#allocation2 + $0x328] sm:$0xff]  ;;  %v6538_v42 = vpack.c.bf16 %v478_v33, %v454_v32 }
  0xcf   :  { %6533 = vmatprep.subr.bf16.mxu1 %v6532_v19  ;;  %v240_v40 = vld [vmem:[#allocation2 + $0x260] sm:$0xff]  ;;  %v289_v43 = vld [vmem:[#allocation2 + $0x3e8] sm:$0xff]  ;;  %v6540_v44 = vpack.c.bf16 %v527_v35, %v503_v34  ;;  %v502_v45 = vld [vmem:[#allocation2 + $0xa90] sm:$0xff] }
  0xd0   :  { %6503 = vmatpush1.bf16.msra.mxu0 %v6502_v62  ;;  %v526_v46 = vld [vmem:[#allocation2 + $0xb50] sm:$0xff]  ;;  %v171_v47 = vld [vmem:[#allocation2 + $0x38] sm:$0xff]  ;;  %v6550_v49 = vpack.c.bf16 %v240_v40, %v216_v39  ;;  %v6552_v50 = vpack.c.bf16 %v289_v43, %v265_v41  ;;  %v264_v51 = vld [vmem:[#allocation2 + $0x320] sm:$0xff] }
  0xd1   :  { %6505 = vmatprep.subr.bf16.mxu0 %v6504_v1  ;;  %v195_v48 = vld [vmem:[#allocation2 + $0xf8] sm:$0xff]  ;;  %v288_v52 = vld [vmem:[#allocation2 + $0x3e0] sm:$0xff]  ;;  %v313_v53 = vld [vmem:[#allocation2 + $0x4a8] sm:$0xff]  ;;  %v6542_v54 = vpack.c.bf16 %v526_v46, %v502_v45 }
  0xd2   :  { %6535 = vmatpush1.bf16.msra.mxu1 %v6534_v29  ;;  %v337_v55 = vld [vmem:[#allocation2 + $0x568] sm:$0xff]  ;;  %v6576_v56 = vpack.c.bf16 %v195_v48, %v171_v47  ;;  %v170_v57 = vld [vmem:[#allocation2 + $0x30] sm:$0xff]  ;;  %v219_v59 = vld [vmem:[#allocation2 + $0x1b8] sm:$0xff]  ;;  %v6554_v61 = vpack.c.bf16 %v288_v52, %v264_v51 }
  0xd3   :  { %6537 = vmatprep.subr.bf16.mxu1 %v6536_v31  ;;  %v194_v58 = vld [vmem:[#allocation2 + $0xf0] sm:$0xff]  ;;  %v243_v60 = vld [vmem:[#allocation2 + $0x278] sm:$0xff]  ;;  %v6556_v62 = vpack.c.bf16 %v337_v55, %v313_v53  ;;  %v312_v63 = vld [vmem:[#allocation2 + $0x4a0] sm:$0xff] }
  0xd4   :  { %6507 = vmatpush1.bf16.msra.mxu0 %v6506_v12  ;;  %v336_v1 = vld [vmem:[#allocation2 + $0x560] sm:$0xff]  ;;  %v361_v2 = vld [vmem:[#allocation2 + $0x628] sm:$0xff]  ;;  %v6578_v3 = vpack.c.bf16 %v194_v58, %v170_v57  ;;  %v6580_v5 = vpack.c.bf16 %v243_v60, %v219_v59  ;;  %v218_v6 = vld [vmem:[#allocation2 + $0x1b0] sm:$0xff] }
  0xd5   :  { %6509 = vmatprep.subr.bf16.mxu0 %v6508_v13  ;;  %v385_v4 = vld [vmem:[#allocation2 + $0x6e8] sm:$0xff]  ;;  %v242_v7 = vld [vmem:[#allocation2 + $0x270] sm:$0xff]  ;;  %v267_v8 = vld [vmem:[#allocation2 + $0x338] sm:$0xff]  ;;  %v6558_v10 = vpack.c.bf16 %v336_v1, %v312_v63 }
  0xd6   :  { %6539 = vmatpush1.bf16.msra.mxu1 %v6538_v42  ;;  %v291_v9 = vld [vmem:[#allocation2 + $0x3f8] sm:$0xff]  ;;  %v6560_v11 = vpack.c.bf16 %v385_v4, %v361_v2  ;;  %v360_v12 = vld [vmem:[#allocation2 + $0x620] sm:$0xff]  ;;  %v409_v14 = vld [vmem:[#allocation2 + $0x7a8] sm:$0xff]  ;;  %v6582_v15 = vpack.c.bf16 %v242_v7, %v218_v6 }
  0xd7   :  { %6541 = vmatprep.subr.bf16.mxu1 %v6540_v44  ;;  %v384_v13 = vld [vmem:[#allocation2 + $0x6e0] sm:$0xff]  ;;  %v433_v16 = vld [vmem:[#allocation2 + $0x868] sm:$0xff]  ;;  %v6584_v17 = vpack.c.bf16 %v291_v9, %v267_v8  ;;  %v266_v18 = vld [vmem:[#allocation2 + $0x330] sm:$0xff] }
  0xd8   :  { %6511 = vmatpush1.bf16.msra.mxu0 %v6510_v24  ;;  %v290_v19 = vld [vmem:[#allocation2 + $0x3f0] sm:$0xff]  ;;  %v315_v20 = vld [vmem:[#allocation2 + $0x4b8] sm:$0xff]  ;;  %v6562_v22 = vpack.c.bf16 %v384_v13, %v360_v12  ;;  %v6564_v23 = vpack.c.bf16 %v433_v16, %v409_v14  ;;  %v408_v24 = vld [vmem:[#allocation2 + $0x7a0] sm:$0xff] }
  0xd9   :  { %6545 = vmatprep.subr.bf16.mxu0 %v6544_v25  ;;  %v339_v21 = vld [vmem:[#allocation2 + $0x578] sm:$0xff]  ;;  %v432_v25 = vld [vmem:[#allocation2 + $0x860] sm:$0xff]  ;;  %v457_v26 = vld [vmem:[#allocation2 + $0x928] sm:$0xff]  ;;  %v6586_v27 = vpack.c.bf16 %v290_v19, %v266_v18 }
  0xda   :  { %6543 = vmatpush1.bf16.msra.mxu1 %v6542_v54  ;;  %v481_v28 = vld [vmem:[#allocation2 + $0x9e8] sm:$0xff]  ;;  %v6588_v29 = vpack.c.bf16 %v339_v21, %v315_v20  ;;  %v314_v30 = vld [vmem:[#allocation2 + $0x4b0] sm:$0xff]  ;;  %v363_v32 = vld [vmem:[#allocation2 + $0x638] sm:$0xff]  ;;  %v6566_v34 = vpack.c.bf16 %v432_v25, %v408_v24 }
  0xdb   :  { %795 = vmatmul.mubr.f32.vlgmr.msra.gmra.mrb[0].mxu0 %v8691_v36  ;;  %6577 = vmatprep.subr.bf16.mxu1 %v6576_v56  ;;  %v338_v31 = vld [vmem:[#allocation2 + $0x570] sm:$0xff]  ;;  %v387_v33 = vld [vmem:[#allocation2 + $0x6f8] sm:$0xff]  ;;  %v6568_v35 = vpack.c.bf16 %v481_v28, %v457_v26  ;;  %v505_v39 = vld [vmem:[#allocation2 + $0xaa8] sm:$0xff] }
  0xdc   :  { %6547 = vmatpush1.bf16.msra.mxu0 %v6546_v37  ;;  %936 = vmatprep.mubr.f32.mxu0 %v9875_v0  ;;  %v456_v37 = vld [vmem:[#allocation2 + $0x920] sm:$0xff]  ;;  %v6590_v40 = vpack.c.bf16 %v338_v31, %v314_v30  ;;  %v529_v41 = vld [vmem:[#allocation2 + $0xb68] sm:$0xff]  ;;  %v6592_v42 = vpack.c.bf16 %v387_v33, %v363_v32  ;;  %v362_v43 = vld [vmem:[#allocation2 + $0x630] sm:$0xff] }
  0xdd   :  { %6549 = vmatprep.subr.bf16.mxu0 %v6548_v38  ;;  %866 = vmatmul.mubr.f32.vlgmr.msra.gmra.mrb[0].mxu1 %v8691_v36  ;;  %v480_v38 = vld [vmem:[#allocation2 + $0x9e0] sm:$0xff]  ;;  %v386_v44 = vld [vmem:[#allocation2 + $0x6f0] sm:$0xff]  ;;  %v411_v45 = vld [vmem:[#allocation2 + $0x7b8] sm:$0xff]  ;;  %v6572_v48 = vpack.c.bf16 %v529_v41, %v505_v39 }
  0xde   :  { %6579 = vmatpush1.bf16.msra.mxu1 %v6578_v3  ;;  %1007 = vmatprep.mubr.f32.mxu1 %v9875_v0  ;;  %v435_v46 = vld [vmem:[#allocation2 + $0x878] sm:$0xff]  ;;  %v6570_v47 = vpack.c.bf16 %v480_v38, %v456_v37  ;;  %v173_v51 = vld [vmem:[#allocation2 + $0x48] sm:$0xff]  ;;  %v6594_v52 = vpack.c.bf16 %v386_v44, %v362_v43  ;;  %v410_v55 = vld [vmem:[#allocation2 + $0x7b0] sm:$0xff] }
  0xdf   :  { %6581 = vmatprep.subr.bf16.mxu1 %v6580_v5  ;;  %v197_v53 = vld [vmem:[#allocation2 + $0x108] sm:$0xff]  ;;  %v6596_v54 = vpack.c.bf16 %v435_v46, %v411_v45  ;;  %v434_v56 = vld [vmem:[#allocation2 + $0x870] sm:$0xff]  ;;  %v459_v57 = vld [vmem:[#allocation2 + $0x938] sm:$0xff] }
  0xe0   :  { %6551 = vmatpush1.bf16.msra.mxu0 %v6550_v49  ;;  %v504_v49 = vld [vmem:[#allocation2 + $0xaa0] sm:$0xff]  ;;  %v483_v58 = vld [vmem:[#allocation2 + $0x9f8] sm:$0xff]  ;;  %v6608_v60 = vpack.c.bf16 %v197_v53, %v173_v51  ;;  %v221_v63 = vld [vmem:[#allocation2 + $0x1c8] sm:$0xff]  ;;  %v6598_v1 = vpack.c.bf16 %v434_v56, %v410_v55 }
  0xe1   :  { %6553 = vmatprep.subr.bf16.mxu0 %v6552_v50  ;;  %v528_v50 = vld [vmem:[#allocation2 + $0xb60] sm:$0xff]  ;;  %v245_v2 = vld [vmem:[#allocation2 + $0x288] sm:$0xff]  ;;  %v6600_v3 = vpack.c.bf16 %v483_v58, %v459_v57  ;;  %v458_v4 = vld [vmem:[#allocation2 + $0x930] sm:$0xff] }
  0xe2   :  { %6583 = vmatpush1.bf16.msra.mxu1 %v6582_v15  ;;  %v6574_v59 = vpack.c.bf16 %v528_v50, %v504_v49  ;;  %v482_v5 = vld [vmem:[#allocation2 + $0x9f0] sm:$0xff]  ;;  %v507_v6 = vld [vmem:[#allocation2 + $0xab8] sm:$0xff]  ;;  %v6612_v9 = vpack.c.bf16 %v245_v2, %v221_v63  ;;  %v269_v12 = vld [vmem:[#allocation2 + $0x348] sm:$0xff] }
  0xe3   :  { %6585 = vmatprep.subr.bf16.mxu1 %v6584_v17  ;;  %v531_v7 = vld [vmem:[#allocation2 + $0xb78] sm:$0xff]  ;;  %v6602_v13 = vpack.c.bf16 %v482_v5, %v458_v4  ;;  %v293_v14 = vld [vmem:[#allocation2 + $0x408] sm:$0xff]  ;;  %v506_v16 = vld [vmem:[#allocation2 + $0xab0] sm:$0xff] }
  0xe4   :  { %6555 = vmatpush1.bf16.msra.mxu0 %v6554_v61  ;;  %v172_v61 = vld [vmem:[#allocation2 + $0x40] sm:$0xff]  ;;  %v6604_v15 = vpack.c.bf16 %v531_v7, %v507_v6  ;;  %v530_v17 = vld [vmem:[#allocation2 + $0xb70] sm:$0xff]  ;;  %v175_v18 = vld [vmem:[#allocation2 + $0x58] sm:$0xff]  ;;  %v6616_v21 = vpack.c.bf16 %v293_v14, %v269_v12 }
  0xe5   :  { %6557 = vmatprep.subr.bf16.mxu0 %v6556_v62  ;;  %v196_v62 = vld [vmem:[#allocation2 + $0x100] sm:$0xff]  ;;  %v199_v19 = vld [vmem:[#allocation2 + $0x118] sm:$0xff]  ;;  %v317_v24 = vld [vmem:[#allocation2 + $0x4c8] sm:$0xff]  ;;  %v6606_v25 = vpack.c.bf16 %v530_v17, %v506_v16 }
  0xe6   :  { %6587 = vmatpush1.bf16.msra.mxu1 %v6586_v27  ;;  %v6610_v8 = vpack.c.bf16 %v196_v62, %v172_v61  ;;  %v341_v26 = vld [vmem:[#allocation2 + $0x588] sm:$0xff]  ;;  %v6640_v27 = vpack.c.bf16 %v199_v19, %v175_v18  ;;  %v174_v28 = vld [vmem:[#allocation2 + $0x50] sm:$0xff]  ;;  %v223_v30 = vld [vmem:[#allocation2 + $0x1d8] sm:$0xff] }
  0xe7   :  { %6589 = vmatprep.subr.bf16.mxu1 %v6588_v29  ;;  %v198_v29 = vld [vmem:[#allocation2 + $0x110] sm:$0xff]  ;;  %v247_v31 = vld [vmem:[#allocation2 + $0x298] sm:$0xff]  ;;  %v6620_v33 = vpack.c.bf16 %v341_v26, %v317_v24  ;;  %v365_v37 = vld [vmem:[#allocation2 + $0x648] sm:$0xff] }
  0xe8   :  { %6559 = vmatpush1.bf16.msra.mxu0 %v6558_v10  ;;  %v220_v10 = vld [vmem:[#allocation2 + $0x1c0] sm:$0xff]  ;;  %v6642_v38 = vpack.c.bf16 %v198_v29, %v174_v28  ;;  %v389_v39 = vld [vmem:[#allocation2 + $0x708] sm:$0xff]  ;;  %v222_v41 = vld [vmem:[#allocation2 + $0x1d0] sm:$0xff] }
  0xe9   :  { %6561 = vmatprep.subr.bf16.mxu0 %v6560_v11  ;;  %v244_v11 = vld [vmem:[#allocation2 + $0x280] sm:$0xff]  ;;  %v271_v43 = vld [vmem:[#allocation2 + $0x358] sm:$0xff]  ;;  %v6624_v46 = vpack.c.bf16 %v389_v39, %v365_v37  ;;  %v413_v49 = vld [vmem:[#allocation2 + $0x7c8] sm:$0xff] }
  0xea   :  { %6591 = vmatpush1.bf16.msra.mxu1 %v6590_v40  ;;  %v6614_v20 = vpack.c.bf16 %v244_v11, %v220_v10  ;;  %v6644_v40 = vpack.c.bf16 %v247_v31, %v223_v30  ;;  %v295_v44 = vld [vmem:[#allocation2 + $0x418] sm:$0xff]  ;;  %v437_v51 = vld [vmem:[#allocation2 + $0x888] sm:$0xff]  ;;  %v270_v53 = vld [vmem:[#allocation2 + $0x350] sm:$0xff] }
  0xeb   :  { %6593 = vmatprep.subr.bf16.mxu1 %v6592_v42  ;;  %v246_v42 = vld [vmem:[#allocation2 + $0x290] sm:$0xff]  ;;  %v319_v55 = vld [vmem:[#allocation2 + $0x4d8] sm:$0xff]  ;;  %v6628_v58 = vpack.c.bf16 %v437_v51, %v413_v49  ;;  %v461_v61 = vld [vmem:[#allocation2 + $0x948] sm:$0xff] }
  0xec   :  { %6563 = vmatpush1.bf16.msra.mxu0 %v6562_v22  ;;  %v268_v22 = vld [vmem:[#allocation2 + $0x340] sm:$0xff]  ;;  %v6646_v50 = vpack.c.bf16 %v246_v42, %v222_v41  ;;  %v343_v56 = vld [vmem:[#allocation2 + $0x598] sm:$0xff]  ;;  %v485_v63 = vld [vmem:[#allocation2 + $0xa08] sm:$0xff] }
  0xed   :  { %6565 = vmatprep.subr.bf16.mxu0 %v6564_v23  ;;  %v292_v23 = vld [vmem:[#allocation2 + $0x400] sm:$0xff]  ;;  %v318_v2 = vld [vmem:[#allocation2 + $0x4d0] sm:$0xff]  ;;  %v367_v4 = vld [vmem:[#allocation2 + $0x658] sm:$0xff]  ;;  %v6632_v7 = vpack.c.bf16 %v485_v63, %v461_v61 }
  0xee   :  { %6595 = vmatpush1.bf16.msra.mxu1 %v6594_v52  ;;  %v6618_v32 = vpack.c.bf16 %v292_v23, %v268_v22  ;;  %v6648_v52 = vpack.c.bf16 %v295_v44, %v271_v43  ;;  %v391_v5 = vld [vmem:[#allocation2 + $0x718] sm:$0xff]  ;;  %v509_v10 = vld [vmem:[#allocation2 + $0xac8] sm:$0xff]  ;;  %v366_v14 = vld [vmem:[#allocation2 + $0x650] sm:$0xff] }
  0xef   :  { %6597 = vmatprep.subr.bf16.mxu1 %v6596_v54  ;;  %v294_v54 = vld [vmem:[#allocation2 + $0x410] sm:$0xff]  ;;  %v533_v12 = vld [vmem:[#allocation2 + $0xb88] sm:$0xff]  ;;  %v415_v16 = vld [vmem:[#allocation2 + $0x7d8] sm:$0xff] }
  0xf0   :  { %6567 = vmatpush1.bf16.msra.mxu0 %v6566_v34  ;;  %v316_v34 = vld [vmem:[#allocation2 + $0x4c0] sm:$0xff]  ;;  %v6650_v62 = vpack.c.bf16 %v294_v54, %v270_v53  ;;  %v439_v17 = vld [vmem:[#allocation2 + $0x898] sm:$0xff]  ;;  %v6636_v19 = vpack.c.bf16 %v533_v12, %v509_v10  ;;  %v177_v22 = vld [vmem:[#allocation2 + $0x68] sm:$0xff] }
  0xf1   :  { %6569 = vmatprep.subr.bf16.mxu0 %v6568_v35  ;;  %v340_v35 = vld [vmem:[#allocation2 + $0x580] sm:$0xff]  ;;  %v201_v24 = vld [vmem:[#allocation2 + $0x128] sm:$0xff]  ;;  %v414_v26 = vld [vmem:[#allocation2 + $0x7d0] sm:$0xff] }
  0xf2   :  { %6599 = vmatpush1.bf16.msra.mxu1 %v6598_v1  ;;  %v6622_v45 = vpack.c.bf16 %v340_v35, %v316_v34  ;;  %v6652_v1 = vpack.c.bf16 %v343_v56, %v319_v55  ;;  %v463_v28 = vld [vmem:[#allocation2 + $0x958] sm:$0xff]  ;;  %v6672_v31 = vpack.c.bf16 %v201_v24, %v177_v22  ;;  %v225_v34 = vld [vmem:[#allocation2 + $0x1e8] sm:$0xff]  ;;  %v462_v39 = vld [vmem:[#allocation2 + $0x950] sm:$0xff] }
  0xf3   :  { %6601 = vmatprep.subr.bf16.mxu1 %v6600_v3  ;;  %v342_v3 = vld [vmem:[#allocation2 + $0x590] sm:$0xff]  ;;  %v487_v29 = vld [vmem:[#allocation2 + $0xa18] sm:$0xff]  ;;  %v249_v37 = vld [vmem:[#allocation2 + $0x2a8] sm:$0xff] }
  0xf4   :  { %6571 = vmatpush1.bf16.msra.mxu0 %v6570_v47  ;;  %v364_v47 = vld [vmem:[#allocation2 + $0x640] sm:$0xff]  ;;  %v6654_v11 = vpack.c.bf16 %v342_v3, %v318_v2  ;;  %v511_v41 = vld [vmem:[#allocation2 + $0xad8] sm:$0xff]  ;;  %v6676_v44 = vpack.c.bf16 %v249_v37, %v225_v34  ;;  %v297_v49 = vld [vmem:[#allocation2 + $0x428] sm:$0xff] }
  0xf5   :  { %6573 = vmatprep.subr.bf16.mxu0 %v6572_v48  ;;  %v388_v48 = vld [vmem:[#allocation2 + $0x700] sm:$0xff]  ;;  %v535_v42 = vld [vmem:[#allocation2 + $0xb98] sm:$0xff]  ;;  %v510_v51 = vld [vmem:[#allocation2 + $0xad0] sm:$0xff] }
  0xf6   :  { %6603 = vmatpush1.bf16.msra.mxu1 %v6602_v13  ;;  %v6626_v57 = vpack.c.bf16 %v388_v48, %v364_v47  ;;  %v6656_v13 = vpack.c.bf16 %v391_v5, %v367_v4  ;;  %v273_v47 = vld [vmem:[#allocation2 + $0x368] sm:$0xff]  ;;  %v179_v53 = vld [vmem:[#allocation2 + $0x78] sm:$0xff]  ;;  %v178_v63 = vld [vmem:[#allocation2 + $0x70] sm:$0xff] }
  0xf7   :  { %6605 = vmatprep.subr.bf16.mxu1 %v6604_v15  ;;  %v390_v15 = vld [vmem:[#allocation2 + $0x710] sm:$0xff]  ;;  %v203_v54 = vld [vmem:[#allocation2 + $0x138] sm:$0xff]  ;;  %v6680_v56 = vpack.c.bf16 %v297_v49, %v273_v47  ;;  %v345_v61 = vld [vmem:[#allocation2 + $0x5a8] sm:$0xff] }
  0xf8   :  { %6575 = vmatpush1.bf16.msra.mxu0 %v6574_v59  ;;  %v412_v59 = vld [vmem:[#allocation2 + $0x7c0] sm:$0xff]  ;;  %v6658_v23 = vpack.c.bf16 %v390_v15, %v366_v14  ;;  %v227_v2 = vld [vmem:[#allocation2 + $0x1f8] sm:$0xff]  ;;  %v393_v10 = vld [vmem:[#allocation2 + $0x728] sm:$0xff] }
  0xf9   :  { %6609 = vmatprep.subr.bf16.mxu0 %v6608_v60  ;;  %v436_v60 = vld [vmem:[#allocation2 + $0x880] sm:$0xff]  ;;  %v251_v3 = vld [vmem:[#allocation2 + $0x2b8] sm:$0xff]  ;;  %v226_v12 = vld [vmem:[#allocation2 + $0x1f0] sm:$0xff] }
  0xfa   :  { %6607 = vmatpush1.bf16.msra.mxu1 %v6606_v25  ;;  %v6630_v6 = vpack.c.bf16 %v436_v60, %v412_v59  ;;  %v6660_v25 = vpack.c.bf16 %v439_v17, %v415_v16  ;;  %v321_v59 = vld [vmem:[#allocation2 + $0x4e8] sm:$0xff]  ;;  %v275_v14 = vld [vmem:[#allocation2 + $0x378] sm:$0xff]  ;;  %v274_v24 = vld [vmem:[#allocation2 + $0x370] sm:$0xff] }
  0xfb   :  { %937 = vmatmul.mubr.f32.vlgmr.msra.gmra.mrb[2].mxu0 %v8691_v36  ;;  %6641 = vmatprep.subr.bf16.mxu1 %v6640_v27  ;;  %v438_v27 = vld [vmem:[#allocation2 + $0x890] sm:$0xff]  ;;  %v6684_v5 = vpack.c.bf16 %v345_v61, %v321_v59  ;;  %v299_v15 = vld [vmem:[#allocation2 + $0x438] sm:$0xff]  ;;  %v441_v22 = vld [vmem:[#allocation2 + $0x8a8] sm:$0xff] }
  0xfc   :  { %6611 = vmatpush1.bf16.msra.mxu0 %v6610_v8  ;;  %1078 = vmatprep.mubr.f32.mxu0 %v9875_v0  ;;  %v460_v8 = vld [vmem:[#allocation2 + $0x940] sm:$0xff]  ;;  %v6662_v35 = vpack.c.bf16 %v438_v27, %v414_v26  ;;  %v323_v26 = vld [vmem:[#allocation2 + $0x4f8] sm:$0xff]  ;;  %v489_v34 = vld [vmem:[#allocation2 + $0xa28] sm:$0xff] }
  0xfd   :  { %6613 = vmatprep.subr.bf16.mxu0 %v6612_v9  ;;  %1008 = vmatmul.mubr.f32.vlgmr.msra.gmra.mrb[2].mxu1 %v8691_v36  ;;  %v484_v9 = vld [vmem:[#allocation2 + $0xa00] sm:$0xff]  ;;  %v347_v27 = vld [vmem:[#allocation2 + $0x5b8] sm:$0xff]  ;;  %v322_v37 = vld [vmem:[#allocation2 + $0x4f0] sm:$0xff] }
  0xfe   :  { %6643 = vmatpush1.bf16.msra.mxu1 %v6642_v38  ;;  %1149 = vmatprep.mubr.f32.mxu1 %v9875_v0  ;;  %v6634_v18 = vpack.c.bf16 %v484_v9, %v460_v8  ;;  %v6664_v38 = vpack.c.bf16 %v487_v29, %v463_v28  ;;  %v369_v8 = vld [vmem:[#allocation2 + $0x668] sm:$0xff]  ;;  %v370_v49 = vld [vmem:[#allocation2 + $0x670] sm:$0xff] }
  0xff   :  { %6645 = vmatprep.subr.bf16.mxu1 %v6644_v40  ;;  %v486_v40 = vld [vmem:[#allocation2 + $0xa10] sm:$0xff]  ;;  %v6688_v17 = vpack.c.bf16 %v393_v10, %v369_v8  ;;  %v537_v47 = vld [vmem:[#allocation2 + $0xba8] sm:$0xff] }
 0x100   :  { %6615 = vmatpush1.bf16.msra.mxu0 %v6614_v20  ;;  %v508_v20 = vld [vmem:[#allocation2 + $0xac0] sm:$0xff]  ;;  %v6666_v48 = vpack.c.bf16 %v486_v40, %v462_v39  ;;  %v371_v39 = vld [vmem:[#allocation2 + $0x678] sm:$0xff]  ;;  %v205_v59 = vld [vmem:[#allocation2 + $0x148] sm:$0xff] }
 0x101   :  { %6617 = vmatprep.subr.bf16.mxu0 %v6616_v21  ;;  %v532_v21 = vld [vmem:[#allocation2 + $0xb80] sm:$0xff]  ;;  %v395_v40 = vld [vmem:[#allocation2 + $0x738] sm:$0xff]  ;;  %v418_v61 = vld [vmem:[#allocation2 + $0x7f0] sm:$0xff] }
 0x102   :  { %6647 = vmatpush1.bf16.msra.mxu1 %v6646_v50  ;;  %v6638_v30 = vpack.c.bf16 %v532_v21, %v508_v20  ;;  %v6668_v50 = vpack.c.bf16 %v535_v42, %v511_v41  ;;  %v417_v20 = vld [vmem:[#allocation2 + $0x7e8] sm:$0xff]  ;;  %v466_v10 = vld [vmem:[#allocation2 + $0x970] sm:$0xff] }
 0x103   :  { %6649 = vmatprep.subr.bf16.mxu1 %v6648_v52  ;;  %v534_v52 = vld [vmem:[#allocation2 + $0xb90] sm:$0xff]  ;;  %v6692_v29 = vpack.c.bf16 %v441_v22, %v417_v20  ;;  %v253_v8 = vld [vmem:[#allocation2 + $0x2c8] sm:$0xff] }
 0x104   :  { %6619 = vmatpush1.bf16.msra.mxu0 %v6618_v32  ;;  %v176_v32 = vld [vmem:[#allocation2 + $0x60] sm:$0xff]  ;;  %v6670_v60 = vpack.c.bf16 %v534_v52, %v510_v51  ;;  %v419_v51 = vld [vmem:[#allocation2 + $0x7f8] sm:$0xff]  ;;  %v301_v20 = vld [vmem:[#allocation2 + $0x448] sm:$0xff] }
 0x105   :  { %6621 = vmatprep.subr.bf16.mxu0 %v6620_v33  ;;  %v200_v33 = vld [vmem:[#allocation2 + $0x120] sm:$0xff]  ;;  %v443_v52 = vld [vmem:[#allocation2 + $0x8b8] sm:$0xff]  ;;  %v514_v22 = vld [vmem:[#allocation2 + $0xaf0] sm:$0xff] }
 0x106   :  { %6651 = vmatpush1.bf16.msra.mxu1 %v6650_v62  ;;  %v6674_v43 = vpack.c.bf16 %v200_v33, %v176_v32  ;;  %v6704_v62 = vpack.c.bf16 %v203_v54, %v179_v53  ;;  %v465_v32 = vld [vmem:[#allocation2 + $0x968] sm:$0xff] }
 0x107   :  { %6653 = vmatprep.subr.bf16.mxu1 %v6652_v1  ;;  %v202_v1 = vld [vmem:[#allocation2 + $0x130] sm:$0xff]  ;;  %v6696_v42 = vpack.c.bf16 %v489_v34, %v465_v32  ;;  %v349_v32 = vld [vmem:[#allocation2 + $0x5c8] sm:$0xff] }
 0x108   :  { %6623 = vmatpush1.bf16.msra.mxu0 %v6622_v45  ;;  %v224_v45 = vld [vmem:[#allocation2 + $0x1e0] sm:$0xff]  ;;  %v6706_v9 = vpack.c.bf16 %v202_v1, %v178_v63  ;;  %v467_v63 = vld [vmem:[#allocation2 + $0x978] sm:$0xff]  ;;  %v182_v34 = vld [vmem:[#allocation2 + $0x90] sm:$0xff] }
 0x109   :  { %6625 = vmatprep.subr.bf16.mxu0 %v6624_v46  ;;  %v248_v46 = vld [vmem:[#allocation2 + $0x2a0] sm:$0xff]  ;;  %v491_v1 = vld [vmem:[#allocation2 + $0xa38] sm:$0xff] }
 0x10a   :  { %6655 = vmatpush1.bf16.msra.mxu1 %v6654_v11  ;;  %v6678_v55 = vpack.c.bf16 %v248_v46, %v224_v45  ;;  %v6708_v11 = vpack.c.bf16 %v251_v3, %v227_v2  ;;  %v513_v45 = vld [vmem:[#allocation2 + $0xae8] sm:$0xff] }
 0x10b   :  { %6657 = vmatprep.subr.bf16.mxu1 %v6656_v13  ;;  %v250_v13 = vld [vmem:[#allocation2 + $0x2b0] sm:$0xff]  ;;  %v6700_v54 = vpack.c.bf16 %v537_v47, %v513_v45  ;;  %v397_v45 = vld [vmem:[#allocation2 + $0x748] sm:$0xff] }
 0x10c   :  { %6627 = vmatpush1.bf16.msra.mxu0 %v6626_v57  ;;  %v272_v57 = vld [vmem:[#allocation2 + $0x360] sm:$0xff]  ;;  %v6710_v21 = vpack.c.bf16 %v250_v13, %v226_v12  ;;  %v515_v12 = vld [vmem:[#allocation2 + $0xaf8] sm:$0xff]  ;;  %v230_v47 = vld [vmem:[#allocation2 + $0x210] sm:$0xff] }
 0x10d   :  { %6629 = vmatprep.subr.bf16.mxu0 %v6628_v58  ;;  %v296_v58 = vld [vmem:[#allocation2 + $0x420] sm:$0xff]  ;;  %v539_v13 = vld [vmem:[#allocation2 + $0xbb8] sm:$0xff] }
 0x10e   :  { %6659 = vmatpush1.bf16.msra.mxu1 %v6658_v23  ;;  %v6682_v4 = vpack.c.bf16 %v296_v58, %v272_v57  ;;  %v6712_v23 = vpack.c.bf16 %v299_v15, %v275_v14  ;;  %v181_v57 = vld [vmem:[#allocation2 + $0x88] sm:$0xff] }
 0x10f   :  { %6661 = vmatprep.subr.bf16.mxu1 %v6660_v25  ;;  %v298_v25 = vld [vmem:[#allocation2 + $0x430] sm:$0xff]  ;;  %v6736_v3 = vpack.c.bf16 %v205_v59, %v181_v57  ;;  %v445_v57 = vld [vmem:[#allocation2 + $0x8c8] sm:$0xff] }
 0x110   :  { %6631 = vmatpush1.bf16.msra.mxu0 %v6630_v6  ;;  %v320_v6 = vld [vmem:[#allocation2 + $0x4e0] sm:$0xff]  ;;  %v6714_v33 = vpack.c.bf16 %v298_v25, %v274_v24  ;;  %v183_v24 = vld [vmem:[#allocation2 + $0x98] sm:$0xff]  ;;  %v278_v59 = vld [vmem:[#allocation2 + $0x390] sm:$0xff] }
 0x111   :  { %6633 = vmatprep.subr.bf16.mxu0 %v6632_v7  ;;  %v344_v7 = vld [vmem:[#allocation2 + $0x5a0] sm:$0xff]  ;;  %v207_v25 = vld [vmem:[#allocation2 + $0x158] sm:$0xff] }
 0x112   :  { %6663 = vmatpush1.bf16.msra.mxu1 %v6662_v35  ;;  %v6686_v16 = vpack.c.bf16 %v344_v7, %v320_v6  ;;  %v6716_v35 = vpack.c.bf16 %v347_v27, %v323_v26  ;;  %v229_v6 = vld [vmem:[#allocation2 + $0x208] sm:$0xff] }
 0x113   :  { %6665 = vmatprep.subr.bf16.mxu1 %v6664_v38  ;;  %v346_v38 = vld [vmem:[#allocation2 + $0x5b0] sm:$0xff]  ;;  %v6740_v15 = vpack.c.bf16 %v253_v8, %v229_v6 }
 0x114   :  { %6635 = vmatpush1.bf16.msra.mxu0 %v6634_v18  ;;  %v368_v18 = vld [vmem:[#allocation2 + $0x660] sm:$0xff]  ;;  %v6718_v46 = vpack.c.bf16 %v346_v38, %v322_v37  ;;  %v231_v37 = vld [vmem:[#allocation2 + $0x218] sm:$0xff]  ;;  %v350_v8 = vld [vmem:[#allocation2 + $0x5d0] sm:$0xff] }
 0x115   :  { %6637 = vmatprep.subr.bf16.mxu0 %v6636_v19  ;;  %v392_v19 = vld [vmem:[#allocation2 + $0x720] sm:$0xff]  ;;  %v255_v38 = vld [vmem:[#allocation2 + $0x2d8] sm:$0xff] }
 0x116   :  { %6667 = vmatpush1.bf16.msra.mxu1 %v6666_v48  ;;  %v6690_v28 = vpack.c.bf16 %v392_v19, %v368_v18  ;;  %v6720_v48 = vpack.c.bf16 %v395_v40, %v371_v39  ;;  %v277_v18 = vld [vmem:[#allocation2 + $0x388] sm:$0xff] }
 0x117   :  { %6669 = vmatprep.subr.bf16.mxu1 %v6668_v50  ;;  %v394_v50 = vld [vmem:[#allocation2 + $0x730] sm:$0xff]  ;;  %v6744_v27 = vpack.c.bf16 %v301_v20, %v277_v18 }
 0x118   :  { %6639 = vmatpush1.bf16.msra.mxu0 %v6638_v30  ;;  %v416_v30 = vld [vmem:[#allocation2 + $0x7e0] sm:$0xff]  ;;  %v6722_v58 = vpack.c.bf16 %v394_v50, %v370_v49  ;;  %v279_v49 = vld [vmem:[#allocation2 + $0x398] sm:$0xff]  ;;  %v398_v20 = vld [vmem:[#allocation2 + $0x750] sm:$0xff] }
 0x119   :  { %6673 = vmatprep.subr.bf16.mxu0 %v6672_v31  ;;  %v440_v31 = vld [vmem:[#allocation2 + $0x8a0] sm:$0xff]  ;;  %v303_v50 = vld [vmem:[#allocation2 + $0x458] sm:$0xff] }
 0x11a   :  { %6671 = vmatpush1.bf16.msra.mxu1 %v6670_v60  ;;  %v6694_v41 = vpack.c.bf16 %v440_v31, %v416_v30  ;;  %v6724_v60 = vpack.c.bf16 %v443_v52, %v419_v51  ;;  %v325_v30 = vld [vmem:[#allocation2 + $0x508] sm:$0xff] }
 0x11b   :  { %1079 = vmatmul.mubr.f32.vlgmr.msra.gmra.mrb[4].mxu0 %v8691_v36  ;;  %6705 = vmatprep.subr.bf16.mxu1 %v6704_v62  ;;  %v442_v62 = vld [vmem:[#allocation2 + $0x8b0] sm:$0xff]  ;;  %v6748_v40 = vpack.c.bf16 %v349_v32, %v325_v30 }
 0x11c   :  { %6675 = vmatpush1.bf16.msra.mxu0 %v6674_v43  ;;  %1220 = vmatprep.mubr.f32.mxu0 %v9875_v0  ;;  %v464_v43 = vld [vmem:[#allocation2 + $0x960] sm:$0xff]  ;;  %v6726_v7 = vpack.c.bf16 %v442_v62, %v418_v61  ;;  %v327_v61 = vld [vmem:[#allocation2 + $0x518] sm:$0xff]  ;;  %v446_v32 = vld [vmem:[#allocation2 + $0x8d0] sm:$0xff] }
 0x11d   :  { %6677 = vmatprep.subr.bf16.mxu0 %v6676_v44  ;;  %1150 = vmatmul.mubr.f32.vlgmr.msra.gmra.mrb[4].mxu1 %v8691_v36  ;;  %v488_v44 = vld [vmem:[#allocation2 + $0xa20] sm:$0xff]  ;;  %v351_v62 = vld [vmem:[#allocation2 + $0x5d8] sm:$0xff] }
 0x11e   :  { %6707 = vmatpush1.bf16.msra.mxu1 %v6706_v9  ;;  %1291 = vmatprep.mubr.f32.mxu1 %v9875_v0  ;;  %v6698_v53 = vpack.c.bf16 %v488_v44, %v464_v43  ;;  %v6728_v9 = vpack.c.bf16 %v491_v1, %v467_v63  ;;  %v373_v43 = vld [vmem:[#allocation2 + $0x688] sm:$0xff]  ;;  %v420_v1 = vld [vmem:[#allocation2 + $0x800] sm:$0xff]  ;;  %v6780_v6 = vpack.c.bf16 %v351_v62, %v327_v61 }
 0x11f   :  { %6709 = vmatprep.subr.bf16.mxu1 %v6708_v11  ;;  %v490_v11 = vld [vmem:[#allocation2 + $0xa30] sm:$0xff]  ;;  %v6752_v52 = vpack.c.bf16 %v397_v45, %v373_v43 }
 0x120   :  { %6679 = vmatpush1.bf16.msra.mxu0 %v6678_v55  ;;  %v512_v55 = vld [vmem:[#allocation2 + $0xae0] sm:$0xff]  ;;  %v6730_v19 = vpack.c.bf16 %v490_v11, %v466_v10  ;;  %v399_v10 = vld [vmem:[#allocation2 + $0x758] sm:$0xff]  ;;  %v494_v45 = vld [vmem:[#allocation2 + $0xa50] sm:$0xff] }
 0x121   :  { %6681 = vmatprep.subr.bf16.mxu0 %v6680_v56  ;;  %v536_v56 = vld [vmem:[#allocation2 + $0xba0] sm:$0xff] }
 0x122   :  { %6711 = vmatpush1.bf16.msra.mxu1 %v6710_v21  ;;  %v6702_v2 = vpack.c.bf16 %v536_v56, %v512_v55  ;;  %v6732_v21 = vpack.c.bf16 %v539_v13, %v515_v12  ;;  %v421_v55 = vld [vmem:[#allocation2 + $0x808] sm:$0xff]  ;;  %v468_v13 = vld [vmem:[#allocation2 + $0x980] sm:$0xff] }
 0x123   :  { %6713 = vmatprep.subr.bf16.mxu1 %v6712_v23  ;;  %v538_v23 = vld [vmem:[#allocation2 + $0xbb0] sm:$0xff] }
 0x124   :  { %6683 = vmatpush1.bf16.msra.mxu0 %v6682_v4  ;;  %v180_v4 = vld [vmem:[#allocation2 + $0x80] sm:$0xff]  ;;  %v6734_v31 = vpack.c.bf16 %v538_v23, %v514_v22  ;;  %v447_v22 = vld [vmem:[#allocation2 + $0x8d8] sm:$0xff] }
 0x125   :  { %6685 = vmatprep.subr.bf16.mxu0 %v6684_v5  ;;  %v204_v5 = vld [vmem:[#allocation2 + $0x140] sm:$0xff] }
 0x126   :  { %6715 = vmatpush1.bf16.msra.mxu1 %v6714_v33  ;;  %v6738_v14 = vpack.c.bf16 %v204_v5, %v180_v4  ;;  %v6768_v33 = vpack.c.bf16 %v207_v25, %v183_v24  ;;  %v493_v5 = vld [vmem:[#allocation2 + $0xa48] sm:$0xff]  ;;  %v516_v25 = vld [vmem:[#allocation2 + $0xb00] sm:$0xff] }
 0x127   :  { %6717 = vmatprep.subr.bf16.mxu1 %v6716_v35  ;;  %v206_v35 = vld [vmem:[#allocation2 + $0x150] sm:$0xff] }
 0x128   :  { %6687 = vmatpush1.bf16.msra.mxu0 %v6686_v16  ;;  %v228_v16 = vld [vmem:[#allocation2 + $0x200] sm:$0xff]  ;;  %v6770_v44 = vpack.c.bf16 %v206_v35, %v182_v34  ;;  %v495_v34 = vld [vmem:[#allocation2 + $0xa58] sm:$0xff] }
 0x129   :  { %6689 = vmatprep.subr.bf16.mxu0 %v6688_v17  ;;  %v252_v17 = vld [vmem:[#allocation2 + $0x2c0] sm:$0xff] }
 0x12a   :  { %6719 = vmatpush1.bf16.msra.mxu1 %v6718_v46  ;;  %v6742_v26 = vpack.c.bf16 %v252_v17, %v228_v16  ;;  %v6772_v46 = vpack.c.bf16 %v255_v38, %v231_v37  ;;  %v541_v17 = vld [vmem:[#allocation2 + $0xbc8] sm:$0xff]  ;;  %v184_v38 = vld [vmem:[#allocation2 + $0xa0] sm:$0xff] }
 0x12b   :  { %6721 = vmatprep.subr.bf16.mxu1 %v6720_v48  ;;  %v254_v48 = vld [vmem:[#allocation2 + $0x2d0] sm:$0xff] }
 0x12c   :  { %6691 = vmatpush1.bf16.msra.mxu0 %v6690_v28  ;;  %v276_v28 = vld [vmem:[#allocation2 + $0x380] sm:$0xff]  ;;  %v6774_v56 = vpack.c.bf16 %v254_v48, %v230_v47  ;;  %v543_v47 = vld [vmem:[#allocation2 + $0xbd8] sm:$0xff] }
 0x12d   :  { %6693 = vmatprep.subr.bf16.mxu0 %v6692_v29  ;;  %v300_v29 = vld [vmem:[#allocation2 + $0x440] sm:$0xff] }
 0x12e   :  { %6723 = vmatpush1.bf16.msra.mxu1 %v6722_v58  ;;  %v6746_v39 = vpack.c.bf16 %v300_v29, %v276_v28  ;;  %v6776_v58 = vpack.c.bf16 %v303_v50, %v279_v49  ;;  %v209_v29 = vld [vmem:[#allocation2 + $0x168] sm:$0xff]  ;;  %v232_v50 = vld [vmem:[#allocation2 + $0x220] sm:$0xff] }
 0x12f   :  { %6725 = vmatprep.subr.bf16.mxu1 %v6724_v60  ;;  %v302_v60 = vld [vmem:[#allocation2 + $0x450] sm:$0xff] }
 0x130   :  { %6695 = vmatpush1.bf16.msra.mxu0 %v6694_v41  ;;  %v324_v41 = vld [vmem:[#allocation2 + $0x500] sm:$0xff]  ;;  %v6778_v4 = vpack.c.bf16 %v302_v60, %v278_v59  ;;  %v187_v59 = vld [vmem:[#allocation2 + $0xb8] sm:$0xff] }
 0x131   :  { %6697 = vmatprep.subr.bf16.mxu0 %v6696_v42  ;;  %v348_v42 = vld [vmem:[#allocation2 + $0x5c0] sm:$0xff]  ;;  %v211_v60 = vld [vmem:[#allocation2 + $0x178] sm:$0xff] }
 0x132   :  { %6727 = vmatpush1.bf16.msra.mxu1 %v6726_v7  ;;  %v6750_v51 = vpack.c.bf16 %v348_v42, %v324_v41  ;;  %v326_v7 = vld [vmem:[#allocation2 + $0x510] sm:$0xff]  ;;  %v257_v42 = vld [vmem:[#allocation2 + $0x2e8] sm:$0xff] }
 0x133   :  { %6729 = vmatprep.subr.bf16.mxu1 %v6728_v9  ;;  %v375_v9 = vld [vmem:[#allocation2 + $0x698] sm:$0xff]  ;;  %v6782_v16 = vpack.c.bf16 %v350_v8, %v326_v7 }
 0x134   :  { %6699 = vmatpush1.bf16.msra.mxu0 %v6698_v53  ;;  %v372_v53 = vld [vmem:[#allocation2 + $0x680] sm:$0xff]  ;;  %v6784_v18 = vpack.c.bf16 %v399_v10, %v375_v9  ;;  %v235_v7 = vld [vmem:[#allocation2 + $0x238] sm:$0xff] }
 0x135   :  { %6701 = vmatprep.subr.bf16.mxu0 %v6700_v54  ;;  %v396_v54 = vld [vmem:[#allocation2 + $0x740] sm:$0xff]  ;;  %v259_v8 = vld [vmem:[#allocation2 + $0x2f8] sm:$0xff] }
 0x136   :  { %6731 = vmatpush1.bf16.msra.mxu1 %v6730_v19  ;;  %v6754_v63 = vpack.c.bf16 %v396_v54, %v372_v53  ;;  %v374_v19 = vld [vmem:[#allocation2 + $0x690] sm:$0xff]  ;;  %v305_v54 = vld [vmem:[#allocation2 + $0x468] sm:$0xff] }
 0x137   :  { %6733 = vmatprep.subr.bf16.mxu1 %v6732_v21  ;;  %v423_v21 = vld [vmem:[#allocation2 + $0x818] sm:$0xff]  ;;  %v6786_v28 = vpack.c.bf16 %v398_v20, %v374_v19 }
 0x138   :  { %6703 = vmatpush1.bf16.msra.mxu0 %v6702_v2  ;;  %v444_v2 = vld [vmem:[#allocation2 + $0x8c0] sm:$0xff]  ;;  %v6788_v30 = vpack.c.bf16 %v447_v22, %v423_v21  ;;  %v283_v19 = vld [vmem:[#allocation2 + $0x3b8] sm:$0xff] }
 0x139   :  { %6737 = vmatprep.subr.bf16.mxu0 %v6736_v3  ;;  %v469_v3 = vld [vmem:[#allocation2 + $0x988] sm:$0xff]  ;;  %v6758_v11 = vpack.c.bf16 %v444_v2, %v420_v1  ;;  %v307_v20 = vld [vmem:[#allocation2 + $0x478] sm:$0xff] }
 0x13a   :  { %6735 = vmatpush1.bf16.msra.mxu1 %v6734_v31  ;;  %v6760_v12 = vpack.c.bf16 %v493_v5, %v469_v3  ;;  %v422_v31 = vld [vmem:[#allocation2 + $0x810] sm:$0xff]  ;;  %v329_v1 = vld [vmem:[#allocation2 + $0x528] sm:$0xff] }
 0x13b   :  { %1221 = vmatmul.mubr.f32.vlgmr.msra.gmra.mrb[6].mxu0 %v8691_v36  ;;  %6769 = vmatprep.subr.bf16.mxu1 %v6768_v33  ;;  %v471_v33 = vld [vmem:[#allocation2 + $0x998] sm:$0xff]  ;;  %v6790_v41 = vpack.c.bf16 %v446_v32, %v422_v31  ;;  %v353_v3 = vld [vmem:[#allocation2 + $0x5e8] sm:$0xff]  ;;  %v186_v5 = vld [vmem:[#allocation2 + $0xb0] sm:$0xff] }
 0x13c   :  { %6739 = vmatpush1.bf16.msra.mxu0 %v6738_v14  ;;  %1362 = vmatprep.mubr.f32.mxu0 %v9875_v0  ;;  %v492_v14 = vld [vmem:[#allocation2 + $0xa40] sm:$0xff]  ;;  %v6792_v43 = vpack.c.bf16 %v495_v34, %v471_v33  ;;  %v6812_v10 = vpack.c.bf16 %v353_v3, %v329_v1  ;;  %v331_v31 = vld [vmem:[#allocation2 + $0x538] sm:$0xff]  ;;  %v426_v3 = vld [vmem:[#allocation2 + $0x830] sm:$0xff] }
 0x13d   :  { %6741 = vmatprep.subr.bf16.mxu0 %v6740_v15  ;;  %1292 = vmatmul.mubr.f32.vlgmr.msra.gmra.mrb[6].mxu1 %v8691_v36  ;;  %v6756_v36 = vpack.c.bf16 %v445_v57, %v421_v55  ;;  %v517_v15 = vld [vmem:[#allocation2 + $0xb08] sm:$0xff]  ;;  %v6762_v23 = vpack.c.bf16 %v492_v14, %v468_v13  ;;  %v542_v57 = vld [vmem:[#allocation2 + $0xbd0] sm:$0xff]  ;;  %v355_v32 = vld [vmem:[#allocation2 + $0x5f8] sm:$0xff] }
 0x13e   :  { %6771 = vmatpush1.bf16.msra.mxu1 %v6770_v44  ;;  %1433 = vmatprep.mubr.f32.mxu1 %v9875_v0  ;;  %v6764_v24 = vpack.c.bf16 %v541_v17, %v517_v15  ;;  %v470_v44 = vld [vmem:[#allocation2 + $0x990] sm:$0xff]  ;;  %v377_v13 = vld [vmem:[#allocation2 + $0x6a8] sm:$0xff]  ;;  %v552_v1 = vld [vmem:[#allocation4 + $0x20] sm:$0xff] }
 0x13f   :  { %6773 = vmatprep.subr.bf16.mxu1 %v6772_v46  ;;  %v519_v46 = vld [vmem:[#allocation2 + $0xb18] sm:$0xff]  ;;  %v6794_v53 = vpack.c.bf16 %v494_v45, %v470_v44  ;;  %v401_v15 = vld [vmem:[#allocation2 + $0x768] sm:$0xff]  ;;  %v234_v17 = vld [vmem:[#allocation2 + $0x230] sm:$0xff] }
 0x140   :  { %6743 = vmatpush1.bf16.msra.mxu0 %v6742_v26  ;;  %v540_v26 = vld [vmem:[#allocation2 + $0xbc0] sm:$0xff]  ;;  %v6796_v55 = vpack.c.bf16 %v543_v47, %v519_v46  ;;  %v6816_v22 = vpack.c.bf16 %v401_v15, %v377_v13  ;;  %v379_v44 = vld [vmem:[#allocation2 + $0x6b8] sm:$0xff]  ;;  %v558_v13 = vld [vmem:[#allocation4 + $0x50] sm:$0xff] }
 0x141   :  { %6745 = vmatprep.subr.bf16.mxu0 %v6744_v27  ;;  %v185_v27 = vld [vmem:[#allocation2 + $0xa8] sm:$0xff]  ;;  %v6766_v35 = vpack.c.bf16 %v540_v26, %v516_v25  ;;  %v403_v45 = vld [vmem:[#allocation2 + $0x778] sm:$0xff]  ;;  %v474_v15 = vld [vmem:[#allocation2 + $0x9b0] sm:$0xff] }
 0x142   :  { %6775 = vmatpush1.bf16.msra.mxu1 %v6774_v56  ;;  %v6800_v37 = vpack.c.bf16 %v209_v29, %v185_v27  ;;  %v518_v56 = vld [vmem:[#allocation2 + $0xb10] sm:$0xff]  ;;  %v425_v25 = vld [vmem:[#allocation2 + $0x828] sm:$0xff] }
 0x143   :  { %6777 = vmatprep.subr.bf16.mxu1 %v6776_v58  ;;  %v8712_v58 = vld [vmem:[%s9863_s0] sm:$0xff]  ;;  %v6798_v2 = vpack.c.bf16 %v542_v57, %v518_v56  ;;  %v449_v27 = vld [vmem:[#allocation2 + $0x8e8] sm:$0xff]  ;;  %v282_v29 = vld [vmem:[#allocation2 + $0x3b0] sm:$0xff] }
 0x144   :  { %6747 = vmatpush1.bf16.msra.mxu0 %v6746_v39  ;;  %v208_v39 = vld [vmem:[#allocation2 + $0x160] sm:$0xff]  ;;  %v6820_v34 = vpack.c.bf16 %v449_v27, %v425_v25  ;;  %v427_v56 = vld [vmem:[#allocation2 + $0x838] sm:$0xff]  ;;  %v522_v27 = vld [vmem:[#allocation2 + $0xb30] sm:$0xff] }
 0x145   :  { %6749 = vmatprep.subr.bf16.mxu0 %v6748_v40  ;;  %v233_v40 = vld [vmem:[#allocation2 + $0x228] sm:$0xff]  ;;  %v6802_v48 = vpack.c.bf16 %v208_v39, %v184_v38  ;;  %v451_v57 = vld [vmem:[#allocation2 + $0x8f8] sm:$0xff]  ;;  %v564_v25 = vld [vmem:[#allocation4 + $0x80] sm:$0xff] }
 0x146   :  { %6779 = vmatpush1.bf16.msra.mxu1 %v6778_v4  ;;  %v6804_v49 = vpack.c.bf16 %v257_v42, %v233_v40  ;;  %v6832_v4 = vpack.c.bf16 %v211_v60, %v187_v59  ;;  %v473_v38 = vld [vmem:[#allocation2 + $0x9a8] sm:$0xff]  ;;  %v330_v42 = vld [vmem:[#allocation2 + $0x530] sm:$0xff] }
 0x147   :  { %6781 = vmatprep.subr.bf16.mxu1 %v6780_v6  ;;  %v210_v6 = vld [vmem:[#allocation2 + $0x170] sm:$0xff]  ;;  %v497_v40 = vld [vmem:[#allocation2 + $0xa68] sm:$0xff] }
 0x148   :  { %6751 = vmatpush1.bf16.msra.mxu0 %v6750_v51  ;;  %v256_v51 = vld [vmem:[#allocation2 + $0x2e0] sm:$0xff]  ;;  %v6834_v14 = vpack.c.bf16 %v210_v6, %v186_v5  ;;  %v6824_v47 = vpack.c.bf16 %v497_v40, %v473_v38  ;;  %v475_v5 = vld [vmem:[#allocation2 + $0x9b8] sm:$0xff]  ;;  %v553_v38 = vld [vmem:[#allocation4 + $0x28] sm:$0xff] }
 0x149   :  { %6753 = vmatprep.subr.bf16.mxu0 %v6752_v52  ;;  %v281_v52 = vld [vmem:[#allocation2 + $0x3a8] sm:$0xff]  ;;  %v6806_v61 = vpack.c.bf16 %v256_v51, %v232_v50  ;;  %v499_v6 = vld [vmem:[#allocation2 + $0xa78] sm:$0xff] }
 0x14a   :  { %6783 = vmatpush1.bf16.msra.mxu1 %v6782_v16  ;;  %v6808_v62 = vpack.c.bf16 %v305_v54, %v281_v52  ;;  %v6836_v16 = vpack.c.bf16 %v259_v8, %v235_v7  ;;  %v521_v50 = vld [vmem:[#allocation2 + $0xb28] sm:$0xff]  ;;  %v378_v54 = vld [vmem:[#allocation2 + $0x6b0] sm:$0xff] }
 0x14b   :  { %6785 = vmatprep.subr.bf16.mxu1 %v6784_v18  ;;  %v258_v18 = vld [vmem:[#allocation2 + $0x2f0] sm:$0xff]  ;;  %v545_v52 = vld [vmem:[#allocation2 + $0xbe8] sm:$0xff] }
 0x14c   :  { %6755 = vmatpush1.bf16.msra.mxu0 %v6754_v63  ;;  %v280_v63 = vld [vmem:[#allocation2 + $0x3a0] sm:$0xff]  ;;  %v6838_v26 = vpack.c.bf16 %v258_v18, %v234_v17  ;;  %v6828_v60 = vpack.c.bf16 %v545_v52, %v521_v50  ;;  %v523_v17 = vld [vmem:[#allocation2 + $0xb38] sm:$0xff] }
 0x14d   :  { %6757 = vmatprep.subr.bf16.mxu0 %v6756_v36  ;;  %v304_v36 = vld [vmem:[#allocation2 + $0x460] sm:$0xff]  ;;  %v547_v18 = vld [vmem:[#allocation2 + $0xbf8] sm:$0xff] }
 0x14e   :  { %6787 = vmatpush1.bf16.msra.mxu1 %v6786_v28  ;;  %v6810_v9 = vpack.c.bf16 %v304_v36, %v280_v63  ;;  %v6840_v28 = vpack.c.bf16 %v307_v20, %v283_v19  ;;  %v549_v63 = vld [vmem:[#allocation4 + $0x8] sm:$0xff]  ;;  %v575_v52 = vld [vmem:[#allocation4 + $0xd8] sm:$0xff] }
 0x14f   :  { %6789 = vmatprep.subr.bf16.mxu1 %v6788_v30  ;;  %v306_v30 = vld [vmem:[#allocation2 + $0x470] sm:$0xff]  ;;  %v8718_v8 = vpack.c.bf16 %v552_v1, %v549_v63  ;;  %v568_v1 = vld [vmem:[#allocation4 + $0xa0] sm:$0xff] }
 0x150   :  { %6759 = vmatpush1.bf16.msra.mxu0 %v6758_v11  ;;  %v328_v11 = vld [vmem:[#allocation2 + $0x520] sm:$0xff]  ;;  %v6842_v39 = vpack.c.bf16 %v306_v30, %v282_v29 }
 0x151   :  { %6761 = vmatprep.subr.bf16.mxu0 %v6760_v12  ;;  %v352_v12 = vld [vmem:[#allocation2 + $0x5e0] sm:$0xff] }
 0x152   :  { %6791 = vmatpush1.bf16.msra.mxu1 %v6790_v41  ;;  %v6814_v21 = vpack.c.bf16 %v352_v12, %v328_v11  ;;  %v6844_v41 = vpack.c.bf16 %v355_v32, %v331_v31  ;;  %v555_v11 = vld [vmem:[#allocation4 + $0x38] sm:$0xff]  ;;  %v560_v31 = vld [vmem:[#allocation4 + $0x60] sm:$0xff] }
 0x153   :  { %6793 = vmatprep.subr.bf16.mxu1 %v6792_v43  ;;  %v354_v43 = vld [vmem:[#allocation2 + $0x5f0] sm:$0xff]  ;;  %v8723_v20 = vpack.c.bf16 %v558_v13, %v555_v11  ;;  %v563_v32 = vld [vmem:[#allocation4 + $0x78] sm:$0xff] }
 0x154   :  { %6763 = vmatpush1.bf16.msra.mxu0 %v6762_v23  ;;  %v376_v23 = vld [vmem:[#allocation2 + $0x6a0] sm:$0xff]  ;;  %v6846_v51 = vpack.c.bf16 %v354_v43, %v330_v42  ;;  %v569_v42 = vld [vmem:[#allocation4 + $0xa8] sm:$0xff]  ;;  %v574_v11 = vld [vmem:[#allocation4 + $0xd0] sm:$0xff] }
 0x155   :  { %6765 = vmatprep.subr.bf16.mxu0 %v6764_v24  ;;  %v400_v24 = vld [vmem:[#allocation2 + $0x760] sm:$0xff]  ;;  %v573_v43 = vld [vmem:[#allocation4 + $0xc8] sm:$0xff] }
 0x156   :  { %6795 = vmatpush1.bf16.msra.mxu1 %v6794_v53  ;;  %v6818_v33 = vpack.c.bf16 %v400_v24, %v376_v23  ;;  %v6848_v53 = vpack.c.bf16 %v403_v45, %v379_v44  ;;  %v561_v23 = vld [vmem:[#allocation4 + $0x68] sm:$0xff]  ;;  %v576_v45 = vld [vmem:[#allocation4 + $0xe0] sm:$0xff] }
 0x157   :  { %6797 = vmatprep.subr.bf16.mxu1 %v6796_v55  ;;  %v402_v55 = vld [vmem:[#allocation2 + $0x770] sm:$0xff]  ;;  %v8731_v30 = vpack.c.bf16 %v564_v25, %v561_v23  ;;  %v8747_v50 = vpack.c.bf16 %v576_v45, %v573_v43  ;;  %v589_v25 = vld [vmem:[#allocation4 + $0x148] sm:$0xff] }
 0x158   :  { %6767 = vmatpush1.bf16.msra.mxu0 %v6766_v35  ;;  %v424_v35 = vld [vmem:[#allocation2 + $0x820] sm:$0xff]  ;;  %v6850_v36 = vpack.c.bf16 %v402_v55, %v378_v54  ;;  %v582_v55 = vld [vmem:[#allocation4 + $0x110] sm:$0xff] }
 0x159   :  { %6801 = vmatprep.subr.bf16.mxu0 %v6800_v37  ;;  %v448_v37 = vld [vmem:[#allocation2 + $0x8e0] sm:$0xff] }
 0x15a   :  { %6799 = vmatpush1.bf16.msra.mxu1 %v6798_v2  ;;  %v6822_v46 = vpack.c.bf16 %v448_v37, %v424_v35  ;;  %v6852_v2 = vpack.c.bf16 %v451_v57, %v427_v56  ;;  %v570_v35 = vld [vmem:[#allocation4 + $0xb0] sm:$0xff]  ;;  %v565_v57 = vld [vmem:[#allocation4 + $0x88] sm:$0xff] }
 0x15b   :  { %1363 = vmatmul.mubr.f32.vlgmr.msra.gmra.mrb[8].mxu0 %v8712_v58  ;;  %6833 = vmatprep.subr.bf16.mxu1 %v6832_v4  ;;  %v450_v4 = vld [vmem:[#allocation2 + $0x8f0] sm:$0xff] }
 0x15c   :  { %6803 = vmatpush1.bf16.msra.mxu0 %v6802_v48  ;;  %1504 = vmatprep.mubr.f32.mxu0 %v9875_v0  ;;  %v472_v48 = vld [vmem:[#allocation2 + $0x9a0] sm:$0xff]  ;;  %v6854_v12 = vpack.c.bf16 %v450_v4, %v426_v3  ;;  %v550_v37 = vld [vmem:[#allocation4 + $0x10] sm:$0xff] }
 0x15d   :  { %6805 = vmatprep.subr.bf16.mxu0 %v6804_v49  ;;  %1434 = vmatmul.mubr.f32.vlgmr.msra.gmra.mrb[8].mxu1 %v8712_v58  ;;  %v496_v49 = vld [vmem:[#allocation2 + $0xa60] sm:$0xff]  ;;  %v8739_v44 = vpack.c.bf16 %v553_v38, %v550_v37  ;;  %v562_v56 = vld [vmem:[#allocation4 + $0x70] sm:$0xff] }
 0x15e   :  { %6835 = vmatpush1.bf16.msra.mxu1 %v6834_v14  ;;  %1575 = vmatprep.mubr.f32.mxu1 %v9875_v0  ;;  %v6826_v59 = vpack.c.bf16 %v496_v49, %v472_v48  ;;  %v6856_v14 = vpack.c.bf16 %v499_v6, %v475_v5  ;;  %v559_v48 = vld [vmem:[#allocation4 + $0x58] sm:$0xff]  ;;  %v8762_v63 = vpack.c.bf16 %v565_v57, %v562_v56  ;;  %v584_v5 = vld [vmem:[#allocation4 + $0x120] sm:$0xff]  ;;  %v610_v56 = vlaneseq }
 0x15f   :  { %6837 = vmatprep.subr.bf16.mxu1 %v6836_v16  ;;  %v498_v16 = vld [vmem:[#allocation2 + $0xa70] sm:$0xff]  ;;  %v587_v6 = vld [vmem:[#allocation4 + $0x138] sm:$0xff] }
 0x160   :  { %6807 = vmatpush1.bf16.msra.mxu0 %v6806_v61  ;;  %v520_v61 = vld [vmem:[#allocation2 + $0xb20] sm:$0xff]  ;;  %v6858_v24 = vpack.c.bf16 %v498_v16, %v474_v15  ;;  %v8776_v13 = vpack.c.bf16 %v587_v6, %v584_v5  ;;  %v590_v15 = vld [vmem:[#allocation4 + $0x150] sm:$0xff]  ;;  %v593_v16 = vld [vmem:[#allocation4 + $0x168] sm:$0xff]  ;;  %v8872_v57 = vshrl.u32 %v610_v56, 7 }
 0x161   :  { %6809 = vmatprep.subr.bf16.mxu0 %v6808_v62  ;;  %v544_v62 = vld [vmem:[#allocation2 + $0xbe0] sm:$0xff] }
 0x162   :  { %6839 = vmatpush1.bf16.msra.mxu1 %v6838_v26  ;;  %v6830_v7 = vpack.c.bf16 %v544_v62, %v520_v61  ;;  %v6860_v26 = vpack.c.bf16 %v547_v18, %v523_v17  ;;  %v581_v61 = vld [vmem:[#allocation4 + $0x108] sm:$0xff]  ;;  %v580_v18 = vld [vmem:[#allocation4 + $0x100] sm:$0xff] }
 0x163   :  { %6841 = vmatprep.subr.bf16.mxu1 %v6840_v28  ;;  %v546_v28 = vld [vmem:[#allocation2 + $0xbf0] sm:$0xff]  ;;  %v585_v62 = vld [vmem:[#allocation4 + $0x128] sm:$0xff] }
 0x164   :  { %6811 = vmatpush1.bf16.msra.mxu0 %v6810_v9  ;;  %v548_v9 = vld [vmem:[#allocation4] sm:$0xff] }
 0x165   :  { %6813 = vmatprep.subr.bf16.mxu0 %v6812_v10  ;;  %v551_v10 = vld [vmem:[#allocation4 + $0x18] sm:$0xff] }
 0x166   :  { %6843 = vmatpush1.bf16.msra.mxu1 %v6842_v39  ;;  %v8720_v19 = vpack.c.bf16 %v551_v10, %v548_v9  ;;  %v8734_v39 = vpack.c.bf16 %v563_v32, %v560_v31  ;;  %v594_v10 = vld [vmem:[#allocation4 + $0x170] sm:$0xff] }
 0x167   :  { %6845 = vmatprep.subr.bf16.mxu1 %v6844_v41  ;;  %v566_v41 = vld [vmem:[#allocation4 + $0x90] sm:$0xff] }
 0x168   :  { %6815 = vmatpush1.bf16.msra.mxu0 %v6814_v21  ;;  %v554_v21 = vld [vmem:[#allocation4 + $0x30] sm:$0xff]  ;;  %v8743_v49 = vpack.c.bf16 %v569_v42, %v566_v41 }
 0x169   :  { %6817 = vmatprep.subr.bf16.mxu0 %v6816_v22  ;;  %v557_v22 = vld [vmem:[#allocation4 + $0x48] sm:$0xff] }
 0x16a   :  { %6847 = vmatpush1.bf16.msra.mxu1 %v6846_v51  ;;  %v8727_v29 = vpack.c.bf16 %v557_v22, %v554_v21  ;;  %v572_v51 = vld [vmem:[#allocation4 + $0xc0] sm:$0xff]  ;;  %v583_v21 = vld [vmem:[#allocation4 + $0x118] sm:$0xff]  ;;  %v8786_v22 = vpack.c.bf16 %v593_v16, %v590_v15 }
 0x16b   :  { %6849 = vmatprep.subr.bf16.mxu1 %v6848_v53  ;;  %v579_v53 = vld [vmem:[#allocation4 + $0xf8] sm:$0xff]  ;;  %v8790_v23 = vpack.c.bf16 %v583_v21, %v580_v18  ;;  %v8887_v21 = vsub.s32 2, %v8872_v57 }
 0x16c   :  { %6819 = vmatpush1.bf16.msra.mxu0 %v6818_v33  ;;  %v567_v33 = vld [vmem:[#allocation4 + $0x98] sm:$0xff] }
 0x16d   :  { %6821 = vmatprep.subr.bf16.mxu0 %v6820_v34  ;;  %v6862_v34 = vpack.c.bf16 %v546_v28, %v522_v27  ;;  %v8737_v40 = vpack.c.bf16 %v570_v35, %v567_v33  ;;  %v592_v27 = vld [vmem:[#allocation4 + $0x160] sm:$0xff]  ;;  %v595_v28 = vld [vmem:[#allocation4 + $0x178] sm:$0xff] }
 0x16e   :  { %6851 = vmatpush1.bf16.msra.mxu1 %v6850_v36  ;;  %v588_v36 = vld [vmem:[#allocation4 + $0x140] sm:$0xff]  ;;  %v8803_v31 = vpack.c.bf16 %v595_v28, %v592_v27 }
 0x16f   :  { %6853 = vmatprep.subr.bf16.mxu1 %v6852_v2  ;;  %v571_v2 = vld [vmem:[#allocation4 + $0xb8] sm:$0xff]  ;;  %v8769_v4 = vpack.c.bf16 %v588_v36, %v585_v62  ;;  %v8882_v36 = vsub.s32 1, %v8872_v57 }
 0x170   :  { %6823 = vmatpush1.bf16.msra.mxu0 %v6822_v46  ;;  %v9877_v46 = vmov 0.0|0.0   ;;  %v8772_v9 = vpack.c.bf16 %v571_v2, %v568_v1 }
 0x171   :  { %6825 = vmatprep.subr.bf16.mxu0 %v6824_v47  ;;  %v556_v47 = vld [vmem:[#allocation4 + $0x40] sm:$0xff] }
 0x172   :  { %6855 = vmatpush1.bf16.msra.mxu1 %v6854_v12  ;;  %v8750_v54 = vpack.c.bf16 %v559_v48, %v556_v47  ;;  %v577_v12 = vld [vmem:[#allocation4 + $0xe8] sm:$0xff] }
 0x173   :  { %6857 = vmatprep.subr.bf16.mxu1 %v6856_v14  ;;  %v8782_v17 = vpack.c.bf16 %v577_v12, %v574_v11 }
 0x174   :  { %6827 = vmatpush1.bf16.msra.mxu0 %v6826_v59  ;;  %v8759_v59 = vpack.c.bf16 %v582_v55, %v579_v53 }
 0x175   :  { %6829 = vmatprep.subr.bf16.mxu0 %v6828_v60  ;;  %v578_v60 = vld [vmem:[#allocation4 + $0xf0] sm:$0xff] }
 0x176   :  { %6859 = vmatpush1.bf16.msra.mxu1 %v6858_v24  ;;  %v8766_v3 = vpack.c.bf16 %v581_v61, %v578_v60  ;;  %v586_v24 = vld [vmem:[#allocation4 + $0x130] sm:$0xff]  ;;  %v8875_v60 = vsub.s32 0, %v8872_v57  ;;  %v8877_v61 = vld [vmem:[#allocation6] sm:$0xff] }
 0x177   :  { %6861 = vmatprep.subr.bf16.mxu1 %v6860_v26  ;;  %v8795_v26 = vpack.c.bf16 %v589_v25, %v586_v24  ;;  %v617_v2 = vrot.slane %v8877_v61, %v8882_v36  ;;  %v8889_v25 = vld [vmem:[#allocation7] ss:$0 sm:$0xff]  ;;  %v621_v27 = vrot.slane %v8877_v61, %v8887_v21 }
 0x178   :  { %6831 = vmatpush1.bf16.msra.mxu0 %v6830_v7  ;;  %v591_v7 = vld [vmem:[#allocation4 + $0x158] sm:$0xff]  ;;  %v613_v62 = vrot.slane %v8877_v61, %v8875_v60 }
 0x179   :  { %6865 = vmatprep.subr.bf16.mxu0 %v8718_v8  ;;  %v8779_v14 = vpack.c.bf16 %v594_v10, %v591_v7 }
 0x17a   :  { %6863 = vmatpush1.bf16.msra.mxu1 %v6862_v34 }
 0x17b   :  { %1505 = vmatmul.mubr.f32.vlgmr.msra.gmra.mrb[10].mxu0 %v8712_v58  ;;  %6896 = vmatprep.subr.bf16.mxu1 %v9877_v46 }
 0x17c   :  { %6867 = vmatpush1.bf16.msra.mxu0 %v8720_v19  ;;  %1646 = vmatprep.mubr.f32.mxu0 %v9875_v0 }
 0x17d   :  { %6869 = vmatprep.subr.bf16.mxu0 %v8723_v20  ;;  %1576 = vmatmul.mubr.f32.vlgmr.msra.gmra.mrb[10].mxu1 %v8712_v58  ;;  %v8756_v58 = vpack.c.bf16 %v575_v52, %v572_v51 }
 0x17e   :  { %6898 = vmatpush3.bf16.msra.mxu1 %v8739_v44  ;;  %5628 = vmatprep.mubr.msk.f32.mxu1 %vm8496_vm0, %v9875_v0 }
 0x17f   :  { %6899 = vmatprep.subr.bf16.mxu1 %v9877_v46 }
 0x180   :  { %6871 = vmatpush1.bf16.msra.mxu0 %v8727_v29 }
 0x181   :  { %6873 = vmatprep.subr.bf16.mxu0 %v8731_v30 }
 0x182   :  { %6901 = vmatpush3.bf16.msra.mxu1 %v8750_v54 }
 0x183   :  { %6902 = vmatprep.subr.bf16.mxu1 %v9877_v46 }
 0x184   :  { %6875 = vmatpush1.bf16.msra.mxu0 %v8734_v39 }
 0x185   :  { %6877 = vmatprep.subr.bf16.mxu0 %v8737_v40 }
 0x186   :  { %6904 = vmatpush3.bf16.msra.mxu1 %v8762_v63 }
 0x187   :  { %6905 = vmatprep.subr.bf16.mxu1 %v9877_v46 }
 0x188   :  { %6879 = vmatpush1.bf16.msra.mxu0 %v8743_v49 }
 0x189   :  { %6881 = vmatprep.subr.bf16.mxu0 %v8747_v50 }
 0x18a   :  { %6907 = vmatpush3.bf16.msra.mxu1 %v8772_v9 }
 0x18b   :  { %6908 = vmatprep.subr.bf16.mxu1 %v9877_v46 }
 0x18c   :  { %6883 = vmatpush1.bf16.msra.mxu0 %v8756_v58 }
 0x18d   :  { %6885 = vmatprep.subr.bf16.mxu0 %v8759_v59 }
 0x18e   :  { %6910 = vmatpush3.bf16.msra.mxu1 %v8782_v17 }
 0x18f   :  { %6911 = vmatprep.subr.bf16.mxu1 %v9877_v46 }
 0x190   :  { %6887 = vmatpush1.bf16.msra.mxu0 %v8766_v3 }
 0x191   :  { %6889 = vmatprep.subr.bf16.mxu0 %v8769_v4 }
 0x192   :  { %6913 = vmatpush3.bf16.msra.mxu1 %v8790_v23 }
 0x193   :  { %6914 = vmatprep.subr.bf16.mxu1 %v9877_v46 }
 0x194   :  { %6891 = vmatpush1.bf16.msra.mxu0 %v8776_v13 }
 0x195   :  { %6893 = vmatprep.subr.bf16.mxu0 %v8779_v14 }
 0x196   :  { %6916 = vmatpush3.bf16.msra.mxu1 %v8795_v26 }
 0x197   :  { %6917 = vmatprep.subr.bf16.mxu1 %v9877_v46 }
 0x198   :  { %6895 = vmatpush1.bf16.msra.mxu0 %v8786_v22 }
 0x199   :  { %6921 = vmatprep.subr.bf16.mxu0 %v8718_v8 }
 0x19a   :  { %6919 = vmatpush3.bf16.msra.mxu1 %v8803_v31 }
 0x19b   :  { %1647 = vmatmul.mubr.f32.vlgmr.msra.gmra.mrb[0].mxu0 %v9875_v0  ;;  %6952 = vmatprep.subr.bf16.mxu1 %v9877_v46 }
 0x19c   :  { %6923 = vmatpush1.bf16.msra.mxu0 %v8720_v19  ;;  %1809 = vmatprep.mubr.f32.mxu0 %v9875_v0 }
 0x19d   :  { %6925 = vmatprep.subr.bf16.mxu0 %v8723_v20  ;;  %5629 = vmatmul.mubr.f32.vlgmr.msra.gmra.mrb[12].mxu1 %v9875_v0 }
 0x19e   :  { %6954 = vmatpush3.bf16.msra.mxu1 %v8739_v44  ;;  %5663 = vmatprep.mubr.msk.f32.mxu1 %vm8496_vm0, %v9875_v0 }
 0x19f   :  { %6955 = vmatprep.subr.bf16.mxu1 %v9877_v46 }
 0x1a0   :  { %6927 = vmatpush1.bf16.msra.mxu0 %v8727_v29 }
 0x1a1   :  { %6929 = vmatprep.subr.bf16.mxu0 %v8731_v30 }
 0x1a2   :  { %6957 = vmatpush3.bf16.msra.mxu1 %v8750_v54 }
 0x1a3   :  { %6958 = vmatprep.subr.bf16.mxu1 %v9877_v46 }
 0x1a4   :  { %6931 = vmatpush1.bf16.msra.mxu0 %v8734_v39 }
 0x1a5   :  { %6933 = vmatprep.subr.bf16.mxu0 %v8737_v40 }
 0x1a6   :  { %6960 = vmatpush3.bf16.msra.mxu1 %v8762_v63 }
 0x1a7   :  { %6961 = vmatprep.subr.bf16.mxu1 %v9877_v46 }
 0x1a8   :  { %6935 = vmatpush1.bf16.msra.mxu0 %v8743_v49 }
 0x1a9   :  { %6937 = vmatprep.subr.bf16.mxu0 %v8747_v50 }
 0x1aa   :  { %6963 = vmatpush3.bf16.msra.mxu1 %v8772_v9 }
 0x1ab   :  { %6964 = vmatprep.subr.bf16.mxu1 %v9877_v46 }
 0x1ac   :  { %6939 = vmatpush1.bf16.msra.mxu0 %v8756_v58 }
 0x1ad   :  { %6941 = vmatprep.subr.bf16.mxu0 %v8759_v59 }
 0x1ae   :  { %6966 = vmatpush3.bf16.msra.mxu1 %v8782_v17 }
 0x1af   :  { %6967 = vmatprep.subr.bf16.mxu1 %v9877_v46 }
 0x1b0   :  { %6943 = vmatpush1.bf16.msra.mxu0 %v8766_v3  ;;  %v867_v32 = vpop.f32.mrb[0].mxu1 }
 0x1b1   :  { %6945 = vmatprep.subr.bf16.mxu0 %v8769_v4  ;;  %v8834_v33 = vpop.f32.mrb[1].mxu1 }
 0x1b2   :  { %6969 = vmatpush3.bf16.msra.mxu1 %v8790_v23 }
 0x1b3   :  { %6970 = vmatprep.subr.bf16.mxu1 %v9877_v46 }
 0x1b4   :  { %6947 = vmatpush1.bf16.msra.mxu0 %v8776_v13 }
 0x1b5   :  { %6949 = vmatprep.subr.bf16.mxu0 %v8779_v14 }
 0x1b6   :  { %6972 = vmatpush3.bf16.msra.mxu1 %v8795_v26 }
 0x1b7   :  { %6973 = vmatprep.subr.bf16.mxu1 %v9877_v46 }
 0x1b8   :  { %6951 = vmatpush1.bf16.msra.mxu0 %v8786_v22 }
 0x1b9   :  { %7008 = vmatprep.subr.bf16.mxu0 %v9877_v46 }
 0x1ba   :  { %6975 = vmatpush3.bf16.msra.mxu1 %v8803_v31 }
 0x1bb   :  { %6977 = vmatprep.subr.bf16.mxu1 %v8718_v8 }
 0x1ce   :  { %v8844_v34 = vpop.f32.mrb[2].mxu0 }
 0x1cf   :  { %v8846_v35 = vpop.f32.mrb[3].mxu0 }
 0x1ee   :  { %v8848_v37 = vpop.f32.mrb[4].mxu0 }
 0x1ef   :  { %v8850_v38 = vpop.f32.mrb[5].mxu0 }
 0x1f0   :  { %v8852_v41 = vpop.f32.mrb[4].mxu1 }
 0x1f1   :  { %v8854_v42 = vpop.f32.mrb[5].mxu1 }
 0x210   :  { %v8856_v43 = vpop.f32.mrb[6].mxu1 }
 0x211   :  { %v8858_v45 = vpop.f32.mrb[7].mxu1 }
 0x22e   :  { %v8860_v47 = vpop.f32.mrb[8].mxu0 }
 0x22f   :  { %v8862_v48 = vpop.f32.mrb[9].mxu0 }
 0x24e   :  { %v8864_v51 = vpop.f32.mrb[10].mxu0 }
 0x24f   :  { %v8866_v52 = vpop.f32.mrb[11].mxu0 }
 0x250   :  { %v8868_v53 = vpop.f32.mrb[10].mxu1 }
 0x251   :  { %9879 = vst [vmem:[#allocation24_spill] sm:$0xff] %v8868_v53  ;;  %v8870_v55 = vpop.f32.mrb[11].mxu1 }
 0x252   :  { %9880 = vst [vmem:[#allocation25_spill] sm:$0xff] %v8870_v55  ;;  %v9002_v55 = vld [vmem:[#allocation6 + $0x8] sm:$0xff] }
 0x26e   :  { %v1648_v1 = vpop.f32.mrb[0].mxu0 }
 0x26f   :  { %v8016_v5 = vadd.f32 %v1648_v1, %v613_v62  ;;  %v1650_v6 = vpop.f32.mrb[1].mxu0  ;;  %v868_v1 = vadd.f32 %v867_v32, %v621_v27  ;;  %v8934_v32 = vsub.s32 3, %v8872_v57 }
 0x270   :  { %v8017_v10 = vadd.f32 %v1650_v6, %v617_v2  ;;  %v1719_v12 = vpop.f32.mrb[12].mxu1 }
 0x271   :  { %v5130_v7 = vmul.f32 -1.442695, %v8016_v5  ;;  %v5630_v15 = vpop.f32.mrb[13].mxu1  ;;  %v1737_v56 = vadd.f32 %v8889_v25, %v1719_v12  ;;  %v8937_v12 = vsub.s32 4, %v8872_v57 }
 0x272   :  { %v5131_v11 = vmul.f32 -1.442695, %v8017_v10 }
 0x273   :  { %8083 = vpow2.f32 %v5130_v7 }
 0x274   :  { %8085 = vpow2.f32 %v5131_v11 }
 0x27d   :  { %v8084_v16 = vpop.eup %8083 }
 0x27e   :  { %v1727_v18 = vadd.f32 1.0, %v8084_v16  ;;  %v8086_v24 = vpop.eup %8085 }
 0x27f   :  { %v1734_v28 = vadd.f32 1.0, %v8086_v24  ;;  %v629_v24 = vrot.slane %v8877_v61, %v8937_v12 }
 0x280   :  { %8087 = vrcp.f32 %v1727_v18  ;;  %v625_v18 = vrot.slane %v8877_v61, %v8934_v32 }
 0x281   :  { %8089 = vrcp.f32 %v1734_v28  ;;  %v939_v28 = vadd.f32 %v8844_v34, %v629_v24 }
 0x282   :  { %v870_v27 = vadd.f32 %v8834_v33, %v625_v18 }
 0x28a   :  { %v8088_v62 = vpop.eup %8087 }
 0x28b   :  { %v1738_v2 = vmul.f32 %v8088_v62, %v1737_v56  ;;  %v8090_v6 = vpop.eup %8089 }
 0x28c   :  { %v1741_v7 = vsub.f32 1.0, %v8090_v6  ;;  %v1743_v15 = vmul.f32 0.0, %v8090_v6 }
 0x28d   :  { %v1739_v5 = vadd.f32 %v1738_v2, %v868_v1 }
 0x28f   :  { %8091 = vtanh.f32 %v1739_v5 }
 0x299   :  { %v8092_v10 = vpop.eup %8091 }
 0x29a   :  { %v1742_v11 = vmul.f32 %v8092_v10, %v1741_v7 }
 0x29c   :  { %v8894_v16 = vadd.f32 %v1743_v15, %v1742_v11 }
 0x29e   :  { %1810 = vmatmul.mubr.f32.vlgmr.msra.gmra.mrb[12].mxu0 %v8894_v16  ;;  %5664 = vmatmul.mubr.f32.vlgmr.msra.gmra.mrb[14].mxu1 %v8894_v16 }
 0x29f   :  { %6979 = vmatpush1.bf16.msra.mxu1 %v8720_v19  ;;  %7010 = vmatpush3.bf16.msra.mxu0 %v8739_v44 }
 0x2a0   :  { %6981 = vmatprep.subr.bf16.mxu1 %v8723_v20  ;;  %7011 = vmatprep.subr.bf16.mxu0 %v9877_v46 }
 0x2a1   :  { %1972 = vmatprep.mubr.f32.mxu1 %v9875_v0  ;;  %5698 = vmatprep.mubr.msk.f32.mxu0 %vm8496_vm0, %v9875_v0  ;;  %v8946_v0 = vsub.s32 5, %v8872_v57 }
 0x2a3   :  { %6983 = vmatpush1.bf16.msra.mxu1 %v8727_v29  ;;  %7013 = vmatpush3.bf16.msra.mxu0 %v8750_v54  ;;  %v633_v33 = vrot.slane %v8877_v61, %v8946_v0 }
 0x2a4   :  { %6985 = vmatprep.subr.bf16.mxu1 %v8731_v30  ;;  %7014 = vmatprep.subr.bf16.mxu0 %v9877_v46 }
 0x2a7   :  { %6987 = vmatpush1.bf16.msra.mxu1 %v8734_v39  ;;  %7016 = vmatpush3.bf16.msra.mxu0 %v8762_v63 }
 0x2a8   :  { %6989 = vmatprep.subr.bf16.mxu1 %v8737_v40  ;;  %7017 = vmatprep.subr.bf16.mxu0 %v9877_v46 }
 0x2ab   :  { %6991 = vmatpush1.bf16.msra.mxu1 %v8743_v49  ;;  %7019 = vmatpush3.bf16.msra.mxu0 %v8772_v9 }
 0x2ac   :  { %6993 = vmatprep.subr.bf16.mxu1 %v8747_v50  ;;  %7020 = vmatprep.subr.bf16.mxu0 %v9877_v46 }
 0x2af   :  { %6995 = vmatpush1.bf16.msra.mxu1 %v8756_v58  ;;  %7022 = vmatpush3.bf16.msra.mxu0 %v8782_v17 }
 0x2b0   :  { %6997 = vmatprep.subr.bf16.mxu1 %v8759_v59  ;;  %7023 = vmatprep.subr.bf16.mxu0 %v9877_v46 }
 0x2b3   :  { %6999 = vmatpush1.bf16.msra.mxu1 %v8766_v3  ;;  %7025 = vmatpush3.bf16.msra.mxu0 %v8790_v23 }
 0x2b4   :  { %7001 = vmatprep.subr.bf16.mxu1 %v8769_v4  ;;  %7026 = vmatprep.subr.bf16.mxu0 %v9877_v46 }
 0x2b7   :  { %7003 = vmatpush1.bf16.msra.mxu1 %v8776_v13  ;;  %7028 = vmatpush3.bf16.msra.mxu0 %v8795_v26 }
 0x2b8   :  { %7005 = vmatprep.subr.bf16.mxu1 %v8779_v14  ;;  %7029 = vmatprep.subr.bf16.mxu0 %v9877_v46 }
 0x2bb   :  { %7007 = vmatpush1.bf16.msra.mxu1 %v8786_v22  ;;  %7031 = vmatpush3.bf16.msra.mxu0 %v8803_v31 }
 0x2bc   :  { %7033 = vmatprep.subr.bf16.mxu0 %v8718_v8  ;;  %7064 = vmatprep.subr.bf16.mxu1 %v9877_v46 }
 0x371   :  { %v1811_v56 = vpop.f32.mrb[12].mxu0  ;;  %v1882_v62 = vpop.f32.mrb[14].mxu1 }
 0x372   :  { %v1886_v1 = vadd.f32 %v1811_v56, %v870_v27  ;;  %v1813_v2 = vpop.f32.mrb[13].mxu0  ;;  %v5665_v5 = vpop.f32.mrb[15].mxu1  ;;  %v1900_v18 = vadd.f32 %v8889_v25, %v1882_v62  ;;  %v941_v27 = vadd.f32 %v8846_v35, %v633_v33  ;;  %v9882_v35 = vmov 0.0  }
 0x373   :  { %v1893_v6 = vadd.f32 %v1813_v2, %v939_v28  ;;  %v8993_v62 = vsub.s32 6, %v8872_v57 }
 0x374   :  { %v5132_v7 = vmul.f32 -1.442695, %v1886_v1 }
 0x375   :  { %v5133_v10 = vmul.f32 -1.442695, %v1893_v6 }
 0x376   :  { %8093 = vpow2.f32 %v5132_v7 }
 0x377   :  { %8095 = vpow2.f32 %v5133_v10 }
 0x380   :  { %v8094_v11 = vpop.eup %8093 }
 0x381   :  { %v1890_v15 = vadd.f32 1.0, %v8094_v11  ;;  %v8096_v46 = vpop.eup %8095  ;;  %v637_v11 = vrot.slane %v8877_v61, %v8993_v62 }
 0x382   :  { %v1897_v34 = vadd.f32 1.0, %v8096_v46  ;;  %v9881_v46 = vmov 0.0|0.0  }
 0x383   :  { %8097 = vrcp.f32 %v1890_v15  ;;  %v8998_v15 = vsub.s32 7, %v8872_v57  ;;  %v645_v57 = vrot.slane %v9002_v55, %v8875_v60 }
 0x384   :  { %8099 = vrcp.f32 %v1897_v34 }
 0x38d   :  { %v8098_v24 = vpop.eup %8097 }
 0x38e   :  { %v1901_v28 = vmul.f32 %v8098_v24, %v1900_v18  ;;  %v8100_v1 = vpop.eup %8099  ;;  %v641_v18 = vrot.slane %v8877_v61, %v8998_v15 }
 0x38f   :  { %v1904_v2 = vsub.f32 1.0, %v8100_v1  ;;  %v1906_v7 = vmul.f32 %v8100_v1, %v8894_v16 }
 0x390   :  { %v1902_v56 = vadd.f32 %v1901_v28, %v941_v27 }
 0x392   :  { %8101 = vtanh.f32 %v1902_v56 }
 0x39c   :  { %v8102_v5 = vpop.eup %8101 }
 0x39d   :  { %v1905_v6 = vmul.f32 %v8102_v5, %v1904_v2 }
 0x39f   :  { %v8953_v10 = vadd.f32 %v1906_v7, %v1905_v6 }
 0x3a1   :  { %1973 = vmatmul.mubr.f32.vlgmr.msra.gmra.mrb[2].mxu1 %v8953_v10  ;;  %5699 = vmatmul.mubr.f32.vlgmr.msra.gmra.mrb[14].mxu0 %v8953_v10 }
 0x3a2   :  { %7035 = vmatpush1.bf16.msra.mxu0 %v8720_v19  ;;  %7066 = vmatpush3.bf16.msra.mxu1 %v8739_v44 }
 0x3a3   :  { %7037 = vmatprep.subr.bf16.mxu0 %v8723_v20  ;;  %7067 = vmatprep.subr.bf16.mxu1 %v9881_v46 }
 0x3a4   :  { %2135 = vmatprep.mubr.f32.mxu0 %v9882_v35  ;;  %5733 = vmatprep.mubr.msk.f32.mxu1 %vm8496_vm0, %v9882_v35 }
 0x3a6   :  { %7039 = vmatpush1.bf16.msra.mxu0 %v8727_v29  ;;  %7069 = vmatpush3.bf16.msra.mxu1 %v8750_v54 }
 0x3a7   :  { %7041 = vmatprep.subr.bf16.mxu0 %v8731_v30  ;;  %7070 = vmatprep.subr.bf16.mxu1 %v9881_v46 }
 0x3aa   :  { %7043 = vmatpush1.bf16.msra.mxu0 %v8734_v39  ;;  %7072 = vmatpush3.bf16.msra.mxu1 %v8762_v63 }
 0x3ab   :  { %7045 = vmatprep.subr.bf16.mxu0 %v8737_v40  ;;  %7073 = vmatprep.subr.bf16.mxu1 %v9881_v46 }
 0x3ae   :  { %7047 = vmatpush1.bf16.msra.mxu0 %v8743_v49  ;;  %7075 = vmatpush3.bf16.msra.mxu1 %v8772_v9 }
 0x3af   :  { %7049 = vmatprep.subr.bf16.mxu0 %v8747_v50  ;;  %7076 = vmatprep.subr.bf16.mxu1 %v9881_v46 }
 0x3b2   :  { %7051 = vmatpush1.bf16.msra.mxu0 %v8756_v58  ;;  %7078 = vmatpush3.bf16.msra.mxu1 %v8782_v17 }
 0x3b3   :  { %7053 = vmatprep.subr.bf16.mxu0 %v8759_v59  ;;  %7079 = vmatprep.subr.bf16.mxu1 %v9881_v46 }
 0x3b6   :  { %7055 = vmatpush1.bf16.msra.mxu0 %v8766_v3  ;;  %7081 = vmatpush3.bf16.msra.mxu1 %v8790_v23 }
 0x3b7   :  { %7057 = vmatprep.subr.bf16.mxu0 %v8769_v4  ;;  %7082 = vmatprep.subr.bf16.mxu1 %v9881_v46 }
 0x3ba   :  { %7059 = vmatpush1.bf16.msra.mxu0 %v8776_v13  ;;  %7084 = vmatpush3.bf16.msra.mxu1 %v8795_v26 }
 0x3bb   :  { %7061 = vmatprep.subr.bf16.mxu0 %v8779_v14  ;;  %7085 = vmatprep.subr.bf16.mxu1 %v9881_v46 }
 0x3be   :  { %7063 = vmatpush1.bf16.msra.mxu0 %v8786_v22  ;;  %7087 = vmatpush3.bf16.msra.mxu1 %v8803_v31 }
 0x3bf   :  { %7089 = vmatprep.subr.bf16.mxu0 %v8718_v8  ;;  %7120 = vmatprep.subr.bf16.mxu1 %v9881_v46 }
 0x474   :  { %v1974_v33 = vpop.f32.mrb[2].mxu1  ;;  %v2045_v34 = vpop.f32.mrb[14].mxu0 }
 0x475   :  { %v8018_v24 = vadd.f32 %v1974_v33, %v637_v11  ;;  %v1976_v27 = vpop.f32.mrb[3].mxu1  ;;  %v5700_v28 = vpop.f32.mrb[15].mxu0  ;;  %v2063_v61 = vadd.f32 %v8889_v25, %v2045_v34  ;;  %v1081_v33 = vadd.f32 %v8848_v37, %v645_v57  ;;  %v649_v37 = vrot.slane %v9002_v55, %v8882_v36 }
 0x476   :  { %v8019_v1 = vadd.f32 %v1976_v27, %v641_v18 }
 0x477   :  { %v5134_v56 = vmul.f32 -1.442695, %v8018_v24  ;;  %v1083_v34 = vadd.f32 %v8850_v38, %v649_v37 }
 0x478   :  { %v5135_v2 = vmul.f32 -1.442695, %v8019_v1 }
 0x479   :  { %8103 = vpow2.f32 %v5134_v56 }
 0x47a   :  { %8105 = vpow2.f32 %v5135_v2 }
 0x483   :  { %v8104_v5 = vpop.eup %8103 }
 0x484   :  { %v2053_v6 = vadd.f32 1.0, %v8104_v5  ;;  %v8106_v7 = vpop.eup %8105 }
 0x485   :  { %v2060_v53 = vadd.f32 1.0, %v8106_v7 }
 0x486   :  { %8107 = vrcp.f32 %v2053_v6 }
 0x487   :  { %8109 = vrcp.f32 %v2060_v53  ;;  %v653_v53 = vrot.slane %v9002_v55, %v8887_v21 }
 0x489   :  { %v1152_v6 = vadd.f32 %v8852_v41, %v653_v53 }
 0x490   :  { %v8108_v11 = vpop.eup %8107 }
 0x491   :  { %v2064_v24 = vmul.f32 %v8108_v11, %v2063_v61  ;;  %v8110_v27 = vpop.eup %8109 }
 0x492   :  { %v2067_v28 = vsub.f32 1.0, %v8110_v27  ;;  %v2069_v2 = vmul.f32 %v8110_v27, %v8953_v10 }
 0x493   :  { %v2065_v18 = vadd.f32 %v2064_v24, %v1081_v33 }
 0x495   :  { %8111 = vtanh.f32 %v2065_v18 }
 0x49f   :  { %v8112_v56 = vpop.eup %8111 }
 0x4a0   :  { %v2068_v1 = vmul.f32 %v8112_v56, %v2067_v28 }
 0x4a2   :  { %v9009_v5 = vadd.f32 %v2069_v2, %v2068_v1  ;;  %v657_v2 = vrot.slane %v9002_v55, %v8934_v32 }
 0x4a4   :  { %2136 = vmatmul.mubr.f32.vlgmr.msra.gmra.mrb[16].mxu0 %v9009_v5  ;;  %5734 = vmatmul.mubr.f32.vlgmr.msra.gmra.mrb[16].mxu1 %v9009_v5  ;;  %v1154_v53 = vadd.f32 %v8854_v42, %v657_v2  ;;  %v661_v42 = vrot.slane %v9002_v55, %v8937_v12 }
 0x4a5   :  { %7091 = vmatpush1.bf16.msra.mxu0 %v8720_v19  ;;  %7122 = vmatpush3.bf16.msra.mxu1 %v8739_v44 }
 0x4a6   :  { %7093 = vmatprep.subr.bf16.mxu0 %v8723_v20  ;;  %7123 = vmatprep.subr.bf16.mxu1 %v9881_v46 }
 0x4a7   :  { %2298 = vmatprep.mubr.f32.mxu0 %v9882_v35  ;;  %5768 = vmatprep.mubr.msk.f32.mxu1 %vm8496_vm0, %v9882_v35 }
 0x4a9   :  { %7095 = vmatpush1.bf16.msra.mxu0 %v8727_v29  ;;  %7125 = vmatpush3.bf16.msra.mxu1 %v8750_v54 }
 0x4aa   :  { %7097 = vmatprep.subr.bf16.mxu0 %v8731_v30  ;;  %7126 = vmatprep.subr.bf16.mxu1 %v9881_v46 }
 0x4ad   :  { %7099 = vmatpush1.bf16.msra.mxu0 %v8734_v39  ;;  %7128 = vmatpush3.bf16.msra.mxu1 %v8762_v63 }
 0x4ae   :  { %7101 = vmatprep.subr.bf16.mxu0 %v8737_v40  ;;  %7129 = vmatprep.subr.bf16.mxu1 %v9881_v46 }
 0x4b1   :  { %7103 = vmatpush1.bf16.msra.mxu0 %v8743_v49  ;;  %7131 = vmatpush3.bf16.msra.mxu1 %v8772_v9 }
 0x4b2   :  { %7105 = vmatprep.subr.bf16.mxu0 %v8747_v50  ;;  %7132 = vmatprep.subr.bf16.mxu1 %v9881_v46 }
 0x4b5   :  { %7107 = vmatpush1.bf16.msra.mxu0 %v8756_v58  ;;  %7134 = vmatpush3.bf16.msra.mxu1 %v8782_v17 }
 0x4b6   :  { %7109 = vmatprep.subr.bf16.mxu0 %v8759_v59  ;;  %7135 = vmatprep.subr.bf16.mxu1 %v9881_v46 }
 0x4b9   :  { %7111 = vmatpush1.bf16.msra.mxu0 %v8766_v3  ;;  %7137 = vmatpush3.bf16.msra.mxu1 %v8790_v23 }
 0x4ba   :  { %7113 = vmatprep.subr.bf16.mxu0 %v8769_v4  ;;  %7138 = vmatprep.subr.bf16.mxu1 %v9881_v46 }
 0x4bd   :  { %7115 = vmatpush1.bf16.msra.mxu0 %v8776_v13  ;;  %7140 = vmatpush3.bf16.msra.mxu1 %v8795_v26 }
 0x4be   :  { %7117 = vmatprep.subr.bf16.mxu0 %v8779_v14  ;;  %7141 = vmatprep.subr.bf16.mxu1 %v9881_v46 }
 0x4c1   :  { %7119 = vmatpush1.bf16.msra.mxu0 %v8786_v22  ;;  %7143 = vmatpush3.bf16.msra.mxu1 %v8803_v31 }
 0x4c2   :  { %7145 = vmatprep.subr.bf16.mxu0 %v8718_v8  ;;  %7176 = vmatprep.subr.bf16.mxu1 %v9881_v46 }
 0x577   :  { %v2137_v7 = vpop.f32.mrb[16].mxu0  ;;  %v2208_v57 = vpop.f32.mrb[16].mxu1 }
 0x578   :  { %v2212_v61 = vadd.f32 %v2137_v7, %v1083_v34  ;;  %v2139_v11 = vpop.f32.mrb[17].mxu0  ;;  %v5735_v33 = vpop.f32.mrb[17].mxu1  ;;  %v2226_v41 = vadd.f32 %v8889_v25, %v2208_v57 }
 0x579   :  { %v2219_v24 = vadd.f32 %v2139_v11, %v1152_v6 }
 0x57a   :  { %v5136_v18 = vmul.f32 -1.442695, %v2212_v61 }
 0x57b   :  { %v5137_v27 = vmul.f32 -1.442695, %v2219_v24 }
 0x57c   :  { %8113 = vpow2.f32 %v5136_v18 }
 0x57d   :  { %8115 = vpow2.f32 %v5137_v27 }
 0x586   :  { %v8114_v28 = vpop.eup %8113 }
 0x587   :  { %v2216_v56 = vadd.f32 1.0, %v8114_v28  ;;  %v8116_v1 = vpop.eup %8115  ;;  %v665_v28 = vrot.slane %v9002_v55, %v8946_v0 }
 0x588   :  { %v2223_v38 = vadd.f32 1.0, %v8116_v1 }
 0x589   :  { %8117 = vrcp.f32 %v2216_v56 }
 0x58a   :  { %8119 = vrcp.f32 %v2223_v38 }
 0x593   :  { %v8118_v37 = vpop.eup %8117 }
 0x594   :  { %v2227_v34 = vmul.f32 %v8118_v37, %v2226_v41  ;;  %v8120_v7 = vpop.eup %8119 }
 0x595   :  { %v2230_v61 = vsub.f32 1.0, %v8120_v7  ;;  %v2232_v24 = vmul.f32 %v8120_v7, %v9009_v5  ;;  %v669_v7 = vrot.slane %v9002_v55, %v8993_v62 }
 0x596   :  { %v2228_v6 = vadd.f32 %v2227_v34, %v1154_v53 }
 0x598   :  { %8121 = vtanh.f32 %v2228_v6 }
 0x5a2   :  { %v8122_v11 = vpop.eup %8121 }
 0x5a3   :  { %v2231_v33 = vmul.f32 %v8122_v11, %v2230_v61 }
 0x5a5   :  { %v9059_v18 = vadd.f32 %v2232_v24, %v2231_v33  ;;  %v1294_v24 = vadd.f32 %v8856_v43, %v669_v7  ;;  %v9146_v43 = vld [vmem:[#allocation6 + $0x10] sm:$0xff] }
 0x5a7   :  { %2299 = vmatmul.mubr.f32.vlgmr.msra.gmra.mrb[6].mxu0 %v9059_v18  ;;  %5769 = vmatmul.mubr.f32.vlgmr.msra.gmra.mrb[18].mxu1 %v9059_v18 }
 0x5a8   :  { %7147 = vmatpush1.bf16.msra.mxu0 %v8720_v19  ;;  %7178 = vmatpush3.bf16.msra.mxu1 %v8739_v44 }
 0x5a9   :  { %7149 = vmatprep.subr.bf16.mxu0 %v8723_v20  ;;  %7179 = vmatprep.subr.bf16.mxu1 %v9881_v46 }
 0x5aa   :  { %2461 = vmatprep.mubr.f32.mxu0 %v9882_v35  ;;  %5803 = vmatprep.mubr.msk.f32.mxu1 %vm8496_vm0, %v9882_v35 }
 0x5ac   :  { %7151 = vmatpush1.bf16.msra.mxu0 %v8727_v29  ;;  %7181 = vmatpush3.bf16.msra.mxu1 %v8750_v54 }
 0x5ad   :  { %7153 = vmatprep.subr.bf16.mxu0 %v8731_v30  ;;  %7182 = vmatprep.subr.bf16.mxu1 %v9881_v46 }
 0x5b0   :  { %7155 = vmatpush1.bf16.msra.mxu0 %v8734_v39  ;;  %7184 = vmatpush3.bf16.msra.mxu1 %v8762_v63 }
 0x5b1   :  { %7157 = vmatprep.subr.bf16.mxu0 %v8737_v40  ;;  %7185 = vmatprep.subr.bf16.mxu1 %v9881_v46 }
 0x5b4   :  { %7159 = vmatpush1.bf16.msra.mxu0 %v8743_v49  ;;  %7187 = vmatpush3.bf16.msra.mxu1 %v8772_v9 }
 0x5b5   :  { %7161 = vmatprep.subr.bf16.mxu0 %v8747_v50  ;;  %7188 = vmatprep.subr.bf16.mxu1 %v9881_v46 }
 0x5b8   :  { %7163 = vmatpush1.bf16.msra.mxu0 %v8756_v58  ;;  %7190 = vmatpush3.bf16.msra.mxu1 %v8782_v17 }
 0x5b9   :  { %7165 = vmatprep.subr.bf16.mxu0 %v8759_v59  ;;  %7191 = vmatprep.subr.bf16.mxu1 %v9881_v46 }
 0x5bc   :  { %7167 = vmatpush1.bf16.msra.mxu0 %v8766_v3  ;;  %7193 = vmatpush3.bf16.msra.mxu1 %v8790_v23 }
 0x5bd   :  { %7169 = vmatprep.subr.bf16.mxu0 %v8769_v4  ;;  %7194 = vmatprep.subr.bf16.mxu1 %v9881_v46 }
 0x5c0   :  { %7171 = vmatpush1.bf16.msra.mxu0 %v8776_v13  ;;  %7196 = vmatpush3.bf16.msra.mxu1 %v8795_v26 }
 0x5c1   :  { %7173 = vmatprep.subr.bf16.mxu0 %v8779_v14  ;;  %7197 = vmatprep.subr.bf16.mxu1 %v9881_v46 }
 0x5c4   :  { %7175 = vmatpush1.bf16.msra.mxu0 %v8786_v22  ;;  %7199 = vmatpush3.bf16.msra.mxu1 %v8803_v31 }
 0x5c5   :  { %7201 = vmatprep.subr.bf16.mxu1 %v8718_v8  ;;  %7232 = vmatprep.subr.bf16.mxu0 %v9881_v46 }
 0x67a   :  { %v2300_v57 = vpop.f32.mrb[6].mxu0  ;;  %v2371_v27 = vpop.f32.mrb[18].mxu1 }
 0x67b   :  { %v8020_v56 = vadd.f32 %v2300_v57, %v661_v42  ;;  %v2302_v1 = vpop.f32.mrb[7].mxu0  ;;  %v5770_v2 = vpop.f32.mrb[19].mxu1  ;;  %v2389_v11 = vadd.f32 %v8889_v25, %v2371_v27  ;;  %v673_v27 = vrot.slane %v9002_v55, %v8998_v15 }
 0x67c   :  { %v8021_v41 = vadd.f32 %v2302_v1, %v665_v28 }
 0x67d   :  { %v5138_v38 = vmul.f32 -1.442695, %v8020_v56 }
 0x67e   :  { %v5139_v37 = vmul.f32 -1.442695, %v8021_v41 }
 0x67f   :  { %8123 = vpow2.f32 %v5138_v38 }
 0x680   :  { %8125 = vpow2.f32 %v5139_v37  ;;  %v677_v37 = vrot.slane %v9146_v43, %v8875_v60 }
 0x689   :  { %v8124_v53 = vpop.eup %8123 }
 0x68a   :  { %v2379_v34 = vadd.f32 1.0, %v8124_v53  ;;  %v8126_v6 = vpop.eup %8125  ;;  %v1296_v53 = vadd.f32 %v8858_v45, %v673_v27 }
 0x68b   :  { %v2386_v61 = vadd.f32 1.0, %v8126_v6 }
 0x68c   :  { %8127 = vrcp.f32 %v2379_v34  ;;  %v1365_v34 = vadd.f32 %v8860_v47, %v677_v37 }
 0x68d   :  { %8129 = vrcp.f32 %v2386_v61 }
 0x696   :  { %v8128_v33 = vpop.eup %8127 }
 0x697   :  { %v2390_v42 = vmul.f32 %v8128_v33, %v2389_v11  ;;  %v8130_v28 = vpop.eup %8129 }
 0x698   :  { %v2393_v56 = vsub.f32 1.0, %v8130_v28  ;;  %v2395_v38 = vmul.f32 %v8130_v28, %v9059_v18 }
 0x699   :  { %v2391_v57 = vadd.f32 %v2390_v42, %v1294_v24 }
 0x69b   :  { %8131 = vtanh.f32 %v2391_v57 }
 0x6a5   :  { %v8132_v1 = vpop.eup %8131 }
 0x6a6   :  { %v2394_v2 = vmul.f32 %v8132_v1, %v2393_v56  ;;  %v681_v56 = vrot.slane %v9146_v43, %v8882_v36 }
 0x6a8   :  { %v9107_v41 = vadd.f32 %v2395_v38, %v2394_v2  ;;  %v1367_v2 = vadd.f32 %v8862_v48, %v681_v56 }
 0x6aa   :  { %2462 = vmatmul.mubr.f32.vlgmr.msra.gmra.mrb[18].mxu0 %v9107_v41  ;;  %5804 = vmatmul.mubr.f32.vlgmr.msra.gmra.mrb[20].mxu1 %v9107_v41 }
 0x6ab   :  { %7203 = vmatpush1.bf16.msra.mxu1 %v8720_v19  ;;  %7234 = vmatpush3.bf16.msra.mxu0 %v8739_v44 }
 0x6ac   :  { %7205 = vmatprep.subr.bf16.mxu1 %v8723_v20  ;;  %7235 = vmatprep.subr.bf16.mxu0 %v9881_v46 }
 0x6ad   :  { %2624 = vmatprep.mubr.f32.mxu1 %v9882_v35  ;;  %5838 = vmatprep.mubr.msk.f32.mxu0 %vm8496_vm0, %v9882_v35 }
 0x6af   :  { %7207 = vmatpush1.bf16.msra.mxu1 %v8727_v29  ;;  %7237 = vmatpush3.bf16.msra.mxu0 %v8750_v54 }
 0x6b0   :  { %7209 = vmatprep.subr.bf16.mxu1 %v8731_v30  ;;  %7238 = vmatprep.subr.bf16.mxu0 %v9881_v46 }
 0x6b3   :  { %7211 = vmatpush1.bf16.msra.mxu1 %v8734_v39  ;;  %7240 = vmatpush3.bf16.msra.mxu0 %v8762_v63 }
 0x6b4   :  { %7213 = vmatprep.subr.bf16.mxu1 %v8737_v40  ;;  %7241 = vmatprep.subr.bf16.mxu0 %v9881_v46 }
 0x6b7   :  { %7215 = vmatpush1.bf16.msra.mxu1 %v8743_v49  ;;  %7243 = vmatpush3.bf16.msra.mxu0 %v8772_v9 }
 0x6b8   :  { %7217 = vmatprep.subr.bf16.mxu1 %v8747_v50  ;;  %7244 = vmatprep.subr.bf16.mxu0 %v9881_v46 }
 0x6bb   :  { %7219 = vmatpush1.bf16.msra.mxu1 %v8756_v58  ;;  %7246 = vmatpush3.bf16.msra.mxu0 %v8782_v17 }
 0x6bc   :  { %7221 = vmatprep.subr.bf16.mxu1 %v8759_v59  ;;  %7247 = vmatprep.subr.bf16.mxu0 %v9881_v46 }
 0x6bf   :  { %7223 = vmatpush1.bf16.msra.mxu1 %v8766_v3  ;;  %7249 = vmatpush3.bf16.msra.mxu0 %v8790_v23 }
 0x6c0   :  { %7225 = vmatprep.subr.bf16.mxu1 %v8769_v4  ;;  %7250 = vmatprep.subr.bf16.mxu0 %v9881_v46 }
 0x6c3   :  { %7227 = vmatpush1.bf16.msra.mxu1 %v8776_v13  ;;  %7252 = vmatpush3.bf16.msra.mxu0 %v8795_v26 }
 0x6c4   :  { %7229 = vmatprep.subr.bf16.mxu1 %v8779_v14  ;;  %7253 = vmatprep.subr.bf16.mxu0 %v9881_v46 }
 0x6c7   :  { %7231 = vmatpush1.bf16.msra.mxu1 %v8786_v22  ;;  %7255 = vmatpush3.bf16.msra.mxu0 %v8803_v31 }
 0x6c8   :  { %7257 = vmatprep.subr.bf16.mxu0 %v8718_v8  ;;  %7288 = vmatprep.subr.bf16.mxu1 %v9881_v46 }
 0x77d   :  { %v2463_v6 = vpop.f32.mrb[18].mxu0  ;;  %v2534_v7 = vpop.f32.mrb[20].mxu1 }
 0x77e   :  { %v2538_v61 = vadd.f32 %v2463_v6, %v1296_v53  ;;  %v2465_v11 = vpop.f32.mrb[19].mxu0  ;;  %v5805_v33 = vpop.f32.mrb[21].mxu1  ;;  %v2552_v47 = vadd.f32 %v8889_v25, %v2534_v7 }
 0x77f   :  { %v2545_v8 = vadd.f32 %v2465_v11, %v1365_v34 }
 0x780   :  { %v5140_v24 = vmul.f32 -1.442695, %v2538_v61 }
 0x781   :  { %v5141_v42 = vmul.f32 -1.442695, %v2545_v8 }
 0x782   :  { %8133 = vpow2.f32 %v5140_v24  ;;  %v2886_v24 = vld [vmem:[#allocation9] sm:$0xff] }
 0x783   :  { %8135 = vpow2.f32 %v5141_v42  ;;  %v2889_v42 = vld [vmem:[#allocation9 + $0x18] sm:$0xff] }
 0x78c   :  { %v8134_v57 = vpop.eup %8133 }
 0x78d   :  { %v2542_v28 = vadd.f32 1.0, %v8134_v57  ;;  %v8136_v55 = vpop.eup %8135 }
 0x78e   :  { %v2549_v45 = vadd.f32 1.0, %v8136_v55  ;;  %v2896_v55 = vld [vmem:[#allocation9 + $0x50] sm:$0xff] }
 0x78f   :  { %8137 = vrcp.f32 %v2542_v28  ;;  %v2893_v28 = vld [vmem:[#allocation9 + $0x38] sm:$0xff] }
 0x790   :  { %8139 = vrcp.f32 %v2549_v45  ;;  %v2894_v45 = vld [vmem:[#allocation9 + $0x40] sm:$0xff] }
 0x799   :  { %v8138_v1 = vpop.eup %8137 }
 0x79a   :  { %v2553_v38 = vmul.f32 %v8138_v1, %v2552_v47  ;;  %v8140_v37 = vpop.eup %8139  ;;  %v2897_v47 = vld [vmem:[#allocation9 + $0x58] sm:$0xff] }
 0x79b   :  { %v2556_v53 = vsub.f32 1.0, %v8140_v37  ;;  %v2558_v61 = vmul.f32 %v8140_v37, %v9107_v41  ;;  %v7348_v37 = vpack.c.bf16 %v2897_v47, %v2894_v45 }
 0x79c   :  { %v2554_v27 = vadd.f32 %v2553_v38, %v1367_v2  ;;  %v2892_v2 = vld [vmem:[#allocation9 + $0x30] sm:$0xff]  ;;  %v2895_v38 = vld [vmem:[#allocation9 + $0x48] sm:$0xff] }
 0x79e   :  { %8141 = vtanh.f32 %v2554_v27  ;;  %v2899_v27 = vld [vmem:[#allocation9 + $0x68] sm:$0xff] }
 0x7a8   :  { %v8142_v34 = vpop.eup %8141 }
 0x7a9   :  { %v2557_v6 = vmul.f32 %v8142_v34, %v2556_v53  ;;  %v2902_v53 = vld [vmem:[#allocation9 + $0x80] sm:$0xff]  ;;  %v2900_v34 = vld [vmem:[#allocation9 + $0x70] sm:$0xff] }
 0x7ab   :  { %v9159_v11 = vadd.f32 %v2558_v61, %v2557_v6  ;;  %v2903_v6 = vld [vmem:[#allocation9 + $0x88] sm:$0xff]  ;;  %v7318_v61 = vpack.c.bf16 %v2895_v38, %v2892_v2  ;;  %v2925_v2 = vld [vmem:[#allocation9 + $0x138] sm:$0xff] }
 0x7ac   :  { %v2929_v38 = vld [vmem:[#allocation9 + $0x158] sm:$0xff] }
 0x7ad   :  { %2625 = vmatmul.mubr.f32.vlgmr.msra.gmra.mrb[8].mxu1 %v9159_v11  ;;  %5839 = vmatmul.mubr.f32.vlgmr.msra.gmra.mrb[20].mxu0 %v9159_v11 }
 0x7ae   :  { %7259 = vmatpush1.bf16.msra.mxu0 %v8720_v19  ;;  %7290 = vmatpush3.bf16.msra.mxu1 %v8739_v44  ;;  %v2887_v19 = vld [vmem:[#allocation9 + $0x8] sm:$0xff]  ;;  %v685_v44 = vrot.slane %v9146_v43, %v8887_v21 }
 0x7af   :  { %7261 = vmatprep.subr.bf16.mxu0 %v8723_v20  ;;  %7291 = vmatprep.subr.bf16.mxu1 %v9881_v46  ;;  %v2890_v20 = vld [vmem:[#allocation9 + $0x20] sm:$0xff] }
 0x7b0   :  { %2787 = vmatprep.mubr.f32.mxu0 %v9882_v35  ;;  %5873 = vmatprep.mubr.msk.f32.mxu1 %vm8496_vm0, %v9882_v35 }
 0x7b2   :  { %7263 = vmatpush1.bf16.msra.mxu0 %v8727_v29  ;;  %7293 = vmatpush3.bf16.msra.mxu1 %v8750_v54  ;;  %v2888_v29 = vld [vmem:[#allocation9 + $0x10] sm:$0xff]  ;;  %v689_v54 = vrot.slane %v9146_v43, %v8934_v32 }
 0x7b3   :  { %7265 = vmatprep.subr.bf16.mxu0 %v8731_v30  ;;  %7294 = vmatprep.subr.bf16.mxu1 %v9881_v46  ;;  %v7312_v30 = vpack.c.bf16 %v2890_v20, %v2887_v19  ;;  %v7320_v19 = vpack.c.bf16 %v2902_v53, %v2899_v27  ;;  %v7352_v20 = vpack.c.bf16 %v2903_v6, %v2900_v34  ;;  %v2932_v27 = vld [vmem:[#allocation9 + $0x170] sm:$0xff]  ;;  %v2933_v53 = vld [vmem:[#allocation9 + $0x178] sm:$0xff] }
 0x7b4   :  { %v7340_v6 = vpack.c.bf16 %v2932_v27, %v2929_v38 }
 0x7b6   :  { %7267 = vmatpush1.bf16.msra.mxu0 %v8734_v39  ;;  %7296 = vmatpush3.bf16.msra.mxu1 %v8762_v63  ;;  %v2891_v39 = vld [vmem:[#allocation9 + $0x28] sm:$0xff] }
 0x7b7   :  { %7269 = vmatprep.subr.bf16.mxu0 %v8737_v40  ;;  %7297 = vmatprep.subr.bf16.mxu1 %v9881_v46  ;;  %v7344_v40 = vpack.c.bf16 %v2891_v39, %v2888_v29  ;;  %v2898_v29 = vld [vmem:[#allocation9 + $0x60] sm:$0xff]  ;;  %v2905_v39 = vld [vmem:[#allocation9 + $0x98] sm:$0xff] }
 0x7ba   :  { %7271 = vmatpush1.bf16.msra.mxu0 %v8743_v49  ;;  %7299 = vmatpush3.bf16.msra.mxu1 %v8772_v9 }
 0x7bb   :  { %7273 = vmatprep.subr.bf16.mxu0 %v8747_v50  ;;  %7300 = vmatprep.subr.bf16.mxu1 %v9881_v46 }
 0x7be   :  { %7275 = vmatpush1.bf16.msra.mxu0 %v8756_v58  ;;  %7302 = vmatpush3.bf16.msra.mxu1 %v8782_v17 }
 0x7bf   :  { %7277 = vmatprep.subr.bf16.mxu0 %v8759_v59  ;;  %7303 = vmatprep.subr.bf16.mxu1 %v9881_v46 }
 0x7c2   :  { %7279 = vmatpush1.bf16.msra.mxu0 %v8766_v3  ;;  %7305 = vmatpush3.bf16.msra.mxu1 %v8790_v23 }
 0x7c3   :  { %7281 = vmatprep.subr.bf16.mxu0 %v8769_v4  ;;  %7306 = vmatprep.subr.bf16.mxu1 %v9881_v46 }
 0x7c6   :  { %7283 = vmatpush1.bf16.msra.mxu0 %v8776_v13  ;;  %7308 = vmatpush3.bf16.msra.mxu1 %v8795_v26 }
 0x7c7   :  { %7285 = vmatprep.subr.bf16.mxu0 %v8779_v14  ;;  %7309 = vmatprep.subr.bf16.mxu1 %v9881_v46 }
 0x7ca   :  { %7287 = vmatpush1.bf16.msra.mxu0 %v8786_v22  ;;  %7311 = vmatpush3.bf16.msra.mxu1 %v8803_v31  ;;  %v693_v22 = vrot.slane %v9146_v43, %v8937_v12 }
 0x7cb   :  { %7313 = vmatprep.subr.bf16.mxu0 %v7312_v30  ;;  %7345 = vmatprep.subr.bf16.mxu1 %v7344_v40  ;;  %v2901_v30 = vld [vmem:[#allocation9 + $0x78] sm:$0xff] }
 0x7cc   :  { %v1507_v48 = vadd.f32 %v8864_v51, %v693_v22  ;;  %v7316_v51 = vpack.c.bf16 %v2896_v55, %v2893_v28  ;;  %v2923_v28 = vld [vmem:[#allocation9 + $0x128] sm:$0xff]  ;;  %v2926_v55 = vld [vmem:[#allocation9 + $0x140] sm:$0xff] }
 0x7cd   :  { %v7336_v47 = vpack.c.bf16 %v2926_v55, %v2923_v28  ;;  %v2967_v28 = vld [vmem:[#allocation10 + $0x108] sm:$0xff] }
 0x880   :  { %v2626_v49 = vpop.f32.mrb[8].mxu1  ;;  %v2697_v50 = vpop.f32.mrb[20].mxu0 }
 0x881   :  { %v8022_v58 = vadd.f32 %v2626_v49, %v685_v44  ;;  %v2628_v59 = vpop.f32.mrb[9].mxu1  ;;  %v5840_v63 = vpop.f32.mrb[21].mxu0  ;;  %v2715_v26 = vadd.f32 %v8889_v25, %v2697_v50  ;;  %v7314_v25 = vpack.c.bf16 %v2889_v42, %v2886_v24  ;;  %v2908_v44 = vld [vmem:[#allocation9 + $0xb0] sm:$0xff]  ;;  %v2906_v49 = vld [vmem:[#allocation9 + $0xa0] sm:$0xff]  ;;  %v2909_v50 = vld [vmem:[#allocation9 + $0xb8] sm:$0xff] }
 0x882   :  { %v8023_v4 = vadd.f32 %v2628_v59, %v689_v54  ;;  %v7322_v54 = vpack.c.bf16 %v2901_v30, %v2898_v29  ;;  %v2904_v59 = vld [vmem:[#allocation9 + $0x90] sm:$0xff]  ;;  %v2907_v63 = vld [vmem:[#allocation9 + $0xa8] sm:$0xff]  ;;  %v2934_v30 = vld [vmem:[#allocation10] sm:$0xff] }
 0x883   :  { %v5142_v3 = vmul.f32 -1.442695, %v8022_v58  ;;  %v7356_v58 = vpack.c.bf16 %v2909_v50, %v2906_v49  ;;  %v2916_v42 = vld [vmem:[#allocation9 + $0xf0] sm:$0xff]  ;;  %v2943_v50 = vld [vmem:[#allocation10 + $0x48] sm:$0xff] }
 0x884   :  { %v5143_v9 = vmul.f32 -1.442695, %v8023_v4  ;;  %v2914_v4 = vld [vmem:[#allocation9 + $0xe0] sm:$0xff]  ;;  %v2940_v49 = vld [vmem:[#allocation10 + $0x30] sm:$0xff] }
 0x885   :  { %8143 = vpow2.f32 %v5142_v3  ;;  %v2911_v3 = vld [vmem:[#allocation9 + $0xc8] sm:$0xff] }
 0x886   :  { %8145 = vpow2.f32 %v5143_v9  ;;  %v2912_v9 = vld [vmem:[#allocation9 + $0xd0] sm:$0xff] }
 0x88f   :  { %v8144_v13 = vpop.eup %8143 }
 0x890   :  { %v2705_v14 = vadd.f32 1.0, %v8144_v13  ;;  %v8146_v17 = vpop.eup %8145  ;;  %v2915_v13 = vld [vmem:[#allocation9 + $0xe8] sm:$0xff] }
 0x891   :  { %v2712_v23 = vadd.f32 1.0, %v8146_v17  ;;  %v7328_v17 = vpack.c.bf16 %v2914_v4, %v2911_v3  ;;  %v7360_v22 = vpack.c.bf16 %v2915_v13, %v2912_v9  ;;  %v2949_v3 = vld [vmem:[#allocation10 + $0x78] sm:$0xff]  ;;  %v2956_v13 = vld [vmem:[#allocation10 + $0xb0] sm:$0xff] }
 0x892   :  { %8147 = vrcp.f32 %v2705_v14  ;;  %v7326_v14 = vpack.c.bf16 %v2907_v63, %v2904_v59  ;;  %v2946_v63 = vld [vmem:[#allocation10 + $0x60] sm:$0xff]  ;;  %v2953_v9 = vld [vmem:[#allocation10 + $0x98] sm:$0xff] }
 0x893   :  { %8149 = vrcp.f32 %v2712_v23  ;;  %v2910_v23 = vld [vmem:[#allocation9 + $0xc0] sm:$0xff]  ;;  %v9246_v4 = vpack.c.bf16 %v2949_v3, %v2946_v63  ;;  %v2969_v3 = vld [vmem:[#allocation10 + $0x118] sm:$0xff] }
 0x894   :  { %v2966_v63 = vld [vmem:[#allocation10 + $0x100] sm:$0xff] }
 0x89c   :  { %v8148_v31 = vpop.eup %8147 }
 0x89d   :  { %v2716_v32 = vmul.f32 %v8148_v31, %v2715_v26  ;;  %v8150_v33 = vpop.eup %8149  ;;  %v2913_v26 = vld [vmem:[#allocation9 + $0xd8] sm:$0xff] }
 0x89e   :  { %v2719_v8 = vsub.f32 1.0, %v8150_v33  ;;  %v2721_v12 = vmul.f32 %v8150_v33, %v9159_v11  ;;  %v2917_v31 = vld [vmem:[#allocation9 + $0xf8] sm:$0xff]  ;;  %v7330_v33 = vpack.c.bf16 %v2913_v26, %v2910_v23  ;;  %v2959_v26 = vld [vmem:[#allocation10 + $0xc8] sm:$0xff] }
 0x89f   :  { %v2717_v7 = vadd.f32 %v2716_v32, %v1507_v48  ;;  %v2920_v48 = vld [vmem:[#allocation9 + $0x110] sm:$0xff]  ;;  %v2918_v32 = vld [vmem:[#allocation9 + $0x100] sm:$0xff] }
 0x8a1   :  { %8151 = vtanh.f32 %v2717_v7  ;;  %v2921_v7 = vld [vmem:[#allocation9 + $0x118] sm:$0xff] }
 0x8a2   :  { %v7364_v24 = vpack.c.bf16 %v2921_v7, %v2918_v32  ;;  %v2958_v32 = vld [vmem:[#allocation10 + $0xc0] sm:$0xff]  ;;  %v2961_v7 = vld [vmem:[#allocation10 + $0xd8] sm:$0xff] }
 0x8ab   :  { %v8152_v57 = vpop.eup %8151 }
 0x8ac   :  { %v2720_v56 = vmul.f32 %v8152_v57, %v2719_v8  ;;  %v7332_v8 = vpack.c.bf16 %v2920_v48, %v2917_v31  ;;  %v2919_v57 = vld [vmem:[#allocation9 + $0x108] sm:$0xff]  ;;  %v2962_v31 = vld [vmem:[#allocation10 + $0xe0] sm:$0xff] }
 0x8ad   :  { %v7334_v45 = vpack.c.bf16 %v2919_v57, %v2916_v42  ;;  %v9256_v48 = vpack.c.bf16 %v2962_v31, %v2959_v26  ;;  %v2964_v57 = vld [vmem:[#allocation10 + $0xf0] sm:$0xff]  ;;  %v2978_v26 = vld [vmem:[#allocation10 + $0x160] sm:$0xff]  ;;  %v2981_v31 = vld [vmem:[#allocation10 + $0x178] sm:$0xff] }
 0x8ae   :  { %v9205_v1 = vadd.f32 %v2721_v12, %v2720_v56  ;;  %v2924_v56 = vld [vmem:[#allocation9 + $0x130] sm:$0xff]  ;;  %v2927_v12 = vld [vmem:[#allocation9 + $0x148] sm:$0xff]  ;;  %v9264_v55 = vpack.c.bf16 %v2967_v28, %v2964_v57 }
 0x8af   :  { %v9883_v57 = vld [vmem:[#allocation24_spill] sm:$0xff] }
 0x8b0   :  { %2788 = vmatmul.mubr.f32.vlgmr.msra.gmra.mrb[22].mxu0 %v9205_v1  ;;  %5874 = vmatmul.mubr.f32.vlgmr.msra.gmra.mrb[22].mxu1 %v9205_v1 }
 0x8b1   :  { %7315 = vmatpush1.bf16.msra.mxu0 %v7314_v25  ;;  %7347 = vmatpush3.bf16.msra.mxu1 %v7344_v40  ;;  %v7324_v40 = vpack.c.bf16 %v2908_v44, %v2905_v39  ;;  %v7368_v25 = vpack.c.bf16 %v2927_v12, %v2924_v56  ;;  %v2971_v56 = vld [vmem:[#allocation10 + $0x128] sm:$0xff]  ;;  %v2974_v12 = vld [vmem:[#allocation10 + $0x140] sm:$0xff] }
 0x8b2   :  { %5908 = vmatprep.mubr.f32.mxu1 %v8894_v16  ;;  %7317 = vmatprep.subr.bf16.mxu0 %v7316_v51  ;;  %v2922_v51 = vld [vmem:[#allocation9 + $0x120] sm:$0xff] }
 0x8b3   :  { %7349 = vmatprep.subr.bf16.mxu1 %v7348_v37  ;;  %3070 = vmatprep.mubr.f32.mxu0 %v9882_v35  ;;  %v7338_v34 = vpack.c.bf16 %v2925_v2, %v2922_v51  ;;  %v2936_v51 = vld [vmem:[#allocation10 + $0x10] sm:$0xff]  ;;  %v2939_v2 = vld [vmem:[#allocation10 + $0x28] sm:$0xff] }
 0x8b4   :  { %v9272_v27 = vpack.c.bf16 %v2939_v2, %v2936_v51 }
 0x8b5   :  { %7319 = vmatpush1.bf16.msra.mxu0 %v7318_v61  ;;  %7351 = vmatpush3.bf16.msra.mxu1 %v7348_v37  ;;  %v2930_v37 = vld [vmem:[#allocation9 + $0x160] sm:$0xff] }
 0x8b6   :  { %7321 = vmatprep.subr.bf16.mxu0 %v7320_v19  ;;  %7353 = vmatprep.subr.bf16.mxu1 %v7352_v20  ;;  %v7372_v61 = vpack.c.bf16 %v2933_v53, %v2930_v37  ;;  %v2928_v19 = vld [vmem:[#allocation9 + $0x150] sm:$0xff]  ;;  %v2977_v37 = vld [vmem:[#allocation10 + $0x158] sm:$0xff] }
 0x8b7   :  { %v2980_v53 = vld [vmem:[#allocation10 + $0x170] sm:$0xff] }
 0x8b9   :  { %7323 = vmatpush1.bf16.msra.mxu0 %v7322_v54  ;;  %7355 = vmatpush3.bf16.msra.mxu1 %v7352_v20  ;;  %v2931_v20 = vld [vmem:[#allocation9 + $0x168] sm:$0xff]  ;;  %v9240_v54 = vpack.c.bf16 %v2943_v50, %v2940_v49  ;;  %v2960_v50 = vld [vmem:[#allocation10 + $0xd0] sm:$0xff] }
 0x8ba   :  { %7325 = vmatprep.subr.bf16.mxu0 %v7324_v40  ;;  %7357 = vmatprep.subr.bf16.mxu1 %v7356_v58  ;;  %v7342_v29 = vpack.c.bf16 %v2931_v20, %v2928_v19  ;;  %v2947_v40 = vld [vmem:[#allocation10 + $0x68] sm:$0xff]  ;;  %v2942_v20 = vld [vmem:[#allocation10 + $0x40] sm:$0xff] }
 0x8bd   :  { %7327 = vmatpush1.bf16.msra.mxu0 %v7326_v14  ;;  %7359 = vmatpush3.bf16.msra.mxu1 %v7356_v58  ;;  %v2950_v58 = vld [vmem:[#allocation10 + $0x80] sm:$0xff]  ;;  %v9250_v14 = vpack.c.bf16 %v2956_v13, %v2953_v9  ;;  %v9300_v9 = vpack.c.bf16 %v2969_v3, %v2966_v63  ;;  %v2972_v13 = vld [vmem:[#allocation10 + $0x130] sm:$0xff] }
 0x8be   :  { %7329 = vmatprep.subr.bf16.mxu0 %v7328_v17  ;;  %7361 = vmatprep.subr.bf16.mxu1 %v7360_v22  ;;  %v9244_v59 = vpack.c.bf16 %v2950_v58, %v2947_v40  ;;  %v2952_v17 = vld [vmem:[#allocation10 + $0x90] sm:$0xff]  ;;  %v2963_v40 = vld [vmem:[#allocation10 + $0xe8] sm:$0xff] }
 0x8bf   :  { %v9296_v58 = vpack.c.bf16 %v2963_v40, %v2960_v50 }
 0x8c1   :  { %7331 = vmatpush1.bf16.msra.mxu0 %v7330_v33  ;;  %7363 = vmatpush3.bf16.msra.mxu1 %v7360_v22  ;;  %v2955_v22 = vld [vmem:[#allocation10 + $0xa8] sm:$0xff]  ;;  %v9258_v33 = vpack.c.bf16 %v2961_v7, %v2958_v32  ;;  %v9308_v32 = vpack.c.bf16 %v2981_v31, %v2978_v26  ;;  %v697_v7 = vrot.slane %v9146_v43, %v8946_v0 }
 0x8c2   :  { %7333 = vmatprep.subr.bf16.mxu0 %v7332_v8  ;;  %7365 = vmatprep.subr.bf16.mxu1 %v7364_v24  ;;  %v9252_v23 = vpack.c.bf16 %v2955_v22, %v2952_v17  ;;  %v2965_v8 = vld [vmem:[#allocation10 + $0xf8] sm:$0xff]  ;;  %v2975_v17 = vld [vmem:[#allocation10 + $0x148] sm:$0xff] }
 0x8c3   :  { %v9304_v22 = vpack.c.bf16 %v2975_v17, %v2972_v13 }
 0x8c5   :  { %7335 = vmatpush1.bf16.msra.mxu0 %v7334_v45  ;;  %7367 = vmatpush3.bf16.msra.mxu1 %v7364_v24  ;;  %v2968_v24 = vld [vmem:[#allocation10 + $0x110] sm:$0xff]  ;;  %v2970_v45 = vld [vmem:[#allocation10 + $0x120] sm:$0xff] }
 0x8c6   :  { %7337 = vmatprep.subr.bf16.mxu0 %v7336_v47  ;;  %7369 = vmatprep.subr.bf16.mxu1 %v7368_v25  ;;  %v9262_v42 = vpack.c.bf16 %v2968_v24, %v2965_v8  ;;  %v9268_v47 = vpack.c.bf16 %v2974_v12, %v2971_v56  ;;  %v701_v8 = vrot.slane %v9146_v43, %v8993_v62 }
 0x8c7   :  { %v1509_v24 = vadd.f32 %v8866_v52, %v697_v7  ;;  %v705_v62 = vrot.slane %v9146_v43, %v8998_v15 }
 0x8c8   :  { %v1578_v28 = vadd.f32 %v9883_v57, %v701_v8 }
 0x8c9   :  { %7339 = vmatpush1.bf16.msra.mxu0 %v7338_v34  ;;  %7371 = vmatpush3.bf16.msra.mxu1 %v7368_v25  ;;  %v2973_v25 = vld [vmem:[#allocation10 + $0x138] sm:$0xff]  ;;  %v9275_v34 = vpack.c.bf16 %v2980_v53, %v2977_v37 }
 0x8ca   :  { %7341 = vmatprep.subr.bf16.mxu0 %v7340_v6  ;;  %7373 = vmatprep.subr.bf16.mxu1 %v7372_v61  ;;  %v9270_v38 = vpack.c.bf16 %v2973_v25, %v2970_v45  ;;  %v2976_v6 = vld [vmem:[#allocation10 + $0x150] sm:$0xff] }
 0x8cd   :  { %7343 = vmatpush1.bf16.msra.mxu0 %v7342_v29  ;;  %7375 = vmatpush3.bf16.msra.mxu1 %v7372_v61  ;;  %v2979_v61 = vld [vmem:[#allocation10 + $0x168] sm:$0xff]  ;;  %v2945_v29 = vld [vmem:[#allocation10 + $0x58] sm:$0xff] }
 0x8ce   :  { %7408 = vmatprep.subr.bf16.mxu1 %v9881_v46  ;;  %v9281_v19 = vpack.c.bf16 %v2979_v61, %v2976_v6 }
 0x8d0   :  { %3071 = vmatmul.mubr.f32.vlgmr.msra.gmra.mrb[24].mxu0 %v8894_v16  ;;  %5909 = vmatmul.mubr.f32.vlgmr.msra.gmra.mrb[24].mxu1 %v8953_v10  ;;  %v2935_v16 = vld [vmem:[#allocation10 + $0x8] sm:$0xff] }
 0x8d1   :  { %5911 = vmatprep.mubr.f32.mxu1 %v9009_v5  ;;  %3076 = vmatprep.mubr.f32.mxu0 %v9882_v35 }
 0x8d2   :  { %7410 = vmatpush3.bf16.msra.mxu1 %v9272_v27 }
 0x8d3   :  { %7411 = vmatprep.subr.bf16.mxu1 %v9881_v46 }
 0x8d4   :  { %3077 = vmatmul.mubr.f32.gmra.mrb[26].mxu0 %v8953_v10  ;;  %5912 = vmatmul.mubr.f32.gmra.mrb[26].mxu1 %v9059_v18  ;;  %v2938_v10 = vld [vmem:[#allocation10 + $0x20] sm:$0xff] }
 0x8d5   :  { %5914 = vmatprep.mubr.f32.mxu1 %v9107_v41  ;;  %3082 = vmatprep.mubr.f32.mxu0 %v9882_v35 }
 0x8d8   :  { %3083 = vmatmul.mubr.f32.gmra.mrb[28].mxu0 %v9009_v5  ;;  %5915 = vmatmul.mubr.f32.gmra.mrb[28].mxu1 %v9159_v11  ;;  %v9232_v5 = vpack.c.bf16 %v2938_v10, %v2935_v16  ;;  %v9283_v16 = vpack.c.bf16 %v2945_v29, %v2942_v20  ;;  %v2948_v10 = vld [vmem:[#allocation10 + $0x70] sm:$0xff]  ;;  %v8244_v20 = vld [vmem:[#allocation7] ss:$0 sm:$0xff] }
 0x8d9   :  { %5917 = vmatprep.mubr.f32.mxu1 %v9205_v1  ;;  %3088 = vmatprep.mubr.f32.mxu0 %v9882_v35 }
 0x8da   :  { %7377 = vmatprep.subr.bf16.mxu0 %v9232_v5  ;;  %7413 = vmatpush3.bf16.msra.mxu1 %v9283_v16 }
 0x8db   :  { %7414 = vmatprep.subr.bf16.mxu1 %v9881_v46 }
 0x8dc   :  { %3089 = vmatmul.mubr.f32.gmra.mrb[30].mxu0 %v9059_v18  ;;  %v2937_v18 = vld [vmem:[#allocation10 + $0x18] sm:$0xff] }
 0x8dd   :  { %3094 = vmatprep.mubr.f32.mxu0 %v9882_v35  ;;  %v9234_v39 = vpack.c.bf16 %v2937_v18, %v2934_v30  ;;  %v2951_v30 = vld [vmem:[#allocation10 + $0x88] sm:$0xff]  ;;  %v2954_v18 = vld [vmem:[#allocation10 + $0xa0] sm:$0xff] }
 0x8df   :  { %7379 = vmatpush1.bf16.msra.mxu0 %v9234_v39 }
 0x8e0   :  { %3095 = vmatmul.mubr.f32.gmra.mrb[32].mxu0 %v9107_v41  ;;  %v2941_v41 = vld [vmem:[#allocation10 + $0x38] sm:$0xff] }
 0x8e1   :  { %3100 = vmatprep.mubr.f32.mxu0 %v9882_v35 }
 0x8e4   :  { %3101 = vmatmul.mubr.f32.gmra.mrb[34].mxu0 %v9159_v11  ;;  %v2944_v11 = vld [vmem:[#allocation10 + $0x50] sm:$0xff] }
 0x8e5   :  { %3106 = vmatprep.mubr.f32.mxu0 %v9882_v35  ;;  %v9238_v44 = vpack.c.bf16 %v2944_v11, %v2941_v41  ;;  %v9289_v41 = vpack.c.bf16 %v2951_v30, %v2948_v10  ;;  %v2957_v11 = vld [vmem:[#allocation10 + $0xb8] sm:$0xff]  ;;  %v9884_v30 = vld [vmem:[#allocation25_spill] sm:$0xff] }
 0x8e6   :  { %v9292_v49 = vpack.c.bf16 %v2957_v11, %v2954_v18  ;;  %v1580_v18 = vadd.f32 %v9884_v30, %v705_v62 }
 0x8e7   :  { %7381 = vmatprep.subr.bf16.mxu0 %v9238_v44  ;;  %7416 = vmatpush3.bf16.msra.mxu1 %v9289_v41 }
 0x8e8   :  { %3107 = vmatmul.mubr.f32.gmra.mrb[36].mxu0 %v9205_v1  ;;  %7417 = vmatprep.subr.bf16.mxu1 %v9881_v46 }
 0x8e9   :  { %3112 = vmatprep.mubr.f32.mxu0 %v9882_v35  ;;  %7383 = vmatpush1.bf16.msra.mxu0 %v9240_v54 }
 0x8ea   :  { %7385 = vmatprep.subr.bf16.mxu0 %v9244_v59 }
 0x8eb   :  { %7419 = vmatpush3.bf16.msra.mxu1 %v9292_v49 }
 0x8ec   :  { %7420 = vmatprep.subr.bf16.mxu1 %v9881_v46 }
 0x8ed   :  { %7387 = vmatpush1.bf16.msra.mxu0 %v9246_v4 }
 0x8ee   :  { %7389 = vmatprep.subr.bf16.mxu0 %v9250_v14 }
 0x8ef   :  { %7422 = vmatpush3.bf16.msra.mxu1 %v9296_v58 }
 0x8f0   :  { %7423 = vmatprep.subr.bf16.mxu1 %v9881_v46 }
 0x8f1   :  { %7391 = vmatpush1.bf16.msra.mxu0 %v9252_v23 }
 0x8f2   :  { %7393 = vmatprep.subr.bf16.mxu0 %v9256_v48 }
 0x8f3   :  { %7425 = vmatpush3.bf16.msra.mxu1 %v9300_v9 }
 0x8f4   :  { %7426 = vmatprep.subr.bf16.mxu1 %v9881_v46 }
 0x8f5   :  { %7395 = vmatpush1.bf16.msra.mxu0 %v9258_v33 }
 0x8f6   :  { %7397 = vmatprep.subr.bf16.mxu0 %v9262_v42 }
 0x8f7   :  { %7428 = vmatpush3.bf16.msra.mxu1 %v9304_v22 }
 0x8f8   :  { %7429 = vmatprep.subr.bf16.mxu1 %v9881_v46 }
 0x8f9   :  { %7399 = vmatpush1.bf16.msra.mxu0 %v9264_v55 }
 0x8fa   :  { %7401 = vmatprep.subr.bf16.mxu0 %v9268_v47 }
 0x8fb   :  { %7431 = vmatpush3.bf16.msra.mxu1 %v9308_v32 }
 0x8fc   :  { %7464 = vmatprep.subr.bf16.mxu1 %v9881_v46 }
 0x8fd   :  { %7403 = vmatpush1.bf16.msra.mxu0 %v9270_v38 }
 0x8fe   :  { %7405 = vmatprep.subr.bf16.mxu0 %v9275_v34 }
 0x901   :  { %7407 = vmatpush1.bf16.msra.mxu0 %v9281_v19 }
 0x902   :  { %7433 = vmatprep.subr.bf16.mxu0 %v9232_v5 }
 0x983   :  { %v2789_v56 = vpop.f32.mrb[22].mxu0  ;;  %v2860_v12 = vpop.f32.mrb[22].mxu1 }
 0x984   :  { %v2864_v45 = vadd.f32 %v2789_v56, %v1509_v24  ;;  %v2791_v25 = vpop.f32.mrb[23].mxu0  ;;  %v5875_v51 = vpop.f32.mrb[23].mxu1  ;;  %v2878_v29 = vadd.f32 %v8244_v20, %v2860_v12 }
 0x985   :  { %v2871_v2 = vadd.f32 %v2791_v25, %v1578_v28 }
 0x986   :  { %v5144_v37 = vmul.f32 -1.442695, %v2864_v45 }
 0x987   :  { %v5145_v53 = vmul.f32 -1.442695, %v2871_v2 }
 0x988   :  { %8153 = vpow2.f32 %v5144_v37 }
 0x989   :  { %8155 = vpow2.f32 %v5145_v53 }
 0x992   :  { %v8154_v6 = vpop.eup %8153 }
 0x993   :  { %v2868_v61 = vadd.f32 1.0, %v8154_v6  ;;  %v8156_v0 = vpop.eup %8155 }
 0x994   :  { %v2875_v52 = vadd.f32 1.0, %v8156_v0 }
 0x995   :  { %8157 = vrcp.f32 %v2868_v61 }
 0x996   :  { %8159 = vrcp.f32 %v2875_v52  ;;  %v9387_v52 = vld [vmem:[#allocation13] ss:$0 sm:$0xff] }
 0x99f   :  { %v8158_v10 = vpop.eup %8157 }
 0x9a0   :  { %v2879_v11 = vmul.f32 %v8158_v10, %v2878_v29  ;;  %v8160_v17 = vpop.eup %8159 }
 0x9a1   :  { %v2882_v26 = vsub.f32 1.0, %v8160_v17  ;;  %v2884_v8 = vmul.f32 %v8160_v17, %v9205_v1  ;;  %v2982_v1 = vld [vmem:[#allocation12] sm:$0x7] }
 0x9a2   :  { %v2880_v50 = vadd.f32 %v2879_v11, %v1580_v18  ;;  %v9378_v28 = vrot.slane %v2982_v1, %v8875_v60  ;;  %v9383_v12 = vrot.slane %v2982_v1, %v8882_v36  ;;  %v9390_v36 = vrot.slane %v2982_v1, %v8887_v21 }
 0x9a3   :  { %v9322_v40 = vpop.f32.mrb[24].mxu1 }
 0x9a4   :  { %8161 = vtanh.f32 %v2880_v50  ;;  %v9324_v63 = vpop.f32.mrb[25].mxu1 }
 0x9a5   :  { %v3186_v30 = vadd.f32 %v9324_v63, %v9390_v36 }
 0x9a7   :  { %v9326_v3 = vpop.f32.mrb[26].mxu1 }
 0x9a8   :  { %v9328_v13 = vpop.f32.mrb[27].mxu1 }
 0x9ab   :  { %v9330_v15 = vpop.f32.mrb[28].mxu1 }
 0x9ac   :  { %v9332_v43 = vpop.f32.mrb[29].mxu1 }
 0x9ae   :  { %v8162_v31 = vpop.eup %8161 }
 0x9af   :  { %v2883_v7 = vmul.f32 %v8162_v31, %v2882_v26 }
 0x9b1   :  { %v2885_v24 = vadd.f32 %v2884_v8, %v2883_v7 }
 0x9b3   :  { %3113 = vmatmul.mubr.f32.gmra.mrb[38].mxu0 %v2885_v24  ;;  %5918 = vmatmul.mubr.f32.gmra.mrb[30].mxu1 %v2885_v24 }
 0x9b4   :  { %3288 = vmatprep.mubr.f32.mxu0 %v9882_v35  ;;  %5952 = vmatprep.mubr.msk.f32.mxu1 %vm8496_vm0, %v9882_v35 }
 0x9b7   :  { %3289 = vmatmul.mubr.f32.vlgmr.msra.gmra.mrb[24].mxu0 %v9882_v35  ;;  %5953 = vmatmul.mubr.f32.vlgmr.msra.gmra.mrb[32].mxu1 %v9882_v35 }
 0x9b8   :  { %7435 = vmatpush1.bf16.msra.mxu0 %v9234_v39  ;;  %7466 = vmatpush3.bf16.msra.mxu1 %v9272_v27 }
 0x9b9   :  { %7437 = vmatprep.subr.bf16.mxu0 %v9238_v44  ;;  %7467 = vmatprep.subr.bf16.mxu1 %v9881_v46 }
 0x9ba   :  { %3451 = vmatprep.mubr.f32.mxu0 %v9882_v35  ;;  %5987 = vmatprep.mubr.msk.f32.mxu1 %vm8496_vm0, %v9882_v35 }
 0x9bc   :  { %7439 = vmatpush1.bf16.msra.mxu0 %v9240_v54  ;;  %7469 = vmatpush3.bf16.msra.mxu1 %v9283_v16 }
 0x9bd   :  { %7441 = vmatprep.subr.bf16.mxu0 %v9244_v59  ;;  %7470 = vmatprep.subr.bf16.mxu1 %v9881_v46 }
 0x9c0   :  { %7443 = vmatpush1.bf16.msra.mxu0 %v9246_v4  ;;  %7472 = vmatpush3.bf16.msra.mxu1 %v9289_v41 }
 0x9c1   :  { %7445 = vmatprep.subr.bf16.mxu0 %v9250_v14  ;;  %7473 = vmatprep.subr.bf16.mxu1 %v9881_v46 }
 0x9c4   :  { %7447 = vmatpush1.bf16.msra.mxu0 %v9252_v23  ;;  %7475 = vmatpush3.bf16.msra.mxu1 %v9292_v49 }
 0x9c5   :  { %7449 = vmatprep.subr.bf16.mxu0 %v9256_v48  ;;  %7476 = vmatprep.subr.bf16.mxu1 %v9881_v46 }
 0x9c8   :  { %7451 = vmatpush1.bf16.msra.mxu0 %v9258_v33  ;;  %7478 = vmatpush3.bf16.msra.mxu1 %v9296_v58 }
 0x9c9   :  { %7453 = vmatprep.subr.bf16.mxu0 %v9262_v42  ;;  %7479 = vmatprep.subr.bf16.mxu1 %v9881_v46 }
 0x9cc   :  { %7455 = vmatpush1.bf16.msra.mxu0 %v9264_v55  ;;  %7481 = vmatpush3.bf16.msra.mxu1 %v9300_v9 }
 0x9cd   :  { %7457 = vmatprep.subr.bf16.mxu0 %v9268_v47  ;;  %7482 = vmatprep.subr.bf16.mxu1 %v9881_v46 }
 0x9d0   :  { %7459 = vmatpush1.bf16.msra.mxu0 %v9270_v38  ;;  %7484 = vmatpush3.bf16.msra.mxu1 %v9304_v22 }
 0x9d1   :  { %7461 = vmatprep.subr.bf16.mxu0 %v9275_v34  ;;  %7485 = vmatprep.subr.bf16.mxu1 %v9881_v46 }
 0x9d4   :  { %7463 = vmatpush1.bf16.msra.mxu0 %v9281_v19  ;;  %7487 = vmatpush3.bf16.msra.mxu1 %v9308_v32 }
 0x9d5   :  { %7489 = vmatprep.subr.bf16.mxu0 %v9232_v5  ;;  %7520 = vmatprep.subr.bf16.mxu1 %v9881_v46 }
 0xa86   :  { %v9375_v57 = vpop.f32.mrb[30].mxu1 }
 0xa87   :  { %v9380_v56 = vpop.f32.mrb[31].mxu1 }
 0xa8a   :  { %v3290_v45 = vpop.f32.mrb[24].mxu0  ;;  %v3361_v25 = vpop.f32.mrb[32].mxu1 }
 0xa8b   :  { %v8024_v51 = vadd.f32 %v3290_v45, %v9378_v28  ;;  %v3292_v2 = vpop.f32.mrb[25].mxu0  ;;  %v5954_v37 = vpop.f32.mrb[33].mxu1  ;;  %v3379_v29 = vadd.f32 %v9387_v52, %v3361_v25 }
 0xa8c   :  { %v8025_v6 = vadd.f32 %v3292_v2, %v9383_v12 }
 0xa8d   :  { %v5147_v53 = vmul.f32 -1.442695, %v8024_v51 }
 0xa8e   :  { %v5148_v61 = vmul.f32 -1.442695, %v8025_v6 }
 0xa8f   :  { %8163 = vpow2.f32 %v5147_v53 }
 0xa90   :  { %8165 = vpow2.f32 %v5148_v61 }
 0xa99   :  { %v8164_v0 = vpop.eup %8163 }
 0xa9a   :  { %v3369_v60 = vadd.f32 1.0, %v8164_v0  ;;  %v8166_v62 = vpop.eup %8165 }
 0xa9b   :  { %v3376_v20 = vadd.f32 1.0, %v8166_v62  ;;  %v3191_v62 = vadd.f32 %v9322_v40, %v9390_v36 }
 0xa9c   :  { %8167 = vrcp.f32 %v3369_v60 }
 0xa9d   :  { %8169 = vrcp.f32 %v3376_v20 }
 0xaa6   :  { %v8168_v10 = vpop.eup %8167 }
 0xaa7   :  { %v3380_v18 = vmul.f32 %v8168_v10, %v3379_v29  ;;  %v8170_v50 = vpop.eup %8169 }
 0xaa8   :  { %v3383_v17 = vsub.f32 1.0, %v8170_v50  ;;  %v3385_v7 = vmul.f32 0.0, %v8170_v50 }
 0xaa9   :  { %v3381_v11 = vadd.f32 %v3380_v18, %v3186_v30 }
 0xaab   :  { %8171 = vtanh.f32 %v3381_v11 }
 0xab5   :  { %v8172_v26 = vpop.eup %8171 }
 0xab6   :  { %v3384_v31 = vmul.f32 %v8172_v26, %v3383_v17 }
 0xab8   :  { %v9395_v8 = vadd.f32 %v3385_v7, %v3384_v31 }
 0xaba   :  { %3452 = vmatmul.mubr.f32.vlgmr.msra.gmra.mrb[26].mxu0 %v9395_v8  ;;  %5988 = vmatmul.mubr.f32.vlgmr.msra.gmra.mrb[34].mxu1 %v9395_v8 }
 0xabb   :  { %7491 = vmatpush1.bf16.msra.mxu0 %v9234_v39  ;;  %7522 = vmatpush3.bf16.msra.mxu1 %v9272_v27 }
 0xabc   :  { %7493 = vmatprep.subr.bf16.mxu0 %v9238_v44  ;;  %7523 = vmatprep.subr.bf16.mxu1 %v9881_v46 }
 0xabd   :  { %3614 = vmatprep.mubr.f32.mxu0 %v9882_v35  ;;  %6022 = vmatprep.mubr.msk.f32.mxu1 %vm8496_vm0, %v9882_v35 }
 0xabf   :  { %7495 = vmatpush1.bf16.msra.mxu0 %v9240_v54  ;;  %7525 = vmatpush3.bf16.msra.mxu1 %v9283_v16 }
 0xac0   :  { %7497 = vmatprep.subr.bf16.mxu0 %v9244_v59  ;;  %7526 = vmatprep.subr.bf16.mxu1 %v9881_v46 }
 0xac3   :  { %7499 = vmatpush1.bf16.msra.mxu0 %v9246_v4  ;;  %7528 = vmatpush3.bf16.msra.mxu1 %v9289_v41 }
 0xac4   :  { %7501 = vmatprep.subr.bf16.mxu0 %v9250_v14  ;;  %7529 = vmatprep.subr.bf16.mxu1 %v9881_v46 }
 0xac7   :  { %7503 = vmatpush1.bf16.msra.mxu0 %v9252_v23  ;;  %7531 = vmatpush3.bf16.msra.mxu1 %v9292_v49 }
 0xac8   :  { %7505 = vmatprep.subr.bf16.mxu0 %v9256_v48  ;;  %7532 = vmatprep.subr.bf16.mxu1 %v9881_v46 }
 0xacb   :  { %7507 = vmatpush1.bf16.msra.mxu0 %v9258_v33  ;;  %7534 = vmatpush3.bf16.msra.mxu1 %v9296_v58 }
 0xacc   :  { %7509 = vmatprep.subr.bf16.mxu0 %v9262_v42  ;;  %7535 = vmatprep.subr.bf16.mxu1 %v9881_v46 }
 0xacf   :  { %7511 = vmatpush1.bf16.msra.mxu0 %v9264_v55  ;;  %7537 = vmatpush3.bf16.msra.mxu1 %v9300_v9 }
 0xad0   :  { %7513 = vmatprep.subr.bf16.mxu0 %v9268_v47  ;;  %7538 = vmatprep.subr.bf16.mxu1 %v9881_v46 }
 0xad3   :  { %7515 = vmatpush1.bf16.msra.mxu0 %v9270_v38  ;;  %7540 = vmatpush3.bf16.msra.mxu1 %v9304_v22 }
 0xad4   :  { %7517 = vmatprep.subr.bf16.mxu0 %v9275_v34  ;;  %7541 = vmatprep.subr.bf16.mxu1 %v9881_v46 }
 0xad7   :  { %7519 = vmatpush1.bf16.msra.mxu0 %v9281_v19  ;;  %7543 = vmatpush3.bf16.msra.mxu1 %v9308_v32 }
 0xad8   :  { %7545 = vmatprep.subr.bf16.mxu0 %v9232_v5  ;;  %7576 = vmatprep.subr.bf16.mxu1 %v9881_v46 }
 0xb8d   :  { %v3453_v21 = vpop.f32.mrb[26].mxu0  ;;  %v3524_v63 = vpop.f32.mrb[34].mxu1 }
 0xb8e   :  { %v8026_v24 = vadd.f32 %v3453_v21, %v9378_v28  ;;  %v3455_v1 = vpop.f32.mrb[27].mxu0  ;;  %v5989_v45 = vpop.f32.mrb[35].mxu1  ;;  %v3542_v0 = vadd.f32 %v9387_v52, %v3524_v63 }
 0xb8f   :  { %v8027_v51 = vadd.f32 %v3455_v1, %v9383_v12 }
 0xb90   :  { %v5149_v25 = vmul.f32 -1.442695, %v8026_v24 }
 0xb91   :  { %v5150_v2 = vmul.f32 -1.442695, %v8027_v51 }
 0xb92   :  { %8173 = vpow2.f32 %v5149_v25 }
 0xb93   :  { %8175 = vpow2.f32 %v5150_v2 }
 0xb9c   :  { %v8174_v37 = vpop.eup %8173 }
 0xb9d   :  { %v3532_v53 = vadd.f32 1.0, %v8174_v37  ;;  %v8176_v6 = vpop.eup %8175 }
 0xb9e   :  { %v3539_v61 = vadd.f32 1.0, %v8176_v6  ;;  %v3196_v6 = vadd.f32 %v9328_v13, %v9390_v36 }
 0xb9f   :  { %8177 = vrcp.f32 %v3532_v53 }
 0xba0   :  { %8179 = vrcp.f32 %v3539_v61 }
 0xba9   :  { %v8178_v60 = vpop.eup %8177 }
 0xbaa   :  { %v3543_v20 = vmul.f32 %v8178_v60, %v3542_v0  ;;  %v8180_v10 = vpop.eup %8179 }
 0xbab   :  { %v3546_v30 = vsub.f32 1.0, %v8180_v10  ;;  %v3548_v50 = vmul.f32 %v8180_v10, %v9395_v8 }
 0xbac   :  { %v3544_v29 = vadd.f32 %v3543_v20, %v3191_v62 }
 0xbae   :  { %8181 = vtanh.f32 %v3544_v29 }
 0xbb8   :  { %v8182_v18 = vpop.eup %8181 }
 0xbb9   :  { %v3547_v11 = vmul.f32 %v8182_v18, %v3546_v30 }
 0xbbb   :  { %v9440_v17 = vadd.f32 %v3548_v50, %v3547_v11 }
 0xbbd   :  { %3615 = vmatmul.mubr.f32.vlgmr.msra.gmra.mrb[28].mxu0 %v9440_v17  ;;  %6023 = vmatmul.mubr.f32.vlgmr.msra.gmra.mrb[36].mxu1 %v9440_v17 }
 0xbbe   :  { %7547 = vmatpush1.bf16.msra.mxu0 %v9234_v39  ;;  %7578 = vmatpush3.bf16.msra.mxu1 %v9272_v27 }
 0xbbf   :  { %7549 = vmatprep.subr.bf16.mxu0 %v9238_v44  ;;  %7579 = vmatprep.subr.bf16.mxu1 %v9881_v46 }
 0xbc0   :  { %3777 = vmatprep.mubr.f32.mxu0 %v9882_v35  ;;  %6057 = vmatprep.mubr.msk.f32.mxu1 %vm8496_vm0, %v9882_v35 }
 0xbc2   :  { %7551 = vmatpush1.bf16.msra.mxu0 %v9240_v54  ;;  %7581 = vmatpush3.bf16.msra.mxu1 %v9283_v16 }
 0xbc3   :  { %7553 = vmatprep.subr.bf16.mxu0 %v9244_v59  ;;  %7582 = vmatprep.subr.bf16.mxu1 %v9881_v46 }
 0xbc6   :  { %7555 = vmatpush1.bf16.msra.mxu0 %v9246_v4  ;;  %7584 = vmatpush3.bf16.msra.mxu1 %v9289_v41 }
 0xbc7   :  { %7557 = vmatprep.subr.bf16.mxu0 %v9250_v14  ;;  %7585 = vmatprep.subr.bf16.mxu1 %v9881_v46 }
 0xbca   :  { %7559 = vmatpush1.bf16.msra.mxu0 %v9252_v23  ;;  %7587 = vmatpush3.bf16.msra.mxu1 %v9292_v49 }
 0xbcb   :  { %7561 = vmatprep.subr.bf16.mxu0 %v9256_v48  ;;  %7588 = vmatprep.subr.bf16.mxu1 %v9881_v46 }
 0xbce   :  { %7563 = vmatpush1.bf16.msra.mxu0 %v9258_v33  ;;  %7590 = vmatpush3.bf16.msra.mxu1 %v9296_v58 }
 0xbcf   :  { %7565 = vmatprep.subr.bf16.mxu0 %v9262_v42  ;;  %7591 = vmatprep.subr.bf16.mxu1 %v9881_v46 }
 0xbd2   :  { %7567 = vmatpush1.bf16.msra.mxu0 %v9264_v55  ;;  %7593 = vmatpush3.bf16.msra.mxu1 %v9300_v9 }
 0xbd3   :  { %7569 = vmatprep.subr.bf16.mxu0 %v9268_v47  ;;  %7594 = vmatprep.subr.bf16.mxu1 %v9881_v46 }
 0xbd6   :  { %7571 = vmatpush1.bf16.msra.mxu0 %v9270_v38  ;;  %7596 = vmatpush3.bf16.msra.mxu1 %v9304_v22 }
 0xbd7   :  { %7573 = vmatprep.subr.bf16.mxu0 %v9275_v34  ;;  %7597 = vmatprep.subr.bf16.mxu1 %v9881_v46 }
 0xbda   :  { %7575 = vmatpush1.bf16.msra.mxu0 %v9281_v19  ;;  %7599 = vmatpush3.bf16.msra.mxu1 %v9308_v32 }
 0xbdb   :  { %7601 = vmatprep.subr.bf16.mxu0 %v9232_v5  ;;  %7632 = vmatprep.subr.bf16.mxu1 %v9881_v46 }
 0xc90   :  { %v3616_v40 = vpop.f32.mrb[28].mxu0  ;;  %v3687_v26 = vpop.f32.mrb[36].mxu1 }
 0xc91   :  { %v8028_v31 = vadd.f32 %v3616_v40, %v9378_v28  ;;  %v3618_v7 = vpop.f32.mrb[29].mxu0  ;;  %v6024_v21 = vpop.f32.mrb[37].mxu1  ;;  %v3705_v37 = vadd.f32 %v9387_v52, %v3687_v26 }
 0xc92   :  { %v8029_v24 = vadd.f32 %v3618_v7, %v9383_v12 }
 0xc93   :  { %v5151_v63 = vmul.f32 -1.442695, %v8028_v31 }
 0xc94   :  { %v5152_v1 = vmul.f32 -1.442695, %v8029_v24 }
 0xc95   :  { %8183 = vpow2.f32 %v5151_v63 }
 0xc96   :  { %8185 = vpow2.f32 %v5152_v1 }
 0xc9f   :  { %v8184_v45 = vpop.eup %8183 }
 0xca0   :  { %v3695_v25 = vadd.f32 1.0, %v8184_v45  ;;  %v8186_v51 = vpop.eup %8185 }
 0xca1   :  { %v3702_v2 = vadd.f32 1.0, %v8186_v51  ;;  %v3201_v51 = vadd.f32 %v9326_v3, %v9390_v36 }
 0xca2   :  { %8187 = vrcp.f32 %v3695_v25 }
 0xca3   :  { %8189 = vrcp.f32 %v3702_v2 }
 0xcac   :  { %v8188_v53 = vpop.eup %8187 }
 0xcad   :  { %v3706_v61 = vmul.f32 %v8188_v53, %v3705_v37  ;;  %v8190_v60 = vpop.eup %8189 }
 0xcae   :  { %v3709_v62 = vsub.f32 1.0, %v8190_v60  ;;  %v3711_v10 = vmul.f32 %v8190_v60, %v9440_v17 }
 0xcaf   :  { %v3707_v0 = vadd.f32 %v3706_v61, %v3196_v6 }
 0xcb1   :  { %8191 = vtanh.f32 %v3707_v0 }
 0xcbb   :  { %v8192_v20 = vpop.eup %8191 }
 0xcbc   :  { %v3710_v29 = vmul.f32 %v8192_v20, %v3709_v62 }
 0xcbe   :  { %v9485_v30 = vadd.f32 %v3711_v10, %v3710_v29 }
 0xcc0   :  { %3778 = vmatmul.mubr.f32.vlgmr.msra.gmra.mrb[30].mxu0 %v9485_v30  ;;  %6058 = vmatmul.mubr.f32.vlgmr.msra.gmra.mrb[38].mxu1 %v9485_v30 }
 0xcc1   :  { %7603 = vmatpush1.bf16.msra.mxu0 %v9234_v39  ;;  %7634 = vmatpush3.bf16.msra.mxu1 %v9272_v27 }
 0xcc2   :  { %7605 = vmatprep.subr.bf16.mxu0 %v9238_v44  ;;  %7635 = vmatprep.subr.bf16.mxu1 %v9881_v46 }
 0xcc3   :  { %3940 = vmatprep.mubr.f32.mxu0 %v9882_v35  ;;  %6092 = vmatprep.mubr.msk.f32.mxu1 %vm8496_vm0, %v9882_v35 }
 0xcc5   :  { %7607 = vmatpush1.bf16.msra.mxu0 %v9240_v54  ;;  %7637 = vmatpush3.bf16.msra.mxu1 %v9283_v16 }
 0xcc6   :  { %7609 = vmatprep.subr.bf16.mxu0 %v9244_v59  ;;  %7638 = vmatprep.subr.bf16.mxu1 %v9881_v46 }
 0xcc9   :  { %7611 = vmatpush1.bf16.msra.mxu0 %v9246_v4  ;;  %7640 = vmatpush3.bf16.msra.mxu1 %v9289_v41 }
 0xcca   :  { %7613 = vmatprep.subr.bf16.mxu0 %v9250_v14  ;;  %7641 = vmatprep.subr.bf16.mxu1 %v9881_v46 }
 0xccd   :  { %7615 = vmatpush1.bf16.msra.mxu0 %v9252_v23  ;;  %7643 = vmatpush3.bf16.msra.mxu1 %v9292_v49 }
 0xcce   :  { %7617 = vmatprep.subr.bf16.mxu0 %v9256_v48  ;;  %7644 = vmatprep.subr.bf16.mxu1 %v9881_v46 }
 0xcd1   :  { %7619 = vmatpush1.bf16.msra.mxu0 %v9258_v33  ;;  %7646 = vmatpush3.bf16.msra.mxu1 %v9296_v58 }
 0xcd2   :  { %7621 = vmatprep.subr.bf16.mxu0 %v9262_v42  ;;  %7647 = vmatprep.subr.bf16.mxu1 %v9881_v46 }
 0xcd5   :  { %7623 = vmatpush1.bf16.msra.mxu0 %v9264_v55  ;;  %7649 = vmatpush3.bf16.msra.mxu1 %v9300_v9 }
 0xcd6   :  { %7625 = vmatprep.subr.bf16.mxu0 %v9268_v47  ;;  %7650 = vmatprep.subr.bf16.mxu1 %v9881_v46 }
 0xcd9   :  { %7627 = vmatpush1.bf16.msra.mxu0 %v9270_v38  ;;  %7652 = vmatpush3.bf16.msra.mxu1 %v9304_v22 }
 0xcda   :  { %7629 = vmatprep.subr.bf16.mxu0 %v9275_v34  ;;  %7653 = vmatprep.subr.bf16.mxu1 %v9881_v46 }
 0xcdd   :  { %7631 = vmatpush1.bf16.msra.mxu0 %v9281_v19  ;;  %7655 = vmatpush3.bf16.msra.mxu1 %v9308_v32 }
 0xcde   :  { %7657 = vmatprep.subr.bf16.mxu0 %v9232_v5  ;;  %7688 = vmatprep.subr.bf16.mxu1 %v9881_v46 }
 0xd93   :  { %v3779_v13 = vpop.f32.mrb[30].mxu0  ;;  %v3850_v18 = vpop.f32.mrb[38].mxu1 }
 0xd94   :  { %v8030_v11 = vadd.f32 %v3779_v13, %v9378_v28  ;;  %v3781_v50 = vpop.f32.mrb[31].mxu0  ;;  %v6059_v40 = vpop.f32.mrb[39].mxu1  ;;  %v3868_v45 = vadd.f32 %v9387_v52, %v3850_v18 }
 0xd95   :  { %v8031_v31 = vadd.f32 %v3781_v50, %v9383_v12 }
 0xd96   :  { %v5153_v26 = vmul.f32 -1.442695, %v8030_v11 }
 0xd97   :  { %v5154_v7 = vmul.f32 -1.442695, %v8031_v31 }
 0xd98   :  { %8193 = vpow2.f32 %v5153_v26 }
 0xd99   :  { %8195 = vpow2.f32 %v5154_v7 }
 0xda2   :  { %v8194_v21 = vpop.eup %8193 }
 0xda3   :  { %v3858_v63 = vadd.f32 1.0, %v8194_v21  ;;  %v8196_v24 = vpop.eup %8195 }
 0xda4   :  { %v3865_v1 = vadd.f32 1.0, %v8196_v24  ;;  %v3206_v24 = vadd.f32 %v9332_v43, %v9390_v36 }
 0xda5   :  { %8197 = vrcp.f32 %v3858_v63 }
 0xda6   :  { %8199 = vrcp.f32 %v3865_v1 }
 0xdaf   :  { %v8198_v25 = vpop.eup %8197 }
 0xdb0   :  { %v3869_v2 = vmul.f32 %v8198_v25, %v3868_v45  ;;  %v8200_v53 = vpop.eup %8199 }
 0xdb1   :  { %v3872_v6 = vsub.f32 1.0, %v8200_v53  ;;  %v3874_v60 = vmul.f32 %v8200_v53, %v9485_v30 }
 0xdb2   :  { %v3870_v37 = vadd.f32 %v3869_v2, %v3201_v51 }
 0xdb4   :  { %8201 = vtanh.f32 %v3870_v37 }
 0xdbe   :  { %v8202_v61 = vpop.eup %8201 }
 0xdbf   :  { %v3873_v0 = vmul.f32 %v8202_v61, %v3872_v6 }
 0xdc1   :  { %v9530_v62 = vadd.f32 %v3874_v60, %v3873_v0 }
 0xdc3   :  { %3941 = vmatmul.mubr.f32.vlgmr.msra.gmra.mrb[32].mxu0 %v9530_v62  ;;  %6093 = vmatmul.mubr.f32.vlgmr.msra.gmra.mrb[40].mxu1 %v9530_v62 }
 0xdc4   :  { %7659 = vmatpush1.bf16.msra.mxu0 %v9234_v39  ;;  %7690 = vmatpush3.bf16.msra.mxu1 %v9272_v27 }
 0xdc5   :  { %7661 = vmatprep.subr.bf16.mxu0 %v9238_v44  ;;  %7691 = vmatprep.subr.bf16.mxu1 %v9881_v46 }
 0xdc6   :  { %4103 = vmatprep.mubr.f32.mxu0 %v9882_v35  ;;  %6127 = vmatprep.mubr.msk.f32.mxu1 %vm8496_vm0, %v9882_v35 }
 0xdc8   :  { %7663 = vmatpush1.bf16.msra.mxu0 %v9240_v54  ;;  %7693 = vmatpush3.bf16.msra.mxu1 %v9283_v16 }
 0xdc9   :  { %7665 = vmatprep.subr.bf16.mxu0 %v9244_v59  ;;  %7694 = vmatprep.subr.bf16.mxu1 %v9881_v46 }
 0xdcc   :  { %7667 = vmatpush1.bf16.msra.mxu0 %v9246_v4  ;;  %7696 = vmatpush3.bf16.msra.mxu1 %v9289_v41 }
 0xdcd   :  { %7669 = vmatprep.subr.bf16.mxu0 %v9250_v14  ;;  %7697 = vmatprep.subr.bf16.mxu1 %v9881_v46 }
 0xdd0   :  { %7671 = vmatpush1.bf16.msra.mxu0 %v9252_v23  ;;  %7699 = vmatpush3.bf16.msra.mxu1 %v9292_v49 }
 0xdd1   :  { %7673 = vmatprep.subr.bf16.mxu0 %v9256_v48  ;;  %7700 = vmatprep.subr.bf16.mxu1 %v9881_v46 }
 0xdd4   :  { %7675 = vmatpush1.bf16.msra.mxu0 %v9258_v33  ;;  %7702 = vmatpush3.bf16.msra.mxu1 %v9296_v58 }
 0xdd5   :  { %7677 = vmatprep.subr.bf16.mxu0 %v9262_v42  ;;  %7703 = vmatprep.subr.bf16.mxu1 %v9881_v46 }
 0xdd8   :  { %7679 = vmatpush1.bf16.msra.mxu0 %v9264_v55  ;;  %7705 = vmatpush3.bf16.msra.mxu1 %v9300_v9 }
 0xdd9   :  { %7681 = vmatprep.subr.bf16.mxu0 %v9268_v47  ;;  %7706 = vmatprep.subr.bf16.mxu1 %v9881_v46 }
 0xddc   :  { %7683 = vmatpush1.bf16.msra.mxu0 %v9270_v38  ;;  %7708 = vmatpush3.bf16.msra.mxu1 %v9304_v22 }
 0xddd   :  { %7685 = vmatprep.subr.bf16.mxu0 %v9275_v34  ;;  %7709 = vmatprep.subr.bf16.mxu1 %v9881_v46 }
 0xde0   :  { %7687 = vmatpush1.bf16.msra.mxu0 %v9281_v19  ;;  %7711 = vmatpush3.bf16.msra.mxu1 %v9308_v32 }
 0xde1   :  { %7713 = vmatprep.subr.bf16.mxu0 %v9232_v5  ;;  %7744 = vmatprep.subr.bf16.mxu1 %v9881_v46 }
 0xe96   :  { %v3942_v3 = vpop.f32.mrb[32].mxu0  ;;  %v4013_v20 = vpop.f32.mrb[40].mxu1 }
 0xe97   :  { %v8032_v29 = vadd.f32 %v3942_v3, %v9378_v28  ;;  %v3944_v10 = vpop.f32.mrb[33].mxu0  ;;  %v6094_v13 = vpop.f32.mrb[41].mxu1  ;;  %v4031_v21 = vadd.f32 %v9387_v52, %v4013_v20 }
 0xe98   :  { %v8033_v11 = vadd.f32 %v3944_v10, %v9383_v12 }
 0xe99   :  { %v5155_v18 = vmul.f32 -1.442695, %v8032_v29 }
 0xe9a   :  { %v5156_v50 = vmul.f32 -1.442695, %v8033_v11 }
 0xe9b   :  { %8203 = vpow2.f32 %v5155_v18 }
 0xe9c   :  { %8205 = vpow2.f32 %v5156_v50 }
 0xea5   :  { %v8204_v40 = vpop.eup %8203 }
 0xea6   :  { %v4021_v26 = vadd.f32 1.0, %v8204_v40  ;;  %v8206_v31 = vpop.eup %8205 }
 0xea7   :  { %v4028_v7 = vadd.f32 1.0, %v8206_v31 }
 0xea8   :  { %8207 = vrcp.f32 %v4021_v26  ;;  %v3211_v26 = vadd.f32 %v9330_v15, %v9390_v36 }
 0xea9   :  { %8209 = vrcp.f32 %v4028_v7 }
 0xeb2   :  { %v8208_v63 = vpop.eup %8207 }
 0xeb3   :  { %v4032_v1 = vmul.f32 %v8208_v63, %v4031_v21  ;;  %v8210_v25 = vpop.eup %8209 }
 0xeb4   :  { %v4035_v51 = vsub.f32 1.0, %v8210_v25  ;;  %v4037_v53 = vmul.f32 %v8210_v25, %v9530_v62 }
 0xeb5   :  { %v4033_v45 = vadd.f32 %v4032_v1, %v3206_v24 }
 0xeb7   :  { %8211 = vtanh.f32 %v4033_v45 }
 0xec1   :  { %v8212_v2 = vpop.eup %8211 }
 0xec2   :  { %v4036_v37 = vmul.f32 %v8212_v2, %v4035_v51 }
 0xec4   :  { %v9575_v6 = vadd.f32 %v4037_v53, %v4036_v37  ;;  %v4531_v37 = vld [vmem:[#allocation15 + $0x18] sm:$0xff]  ;;  %v4532_v53 = vld [vmem:[#allocation15 + $0x20] sm:$0xff] }
 0xec6   :  { %4104 = vmatmul.mubr.f32.vlgmr.msra.gmra.mrb[34].mxu0 %v9575_v6  ;;  %6128 = vmatmul.mubr.f32.vlgmr.msra.gmra.mrb[42].mxu1 %v9575_v6 }
 0xec7   :  { %7715 = vmatpush1.bf16.msra.mxu0 %v9234_v39  ;;  %7746 = vmatpush3.bf16.msra.mxu1 %v9272_v27 }
 0xec8   :  { %7717 = vmatprep.subr.bf16.mxu0 %v9238_v44  ;;  %7747 = vmatprep.subr.bf16.mxu1 %v9881_v46 }
 0xec9   :  { %4266 = vmatprep.mubr.f32.mxu0 %v9882_v35  ;;  %6162 = vmatprep.mubr.msk.f32.mxu1 %vm8496_vm0, %v9882_v35 }
 0xecb   :  { %7719 = vmatpush1.bf16.msra.mxu0 %v9240_v54  ;;  %7749 = vmatpush3.bf16.msra.mxu1 %v9283_v16 }
 0xecc   :  { %7721 = vmatprep.subr.bf16.mxu0 %v9244_v59  ;;  %7750 = vmatprep.subr.bf16.mxu1 %v9881_v46 }
 0xecf   :  { %7723 = vmatpush1.bf16.msra.mxu0 %v9246_v4  ;;  %7752 = vmatpush3.bf16.msra.mxu1 %v9289_v41 }
 0xed0   :  { %7725 = vmatprep.subr.bf16.mxu0 %v9250_v14  ;;  %7753 = vmatprep.subr.bf16.mxu1 %v9881_v46 }
 0xed3   :  { %7727 = vmatpush1.bf16.msra.mxu0 %v9252_v23  ;;  %7755 = vmatpush3.bf16.msra.mxu1 %v9292_v49 }
 0xed4   :  { %7729 = vmatprep.subr.bf16.mxu0 %v9256_v48  ;;  %7756 = vmatprep.subr.bf16.mxu1 %v9881_v46 }
 0xed7   :  { %7731 = vmatpush1.bf16.msra.mxu0 %v9258_v33  ;;  %7758 = vmatpush3.bf16.msra.mxu1 %v9296_v58 }
 0xed8   :  { %7733 = vmatprep.subr.bf16.mxu0 %v9262_v42  ;;  %7759 = vmatprep.subr.bf16.mxu1 %v9881_v46 }
 0xedb   :  { %7735 = vmatpush1.bf16.msra.mxu0 %v9264_v55  ;;  %7761 = vmatpush3.bf16.msra.mxu1 %v9300_v9 }
 0xedc   :  { %7737 = vmatprep.subr.bf16.mxu0 %v9268_v47  ;;  %7762 = vmatprep.subr.bf16.mxu1 %v9881_v46 }
 0xedf   :  { %7739 = vmatpush1.bf16.msra.mxu0 %v9270_v38  ;;  %7764 = vmatpush3.bf16.msra.mxu1 %v9304_v22 }
 0xee0   :  { %7741 = vmatprep.subr.bf16.mxu0 %v9275_v34  ;;  %7765 = vmatprep.subr.bf16.mxu1 %v9881_v46 }
 0xee3   :  { %7743 = vmatpush1.bf16.msra.mxu0 %v9281_v19  ;;  %7767 = vmatpush3.bf16.msra.mxu1 %v9308_v32 }
 0xee4   :  { %7769 = vmatprep.subr.bf16.mxu0 %v9232_v5  ;;  %7800 = vmatprep.subr.bf16.mxu1 %v9881_v46 }
 0xf99   :  { %v4105_v43 = vpop.f32.mrb[34].mxu0  ;;  %v4176_v61 = vpop.f32.mrb[42].mxu1 }
 0xf9a   :  { %v8034_v0 = vadd.f32 %v4105_v43, %v9378_v28  ;;  %v4107_v60 = vpop.f32.mrb[35].mxu0  ;;  %v6129_v3 = vpop.f32.mrb[43].mxu1  ;;  %v4194_v5 = vadd.f32 %v9387_v52, %v4176_v61  ;;  %v4533_v43 = vld [vmem:[#allocation15 + $0x28] sm:$0xff] }
 0xf9b   :  { %v8035_v29 = vadd.f32 %v4107_v60, %v9383_v12  ;;  %v9683_v61 = vpack.c.bf16 %v4533_v43, %v4532_v53  ;;  %v4535_v60 = vld [vmem:[#allocation15 + $0x38] sm:$0xff] }
 0xf9c   :  { %v5157_v20 = vmul.f32 -1.442695, %v8034_v0  ;;  %v4534_v0 = vld [vmem:[#allocation15 + $0x30] sm:$0xff] }
 0xf9d   :  { %v5158_v10 = vmul.f32 -1.442695, %v8035_v29  ;;  %v9689_v3 = vpack.c.bf16 %v4535_v60, %v4534_v0  ;;  %v4537_v29 = vld [vmem:[#allocation15 + $0x48] sm:$0xff] }
 0xf9e   :  { %8213 = vpow2.f32 %v5157_v20  ;;  %v4536_v20 = vld [vmem:[#allocation15 + $0x40] sm:$0xff] }
 0xf9f   :  { %8215 = vpow2.f32 %v5158_v10  ;;  %v9695_v10 = vpack.c.bf16 %v4537_v29, %v4536_v20 }
 0xfa8   :  { %v8214_v13 = vpop.eup %8213 }
 0xfa9   :  { %v4184_v18 = vadd.f32 1.0, %v8214_v13  ;;  %v8216_v11 = vpop.eup %8215  ;;  %v4538_v13 = vld [vmem:[#allocation15 + $0x50] sm:$0xff] }
 0xfaa   :  { %v4191_v50 = vadd.f32 1.0, %v8216_v11 }
 0xfab   :  { %8217 = vrcp.f32 %v4184_v18  ;;  %v4539_v18 = vld [vmem:[#allocation15 + $0x58] sm:$0xff] }
 0xfac   :  { %8219 = vrcp.f32 %v4191_v50  ;;  %v9701_v11 = vpack.c.bf16 %v4539_v18, %v4538_v13  ;;  %v4540_v50 = vld [vmem:[#allocation15 + $0x60] sm:$0xff] }
 0xfb5   :  { %v8218_v40 = vpop.eup %8217 }
 0xfb6   :  { %v4195_v31 = vmul.f32 %v8218_v40, %v4194_v5  ;;  %v8220_v21 = vpop.eup %8219  ;;  %v4541_v5 = vld [vmem:[#allocation15 + $0x68] sm:$0xff] }
 0xfb7   :  { %v4198_v63 = vsub.f32 1.0, %v8220_v21  ;;  %v4200_v45 = vmul.f32 %v8220_v21, %v9575_v6  ;;  %v9707_v40 = vpack.c.bf16 %v4541_v5, %v4540_v50 }
 0xfb8   :  { %v4196_v7 = vadd.f32 %v4195_v31, %v3211_v26  ;;  %v4542_v26 = vld [vmem:[#allocation15 + $0x70] sm:$0xff]  ;;  %v4543_v31 = vld [vmem:[#allocation15 + $0x78] sm:$0xff] }
 0xfba   :  { %8221 = vtanh.f32 %v4196_v7  ;;  %v9713_v7 = vpack.c.bf16 %v4543_v31, %v4542_v26 }
 0xfc4   :  { %v8222_v24 = vpop.eup %8221 }
 0xfc5   :  { %v4199_v1 = vmul.f32 %v8222_v24, %v4198_v63 }
 0xfc7   :  { %v9620_v25 = vadd.f32 %v4200_v45, %v4199_v1 }
 0xfc9   :  { %4267 = vmatmul.mubr.f32.vlgmr.msra.gmra.mrb[36].mxu0 %v9620_v25  ;;  %6163 = vmatmul.mubr.f32.vlgmr.msra.gmra.mrb[44].mxu1 %v9620_v25 }
 0xfca   :  { %7771 = vmatpush1.bf16.msra.mxu0 %v9234_v39  ;;  %7802 = vmatpush3.bf16.msra.mxu1 %v9272_v27 }
 0xfcb   :  { %7773 = vmatprep.subr.bf16.mxu0 %v9238_v44  ;;  %7803 = vmatprep.subr.bf16.mxu1 %v9881_v46 }
 0xfcc   :  { %4429 = vmatprep.mubr.f32.mxu0 %v9882_v35  ;;  %6197 = vmatprep.mubr.msk.f32.mxu1 %vm8496_vm0, %v9882_v35 }
 0xfce   :  { %7775 = vmatpush1.bf16.msra.mxu0 %v9240_v54  ;;  %7805 = vmatpush3.bf16.msra.mxu1 %v9283_v16 }
 0xfcf   :  { %7777 = vmatprep.subr.bf16.mxu0 %v9244_v59  ;;  %7806 = vmatprep.subr.bf16.mxu1 %v9881_v46 }
 0xfd2   :  { %7779 = vmatpush1.bf16.msra.mxu0 %v9246_v4  ;;  %7808 = vmatpush3.bf16.msra.mxu1 %v9289_v41 }
 0xfd3   :  { %7781 = vmatprep.subr.bf16.mxu0 %v9250_v14  ;;  %7809 = vmatprep.subr.bf16.mxu1 %v9881_v46 }
 0xfd6   :  { %7783 = vmatpush1.bf16.msra.mxu0 %v9252_v23  ;;  %7811 = vmatpush3.bf16.msra.mxu1 %v9292_v49 }
 0xfd7   :  { %7785 = vmatprep.subr.bf16.mxu0 %v9256_v48  ;;  %7812 = vmatprep.subr.bf16.mxu1 %v9881_v46 }
 0xfda   :  { %7787 = vmatpush1.bf16.msra.mxu0 %v9258_v33  ;;  %7814 = vmatpush3.bf16.msra.mxu1 %v9296_v58  ;;  %v4528_v58 = vld [vmem:[#allocation15] sm:$0xff] }
 0xfdb   :  { %7789 = vmatprep.subr.bf16.mxu0 %v9262_v42  ;;  %7815 = vmatprep.subr.bf16.mxu1 %v9881_v46 }
 0xfde   :  { %7791 = vmatpush1.bf16.msra.mxu0 %v9264_v55  ;;  %7817 = vmatpush3.bf16.msra.mxu1 %v9300_v9  ;;  %v4529_v9 = vld [vmem:[#allocation15 + $0x8] sm:$0xff] }
 0xfdf   :  { %7793 = vmatprep.subr.bf16.mxu0 %v9268_v47  ;;  %7818 = vmatprep.subr.bf16.mxu1 %v9881_v46  ;;  %v9665_v51 = vpack.c.bf16 %v4529_v9, %v4528_v58 }
 0xfe2   :  { %7795 = vmatpush1.bf16.msra.mxu0 %v9270_v38  ;;  %7820 = vmatpush3.bf16.msra.mxu1 %v9304_v22 }
 0xfe3   :  { %7797 = vmatprep.subr.bf16.mxu0 %v9275_v34  ;;  %7821 = vmatprep.subr.bf16.mxu1 %v9881_v46  ;;  %v3216_v34 = vadd.f32 %v9380_v56, %v9390_v36 }
 0xfe6   :  { %7799 = vmatpush1.bf16.msra.mxu0 %v9281_v19  ;;  %7823 = vmatpush3.bf16.msra.mxu1 %v9308_v32 }
 0xfe7   :  { %7824 = vmatprep.subr.bf16.mxu0 %v9881_v46  ;;  %7848 = vmatprep.subr.bf16.mxu1 %v9881_v46 }
0x109c   :  { %v4268_v39 = vpop.f32.mrb[36].mxu0  ;;  %v4339_v44 = vpop.f32.mrb[44].mxu1 }
0x109d   :  { %v8036_v54 = vadd.f32 %v4268_v39, %v9378_v28  ;;  %v4270_v59 = vpop.f32.mrb[37].mxu0  ;;  %v6164_v4 = vpop.f32.mrb[45].mxu1  ;;  %v4357_v38 = vadd.f32 %v9387_v52, %v4339_v44  ;;  %v4530_v52 = vld [vmem:[#allocation15 + $0x10] sm:$0xff] }
0x109e   :  { %v8037_v23 = vadd.f32 %v4270_v59, %v9383_v12  ;;  %v9673_v56 = vpack.c.bf16 %v4531_v37, %v4530_v52  ;;  %v5163_v59 = vld [vmem:[#allocation16] ss:$0 sm:$0xff] }
0x109f   :  { %v5159_v14 = vmul.f32 -1.442695, %v8036_v54  ;;  %v3221_v54 = vadd.f32 %v9375_v57, %v9390_v36 }
0x10a0   :  { %v5160_v48 = vmul.f32 -1.442695, %v8037_v23 }
0x10a1   :  { %8223 = vpow2.f32 %v5159_v14 }
0x10a2   :  { %8225 = vpow2.f32 %v5160_v48 }
0x10ab   :  { %v8224_v33 = vpop.eup %8223 }
0x10ac   :  { %v4347_v42 = vadd.f32 1.0, %v8224_v33  ;;  %v8226_v55 = vpop.eup %8225 }
0x10ad   :  { %v4354_v47 = vadd.f32 1.0, %v8226_v55 }
0x10ae   :  { %8227 = vrcp.f32 %v4347_v42 }
0x10af   :  { %8229 = vrcp.f32 %v4354_v47 }
0x10b8   :  { %v8228_v27 = vpop.eup %8227 }
0x10b9   :  { %v4358_v19 = vmul.f32 %v8228_v27, %v4357_v38  ;;  %v8230_v41 = vpop.eup %8229 }
0x10ba   :  { %v4361_v49 = vsub.f32 1.0, %v8230_v41  ;;  %v4363_v15 = vmul.f32 %v8230_v41, %v9620_v25 }
0x10bb   :  { %v4359_v16 = vadd.f32 %v4358_v19, %v3216_v34 }
0x10bd   :  { %8231 = vtanh.f32 %v4359_v16 }
0x10c7   :  { %v8232_v22 = vpop.eup %8231 }
0x10c8   :  { %v4362_v32 = vmul.f32 %v8232_v22, %v4361_v49 }
0x10ca   :  { %v9667_v2 = vadd.f32 %v4363_v15, %v4362_v32 }
0x10cc   :  { %4430 = vmatmul.mubr.f32.vlgmr.msra.gmra.mrb[38].mxu0 %v9667_v2  ;;  %6198 = vmatmul.mubr.f32.vlgmr.msra.gmra.mrb[46].mxu1 %v9667_v2 }
0x10cd   :  { %7826 = vmatpush3.bf16.msra.mxu0 %v9665_v51  ;;  %7850 = vmatpush3.bf16.msra.mxu1 %v9665_v51 }
0x10ce   :  { %7827 = vmatprep.subr.bf16.mxu0 %v9881_v46  ;;  %7851 = vmatprep.subr.bf16.mxu1 %v9881_v46 }
0x10cf   :  { %6232 = vmatprep.mubr.msk.f32.mxu0 %vm8496_vm0, %v9882_v35  ;;  %6267 = vmatprep.mubr.msk.f32.mxu1 %vm8496_vm0, %v9882_v35 }
0x10d1   :  { %7829 = vmatpush3.bf16.msra.mxu0 %v9673_v56  ;;  %7853 = vmatpush3.bf16.msra.mxu1 %v9673_v56 }
0x10d2   :  { %7830 = vmatprep.subr.bf16.mxu0 %v9881_v46  ;;  %7854 = vmatprep.subr.bf16.mxu1 %v9881_v46 }
0x10d5   :  { %7832 = vmatpush3.bf16.msra.mxu0 %v9683_v61  ;;  %7856 = vmatpush3.bf16.msra.mxu1 %v9683_v61 }
0x10d6   :  { %7833 = vmatprep.subr.bf16.mxu0 %v9881_v46  ;;  %7857 = vmatprep.subr.bf16.mxu1 %v9881_v46 }
0x10d9   :  { %7835 = vmatpush3.bf16.msra.mxu0 %v9689_v3  ;;  %7859 = vmatpush3.bf16.msra.mxu1 %v9689_v3 }
0x10da   :  { %7836 = vmatprep.subr.bf16.mxu0 %v9881_v46  ;;  %7860 = vmatprep.subr.bf16.mxu1 %v9881_v46 }
0x10dd   :  { %7838 = vmatpush3.bf16.msra.mxu0 %v9695_v10  ;;  %7862 = vmatpush3.bf16.msra.mxu1 %v9695_v10 }
0x10de   :  { %7839 = vmatprep.subr.bf16.mxu0 %v9881_v46  ;;  %7863 = vmatprep.subr.bf16.mxu1 %v9881_v46 }
0x10e1   :  { %7841 = vmatpush3.bf16.msra.mxu0 %v9701_v11  ;;  %7865 = vmatpush3.bf16.msra.mxu1 %v9701_v11 }
0x10e2   :  { %7842 = vmatprep.subr.bf16.mxu0 %v9881_v46  ;;  %7866 = vmatprep.subr.bf16.mxu1 %v9881_v46 }
0x10e5   :  { %7844 = vmatpush3.bf16.msra.mxu0 %v9707_v40  ;;  %7868 = vmatpush3.bf16.msra.mxu1 %v9707_v40 }
0x10e6   :  { %7845 = vmatprep.subr.bf16.mxu0 %v9881_v46  ;;  %7869 = vmatprep.subr.bf16.mxu1 %v9881_v46 }
0x10e9   :  { %7847 = vmatpush3.bf16.msra.mxu0 %v9713_v7  ;;  %7871 = vmatpush3.bf16.msra.mxu1 %v9713_v7 }
0x10ea   :  { %7872 = vmatprep.subr.bf16.mxu0 %v9881_v46  ;;  %7896 = vmatprep.subr.bf16.mxu1 %v9881_v46 }
0x10ec   :  { %6233 = vmatmul.mubr.f32.vlgmr.msra.gmra.mrb[40].mxu0 %v9395_v8  ;;  %6268 = vmatmul.mubr.f32.vlgmr.msra.gmra.mrb[48].mxu1 %v9440_v17 }
0x10ed   :  { %7874 = vmatpush3.bf16.msra.mxu0 %v9665_v51  ;;  %7898 = vmatpush3.bf16.msra.mxu1 %v9665_v51 }
0x10ee   :  { %7875 = vmatprep.subr.bf16.mxu0 %v9881_v46  ;;  %7899 = vmatprep.subr.bf16.mxu1 %v9881_v46 }
0x10ef   :  { %6302 = vmatprep.mubr.msk.f32.mxu0 %vm8496_vm0, %v9882_v35  ;;  %6337 = vmatprep.mubr.msk.f32.mxu1 %vm8496_vm0, %v9882_v35 }
0x10f1   :  { %7877 = vmatpush3.bf16.msra.mxu0 %v9673_v56  ;;  %7901 = vmatpush3.bf16.msra.mxu1 %v9673_v56 }
0x10f2   :  { %7878 = vmatprep.subr.bf16.mxu0 %v9881_v46  ;;  %7902 = vmatprep.subr.bf16.mxu1 %v9881_v46 }
0x10f5   :  { %7880 = vmatpush3.bf16.msra.mxu0 %v9683_v61  ;;  %7904 = vmatpush3.bf16.msra.mxu1 %v9683_v61 }
0x10f6   :  { %7881 = vmatprep.subr.bf16.mxu0 %v9881_v46  ;;  %7905 = vmatprep.subr.bf16.mxu1 %v9881_v46 }
0x10f9   :  { %7883 = vmatpush3.bf16.msra.mxu0 %v9689_v3  ;;  %7907 = vmatpush3.bf16.msra.mxu1 %v9689_v3 }
0x10fa   :  { %7884 = vmatprep.subr.bf16.mxu0 %v9881_v46  ;;  %7908 = vmatprep.subr.bf16.mxu1 %v9881_v46 }
0x10fd   :  { %7886 = vmatpush3.bf16.msra.mxu0 %v9695_v10  ;;  %7910 = vmatpush3.bf16.msra.mxu1 %v9695_v10 }
0x10fe   :  { %7887 = vmatprep.subr.bf16.mxu0 %v9881_v46  ;;  %7911 = vmatprep.subr.bf16.mxu1 %v9881_v46 }
0x1101   :  { %7889 = vmatpush3.bf16.msra.mxu0 %v9701_v11  ;;  %7913 = vmatpush3.bf16.msra.mxu1 %v9701_v11 }
0x1102   :  { %7890 = vmatprep.subr.bf16.mxu0 %v9881_v46  ;;  %7914 = vmatprep.subr.bf16.mxu1 %v9881_v46 }
0x1105   :  { %7892 = vmatpush3.bf16.msra.mxu0 %v9707_v40  ;;  %7916 = vmatpush3.bf16.msra.mxu1 %v9707_v40 }
0x1106   :  { %7893 = vmatprep.subr.bf16.mxu0 %v9881_v46  ;;  %7917 = vmatprep.subr.bf16.mxu1 %v9881_v46 }
0x1109   :  { %7895 = vmatpush3.bf16.msra.mxu0 %v9713_v7  ;;  %7919 = vmatpush3.bf16.msra.mxu1 %v9713_v7 }
0x110a   :  { %7920 = vmatprep.subr.bf16.mxu0 %v9881_v46  ;;  %7944 = vmatprep.subr.bf16.mxu1 %v9881_v46 }
0x110c   :  { %6303 = vmatmul.mubr.f32.vlgmr.msra.gmra.mrb[42].mxu0 %v9485_v30  ;;  %6338 = vmatmul.mubr.f32.vlgmr.msra.gmra.mrb[50].mxu1 %v9530_v62 }
0x110d   :  { %7922 = vmatpush3.bf16.msra.mxu0 %v9665_v51  ;;  %7946 = vmatpush3.bf16.msra.mxu1 %v9665_v51 }
0x110e   :  { %7923 = vmatprep.subr.bf16.mxu0 %v9881_v46  ;;  %7947 = vmatprep.subr.bf16.mxu1 %v9881_v46 }
0x110f   :  { %6372 = vmatprep.mubr.msk.f32.mxu0 %vm8496_vm0, %v9882_v35  ;;  %6407 = vmatprep.mubr.msk.f32.mxu1 %vm8496_vm0, %v9882_v35 }
0x1111   :  { %7925 = vmatpush3.bf16.msra.mxu0 %v9673_v56  ;;  %7949 = vmatpush3.bf16.msra.mxu1 %v9673_v56 }
0x1112   :  { %7926 = vmatprep.subr.bf16.mxu0 %v9881_v46  ;;  %7950 = vmatprep.subr.bf16.mxu1 %v9881_v46 }
0x1115   :  { %7928 = vmatpush3.bf16.msra.mxu0 %v9683_v61  ;;  %7952 = vmatpush3.bf16.msra.mxu1 %v9683_v61 }
0x1116   :  { %7929 = vmatprep.subr.bf16.mxu0 %v9881_v46  ;;  %7953 = vmatprep.subr.bf16.mxu1 %v9881_v46 }
0x1119   :  { %7931 = vmatpush3.bf16.msra.mxu0 %v9689_v3  ;;  %7955 = vmatpush3.bf16.msra.mxu1 %v9689_v3 }
0x111a   :  { %7932 = vmatprep.subr.bf16.mxu0 %v9881_v46  ;;  %7956 = vmatprep.subr.bf16.mxu1 %v9881_v46 }
0x111d   :  { %7934 = vmatpush3.bf16.msra.mxu0 %v9695_v10  ;;  %7958 = vmatpush3.bf16.msra.mxu1 %v9695_v10 }
0x111e   :  { %7935 = vmatprep.subr.bf16.mxu0 %v9881_v46  ;;  %7959 = vmatprep.subr.bf16.mxu1 %v9881_v46 }
0x1121   :  { %7937 = vmatpush3.bf16.msra.mxu0 %v9701_v11  ;;  %7961 = vmatpush3.bf16.msra.mxu1 %v9701_v11 }
0x1122   :  { %7938 = vmatprep.subr.bf16.mxu0 %v9881_v46  ;;  %7962 = vmatprep.subr.bf16.mxu1 %v9881_v46 }
0x1125   :  { %7940 = vmatpush3.bf16.msra.mxu0 %v9707_v40  ;;  %7964 = vmatpush3.bf16.msra.mxu1 %v9707_v40 }
0x1126   :  { %7941 = vmatprep.subr.bf16.mxu0 %v9881_v46  ;;  %7965 = vmatprep.subr.bf16.mxu1 %v9881_v46 }
0x1129   :  { %7943 = vmatpush3.bf16.msra.mxu0 %v9713_v7  ;;  %7967 = vmatpush3.bf16.msra.mxu1 %v9713_v7 }
0x112a   :  { %7968 = vmatprep.subr.bf16.mxu0 %v9881_v46  ;;  %7992 = vmatprep.subr.bf16.mxu1 %v9881_v46 }
0x112c   :  { %6373 = vmatmul.mubr.f32.vlgmr.msra.gmra.mrb[44].mxu0 %v9575_v6  ;;  %6408 = vmatmul.mubr.f32.vlgmr.msra.gmra.mrb[52].mxu1 %v9620_v25  ;;  %v8245_v25 = vld [vmem:[#allocation13] ss:$0 sm:$0xff] }
0x112d   :  { %7970 = vmatpush3.bf16.msra.mxu0 %v9665_v51  ;;  %6442 = vmatprep.mubr.msk.f32.mxu0 %vm8496_vm0, %v9882_v35 }
0x112e   :  { %7971 = vmatprep.subr.bf16.mxu0 %v9881_v46  ;;  %7994 = vmatpush3.bf16.msra.mxu1 %v9665_v51 }
0x112f   :  { %7995 = vmatprep.subr.bf16.mxu1 %v9881_v46  ;;  %6477 = vmatprep.mubr.msk.f32.mxu1 %vm8496_vm0, %v9882_v35 }
0x1131   :  { %7973 = vmatpush3.bf16.msra.mxu0 %v9673_v56 }
0x1132   :  { %7974 = vmatprep.subr.bf16.mxu0 %v9881_v46  ;;  %7997 = vmatpush3.bf16.msra.mxu1 %v9673_v56 }
0x1133   :  { %7998 = vmatprep.subr.bf16.mxu1 %v9881_v46 }
0x1135   :  { %7976 = vmatpush3.bf16.msra.mxu0 %v9683_v61 }
0x1136   :  { %7977 = vmatprep.subr.bf16.mxu0 %v9881_v46  ;;  %8000 = vmatpush3.bf16.msra.mxu1 %v9683_v61 }
0x1137   :  { %8001 = vmatprep.subr.bf16.mxu1 %v9881_v46 }
0x1139   :  { %7979 = vmatpush3.bf16.msra.mxu0 %v9689_v3 }
0x113a   :  { %7980 = vmatprep.subr.bf16.mxu0 %v9881_v46  ;;  %8003 = vmatpush3.bf16.msra.mxu1 %v9689_v3 }
0x113b   :  { %8004 = vmatprep.subr.bf16.mxu1 %v9881_v46 }
0x113d   :  { %7982 = vmatpush3.bf16.msra.mxu0 %v9695_v10 }
0x113e   :  { %7983 = vmatprep.subr.bf16.mxu0 %v9881_v46  ;;  %8006 = vmatpush3.bf16.msra.mxu1 %v9695_v10 }
0x113f   :  { %8007 = vmatprep.subr.bf16.mxu1 %v9881_v46 }
0x1141   :  { %7985 = vmatpush3.bf16.msra.mxu0 %v9701_v11 }
0x1142   :  { %7986 = vmatprep.subr.bf16.mxu0 %v9881_v46  ;;  %8009 = vmatpush3.bf16.msra.mxu1 %v9701_v11 }
0x1143   :  { %8010 = vmatprep.subr.bf16.mxu1 %v9881_v46 }
0x1145   :  { %7988 = vmatpush3.bf16.msra.mxu0 %v9707_v40 }
0x1146   :  { %7989 = vmatprep.subr.bf16.mxu0 %v9881_v46  ;;  %8012 = vmatpush3.bf16.msra.mxu1 %v9707_v40 }
0x1147   :  { %8013 = vmatprep.subr.bf16.mxu1 %v9881_v46 }
0x1149   :  { %7991 = vmatpush3.bf16.msra.mxu0 %v9713_v7 }
0x114a   :  { %8015 = vmatpush3.bf16.msra.mxu1 %v9713_v7 }
0x114c   :  { %6443 = vmatmul.mubr.f32.vlgmr.msra.gmra.mrb[46].mxu0 %v9667_v2 }
0x119f   :  { %v4431_v35 = vpop.f32.mrb[38].mxu0  ;;  %v4502_v8 = vpop.f32.mrb[46].mxu1 }
0x11a0   :  { %v8038_v17 = vadd.f32 %v4431_v35, %v9378_v28  ;;  %v4433_v30 = vpop.f32.mrb[39].mxu0  ;;  %v6199_v62 = vpop.f32.mrb[47].mxu1  ;;  %v4520_v39 = vadd.f32 %v8245_v25, %v4502_v8 }
0x11a1   :  { %v8039_v21 = vadd.f32 %v4433_v30, %v9383_v12 }
0x11a2   :  { %v5161_v6 = vmul.f32 -1.442695, %v8038_v17 }
0x11a3   :  { %v5162_v63 = vmul.f32 -1.442695, %v8039_v21 }
0x11a4   :  { %8233 = vpow2.f32 %v5161_v6 }
0x11a5   :  { %8235 = vpow2.f32 %v5162_v63 }
0x11ae   :  { %v8234_v24 = vpop.eup %8233 }
0x11af   :  { %v4510_v46 = vadd.f32 1.0, %v8234_v24  ;;  %v8236_v1 = vpop.eup %8235 }
0x11b0   :  { %v4517_v45 = vadd.f32 1.0, %v8236_v1 }
0x11b1   :  { %8237 = vrcp.f32 %v4510_v46 }
0x11b2   :  { %8239 = vrcp.f32 %v4517_v45 }
0x11bb   :  { %v8238_v44 = vpop.eup %8237 }
0x11bc   :  { %v4521_v28 = vmul.f32 %v8238_v44, %v4520_v39  ;;  %v8240_v57 = vpop.eup %8239 }
0x11bd   :  { %v4524_v36 = vsub.f32 1.0, %v8240_v57  ;;  %v4526_v38 = vmul.f32 %v8240_v57, %v9667_v2 }
0x11be   :  { %v4522_v4 = vadd.f32 %v4521_v28, %v3221_v54 }
0x11bf   :  { %v4617_v14 = vpop.f32.mrb[40].mxu0  ;;  %v4687_v12 = vpop.f32.mrb[48].mxu1 }
0x11c0   :  { %8241 = vtanh.f32 %v4522_v4  ;;  %v4618_v23 = vadd.f32 %v5163_v59, %v4617_v14  ;;  %v4688_v48 = vadd.f32 %v5163_v59, %v4687_v12  ;;  %v6234_v33 = vpop.f32.mrb[41].mxu0  ;;  %v6269_v42 = vpop.f32.mrb[49].mxu1 }
0x11c2   :  { %5111 = vst [vmem:[%s9874_s11] sm:$0xff] %v4618_v23  ;;  %5112 = vst [vmem:[%s9874_s11 + $0x8] sm:$0xff] %v4688_v48 }
0x11ca   :  { %v8242_v55 = vpop.eup %8241 }
0x11cb   :  { %v4525_v47 = vmul.f32 %v8242_v55, %v4524_v36 }
0x11cd   :  { %v4527_v27 = vadd.f32 %v4526_v38, %v4525_v47 }
0x11cf   :  { %6478 = vmatmul.mubr.f32.vlgmr.msra.gmra.mrb[54].mxu1 %v4527_v27 }
0x11df   :  { %v4757_v34 = vpop.f32.mrb[42].mxu0  ;;  %v4827_v19 = vpop.f32.mrb[50].mxu1 }
0x11e0   :  { %v4758_v16 = vadd.f32 %v5163_v59, %v4757_v34  ;;  %v4828_v41 = vadd.f32 %v5163_v59, %v4827_v19  ;;  %v6304_v49 = vpop.f32.mrb[43].mxu0  ;;  %v6339_v58 = vpop.f32.mrb[51].mxu1 }
0x11e2   :  { %5113 = vst [vmem:[%s9874_s11 + $0x10] sm:$0xff] %v4758_v16  ;;  %5114 = vst [vmem:[%s9874_s11 + $0x18] sm:$0xff] %v4828_v41 }
0x11ff   :  { %v4897_v9 = vpop.f32.mrb[44].mxu0  ;;  %v4967_v22 = vpop.f32.mrb[52].mxu1 }
0x1200   :  { %v4898_v32 = vadd.f32 %v5163_v59, %v4897_v9  ;;  %v4968_v15 = vadd.f32 %v5163_v59, %v4967_v22  ;;  %v6374_v51 = vpop.f32.mrb[45].mxu0  ;;  %v6409_v2 = vpop.f32.mrb[53].mxu1 }
0x1202   :  { %5115 = vst [vmem:[%s9874_s11 + $0x20] sm:$0xff] %v4898_v32  ;;  %5116 = vst [vmem:[%s9874_s11 + $0x28] sm:$0xff] %v4968_v15 }
0x121f   :  { %v5037_v52 = vpop.f32.mrb[46].mxu0 }
0x1220   :  { %v5038_v37 = vadd.f32 %v5163_v59, %v5037_v52  ;;  %v6444_v56 = vpop.f32.mrb[47].mxu0 }
0x1222   :  { %5117 = vst [vmem:[%s9874_s11 + $0x30] sm:$0xff] %v5038_v37 }
0x12a2   :  { %v5107_v53 = vpop.f32.mrb[54].mxu1 }
0x12a3   :  { %v5108_v43 = vadd.f32 %v5163_v59, %v5107_v53  ;;  %v6479_v61 = vpop.f32.mrb[55].mxu1 }
0x12a5   :  { %5118 = vst [vmem:[%s9874_s11 + $0x38] sm:$0xff] %v5108_v43 }
0x12a6   :  { %5123 = vsyncpa [#allocation3], 1 }
0x12a7   :  { %5124 = vsyncpa [#allocation5], 1 }
0x12a8   :  { %5125 = vsyncpa [#allocation8], 1 }
0x12a9   :  { %5126 = vsyncpa [#allocation11], 1 }
0x12aa   :  { %5127 = vsyncpa [#allocation14], 1 }
0x12ab   :  { %5128 = vsyncpa [#allocation17], 1 }

</bundles_post_ra>
